<compile_context>
chip_gen: v7x
topology: tpu7x:2x2x1
jax: 0.10.0
libtpu: 0.0.40
codegen_flags: <defaults>
</compile_context>

<pallas_src>
import functools

import jax
import jax.numpy as jnp
from jax.experimental import pallas as pl
from jax.experimental.pallas import tpu as pltpu

LRELU_SLOPE = 0.2
EPS = 1e-5  # torch.nn.InstanceNorm2d default


def _packed_conv3x3(patch_fn, wv_ref, C):
    """9-tap MAC over lane-packed planes.

    patch_fn(ky, kx) -> [H, P] plane where lane j = ci*seg + w holds the
    ci-channel input pixel needed by output pixel w for tap (ky, kx).
    wv_ref: [C*9, P] VMEM; row co*9 + tap holds w[co, ci, ky, kx] replicated
    across channel ci's lane segment, so one vmul covers all input channels.

    Returns C accumulator planes [H, P]; the caller does the cross-ci
    lane-segment reduction.  Two partial chains per output channel (2*C
    independent MAC chains) keep the 4 VALU slots busy with few live vregs.
    """
    acc_a = [None] * C
    acc_b = [None] * C
    for tap in range(9):
        ky, kx = tap // 3, tap % 3
        patch = patch_fn(ky, kx)                 # hoisted: shared by all co
        for co in range(C):
            term = patch * wv_ref[co * 9 + tap, :]
            if tap % 2 == 0:
                acc_a[co] = term if acc_a[co] is None else acc_a[co] + term
            else:
                acc_b[co] = term if acc_b[co] is None else acc_b[co] + term
    return [acc_a[co] + acc_b[co] for co in range(C)]


def _resblock_kernel(x_ref, wv1_ref, wv2_ref, b1_ref, b2_ref, o_ref, yp_s,
                     *, C, H, W, d, NB):
    """Fused: conv1(3x3, dil d, pre-padded input) -> LeakyReLU -> reflect-pad
    -> conv2(3x3) -> InstanceNorm2d -> + residual.  NB images per grid step.

    x_ref : [NB, H+2d, C*(W+2d)]  VMEM  (reflect-padded, channel-lane-packed)
    wv*_ref: [C*9, P*]            VMEM  (pre-expanded per-lane weight rows)
    b*_ref : [C]                  SMEM
    o_ref : [NB, H, C*W]          VMEM  (channel-lane-packed output)
    yp_s  : [H+2, C*(W+2)]        VMEM scratch (padded conv1 output)
    """
    seg1 = W + 2 * d          # per-channel lane-segment width, padded input
    seg2 = W + 2              # per-channel lane-segment width, padded conv1 out
    P1 = C * seg1 - 2 * d     # packed patch width, conv1
    P2 = C * seg2 - 2         # packed patch width, conv2
    inv_hw = 1.0 / float(H * W)

    for img in range(NB):
        # ---- conv1: 3x3, dilation d, over the pre-padded lane-packed input --
        acc1 = _packed_conv3x3(
            lambda ky, kx: x_ref[img, ky * d:ky * d + H, kx * d:kx * d + P1],
            wv1_ref, C)

        # cross-ci lane-segment reduce, + bias, LeakyReLU(0.2); reflect-pad the
        # columns in-register and write each channel's padded plane into yp_s.
        for co in range(C):
            yco = acc1[co][:, 0:W]
            for ci in range(1, C):
                yco = yco + acc1[co][:, ci * seg1:ci * seg1 + W]
            yco = yco + b1_ref[co]
            yco = jnp.where(yco > 0, yco, LRELU_SLOPE * yco)
            yco_p = jnp.concatenate(
                [yco[:, 1:2], yco, yco[:, W - 2:W - 1]], axis=1)   # [H, W+2]
            yp_s[1:1 + H, co * seg2:(co + 1) * seg2] = yco_p
        # reflect-pad rows: two full-lane-width copies cover every channel.
        # (Self-aliasing ref copies are correct under sequential semantics.)
        yp_s[0:1, :] = yp_s[2:3, :]
        yp_s[H + 1:H + 2, :] = yp_s[H - 1:H, :]

        # ---- conv2: 3x3, dilation 1, over the packed padded conv1 output ----
        acc2 = _packed_conv3x3(
            lambda ky, kx: yp_s[ky:ky + H, kx:kx + P2], wv2_ref, C)

        # ---- InstanceNorm2d (one-pass stats) + residual ----------------------
        outs = []
        for co in range(C):
            zc = acc2[co][:, 0:W]
            for ci in range(1, C):
                zc = zc + acc2[co][:, ci * seg2:ci * seg2 + W]
            zc = zc + b2_ref[co]
            s = jnp.sum(zc)
            ss = jnp.sum(zc * zc)
            mean = s * inv_hw
            var = jnp.maximum(ss * inv_hw - mean * mean, 0.0)   # biased var
            normed = (zc - mean) * jax.lax.rsqrt(var + EPS)
            res = x_ref[img, d:d + H, co * seg1 + d:co * seg1 + d + W]
            outs.append(normed + res)
        # single lane-dense store per image: [H, C*W]
        o_ref[img] = jnp.concatenate(outs, axis=-1).astype(o_ref.dtype)


def _pack_reflect_pad(x, pad):
    """[N, C, H, W] -> [N, H+2p, C*(W+2p)]: reflect-pad, pack channels on lanes."""
    N, C, H, W = x.shape
    xp = jnp.pad(x, ((0, 0), (0, 0), (pad, pad), (pad, pad)), mode="reflect")
    xp = jnp.transpose(xp, (0, 2, 1, 3))
    return xp.reshape(N, H + 2 * pad, C * (W + 2 * pad))


def _expand_weight_lanes(w, W, pad):
    """[C, C, 3, 3] OIHW -> [C*9, C*(W+2p) - 2p] per-lane weight rows.

    Row co*9 + (3*ky + kx) holds w[co, ci, ky, kx] replicated across channel
    ci's lane segment [ci*(W+2p), (ci+1)*(W+2p)).
    """
    C = w.shape[0]
    seg = W + 2 * pad
    wt = jnp.transpose(w, (0, 2, 3, 1)).reshape(C, 9, C)    # [co, tap, ci]
    wt = jnp.repeat(wt, seg, axis=2)                        # [co, tap, C*seg]
    return wt.reshape(C * 9, C * seg)[:, :C * seg - 2 * pad]


def residual_block(x, w1, b1, w2, b2, *, dilation=1, images_per_step=1):
    """x: [N, C, H, W]  w*: [C, C, 3, 3] (OIHW)  b*: [C]  ->  [N, C, H, W]

    images_per_step: images processed per grid step.  1 keeps grid=(N,)
    "parallel" (both v7x TensorCores busy); >1 amortizes grid-step overhead
    on single-TC v5e/v6e.
    """
    N, C, H, W = x.shape
    d = dilation
    if not (0 < d < H and d < W):
        raise ValueError("reflect padding requires 0 < dilation < min(H, W)")
    NB = images_per_step
    if N % NB != 0:
        raise ValueError("images_per_step must divide the batch size")

    x = x.astype(jnp.float32)
    xpk = _pack_reflect_pad(x, d)                              # [N, H+2d, C*(W+2d)]
    wv1 = _expand_weight_lanes(w1.astype(jnp.float32), W, d)   # [C*9, P1]
    wv2 = _expand_weight_lanes(w2.astype(jnp.float32), W, 1)   # [C*9, P2]

    Cp1 = C * (W + 2 * d)
    P1 = Cp1 - 2 * d
    P2 = C * (W + 2) - 2

    out_packed = pl.pallas_call(
        functools.partial(_resblock_kernel, C=C, H=H, W=W, d=d, NB=NB),
        out_shape=jax.ShapeDtypeStruct((N, H, C * W), jnp.float32),
        grid=(N // NB,),
        in_specs=[
            pl.BlockSpec((NB, H + 2 * d, Cp1), lambda n: (n, 0, 0)),
            pl.BlockSpec((C * 9, P1), lambda n: (0, 0)),
            pl.BlockSpec((C * 9, P2), lambda n: (0, 0)),
            pl.BlockSpec(memory_space=pltpu.MemorySpace.SMEM),
            pl.BlockSpec(memory_space=pltpu.MemorySpace.SMEM),
        ],
        out_specs=pl.BlockSpec((NB, H, C * W), lambda n: (n, 0, 0)),
        scratch_shapes=[
            pltpu.VMEM((H + 2, C * (W + 2)), jnp.float32),   # padded conv1 out
        ],
        compiler_params=pltpu.CompilerParams(
            dimension_semantics=("parallel",)),
    )(xpk, wv1, wv2, b1.astype(jnp.float32), b2.astype(jnp.float32))

    # unpack [N, H, C*W] -> [N, C, H, W]
    return out_packed.reshape(N, H, C, W).transpose(0, 2, 1, 3)


def _ref_forward(x, w1, b1, w2, b2, dilation):
    """Pure-JAX reference of the PyTorch forward (for verification)."""
    d = dilation
    dn = ("NCHW", "OIHW", "NCHW")
    xp = jnp.pad(x, ((0, 0), (0, 0), (d, d), (d, d)), mode="reflect")
    y = jax.lax.conv_general_dilated(
        xp, w1, window_strides=(1, 1), padding="VALID",
        rhs_dilation=(d, d), dimension_numbers=dn)
    y = y + b1[None, :, None, None]
    y = jnp.where(y > 0, y, LRELU_SLOPE * y)
    yp = jnp.pad(y, ((0, 0), (0, 0), (1, 1), (1, 1)), mode="reflect")
    z = jax.lax.conv_general_dilated(
        yp, w2, window_strides=(1, 1), padding="VALID", dimension_numbers=dn)
    z = z + b2[None, :, None, None]
    mean = z.mean(axis=(2, 3), keepdims=True)
    var = ((z - mean) ** 2).mean(axis=(2, 3), keepdims=True)
    zn = (z - mean) / jnp.sqrt(var + EPS)
    return zn + x


if __name__ == "__main__":
    N, C, H, W = 2, 4, 16, 16
    key = jax.random.PRNGKey(0)
    kx_, k1, k2, k3, k4 = jax.random.split(key, 5)

    x = jax.random.normal(kx_, (N, C, H, W), dtype=jnp.float32)
    w1 = 0.2 * jax.random.normal(k1, (C, C, 3, 3), dtype=jnp.float32)
    b1 = 0.1 * jax.random.normal(k2, (C,), dtype=jnp.float32)
    w2 = 0.2 * jax.random.normal(k3, (C, C, 3, 3), dtype=jnp.float32)
    b2 = 0.1 * jax.random.normal(k4, (C,), dtype=jnp.float32)

    fwd = jax.jit(residual_block,
                  static_argnames=("dilation", "images_per_step"))

    for dilation in (1, 2):
        ref = _ref_forward(x, w1, b1, w2, b2, dilation)
        for nb in (1, 2):   # nb=1: v7x-friendly grid of 2; nb=2: v5e/v6e batching
            out = jax.block_until_ready(
                fwd(x, w1, b1, w2, b2, dilation=dilation, images_per_step=nb))
            assert out.shape == (N, C, H, W) and out.dtype == jnp.float32
            err = jnp.max(jnp.abs(out - ref))
            assert jnp.allclose(out, ref, atol=1e-3, rtol=1e-3), (
                f"mismatch (dilation={dilation}, images_per_step={nb}): {err}")

    print("KERNEL_OK")
</pallas_src>

<mosaic_0001>
module attributes {stable_mosaic.version = 11 : i64} {
  func.func @_resblock_kernel(%arg0: i32, %arg1: memref<1x18x72xf32, #tpu.memory_space<vmem>>, %arg2: memref<36x70xf32, #tpu.memory_space<vmem>>, %arg3: memref<36x70xf32, #tpu.memory_space<vmem>>, %arg4: memref<4xf32, #tpu.memory_space<smem>>, %arg5: memref<4xf32, #tpu.memory_space<smem>>, %arg6: memref<1x16x64xf32, #tpu.memory_space<vmem>>, %arg7: memref<18x72xf32, #tpu.memory_space<vmem>>) attributes {dimension_semantics = [#tpu.dimension_semantics<parallel>], iteration_bounds = array<i64: 2>, scalar_prefetch = 0 : i64, scratch_operands = 1 : i64, tpu.core_type = #tpu.core_type<tc>, window_params = [{transform_indices = @transform_0, window_bounds = array<i64: 1, 18, 72>}, {pipeline_mode = #tpu.pipeline_mode<synchronous>, transform_indices = @transform_1, window_bounds = array<i64: 36, 70>}, {pipeline_mode = #tpu.pipeline_mode<synchronous>, transform_indices = @transform_2, window_bounds = array<i64: 36, 70>}, {transform_indices = @transform_3, window_bounds = array<i64: 4>}, {transform_indices = @transform_4, window_bounds = array<i64: 4>}, {transform_indices = @transform_5, window_bounds = array<i64: 1, 16, 64>}]} {
    %c0 = arith.constant 0 : index
    %c0_0 = arith.constant 0 : index
    %c0_1 = arith.constant 0 : index
    %0 = vector.load %arg1[%c0, %c0_0, %c0_1] : memref<1x18x72xf32, #tpu.memory_space<vmem>>, vector<1x16x70xf32>
    %1 = vector.shape_cast %0 : vector<1x16x70xf32> to vector<16x70xf32>
    %c0_2 = arith.constant 0 : index
    %c0_3 = arith.constant 0 : index
    %2 = vector.load %arg2[%c0_2, %c0_3] : memref<36x70xf32, #tpu.memory_space<vmem>>, vector<1x70xf32>
    %3 = vector.shape_cast %2 : vector<1x70xf32> to vector<70xf32>
    %4 = vector.shape_cast %3 : vector<70xf32> to vector<1x70xf32>
    %5 = vector.broadcast %4 : vector<1x70xf32> to vector<16x70xf32>
    %6 = arith.mulf %1, %5 : vector<16x70xf32>
    %c9 = arith.constant 9 : index
    %c0_4 = arith.constant 0 : index
    %7 = vector.load %arg2[%c9, %c0_4] : memref<36x70xf32, #tpu.memory_space<vmem>>, vector<1x70xf32>
    %8 = vector.shape_cast %7 : vector<1x70xf32> to vector<70xf32>
    %9 = vector.shape_cast %8 : vector<70xf32> to vector<1x70xf32>
    %10 = vector.broadcast %9 : vector<1x70xf32> to vector<16x70xf32>
    %11 = arith.mulf %1, %10 : vector<16x70xf32>
    %c18 = arith.constant 18 : index
    %c0_5 = arith.constant 0 : index
    %12 = vector.load %arg2[%c18, %c0_5] : memref<36x70xf32, #tpu.memory_space<vmem>>, vector<1x70xf32>
    %13 = vector.shape_cast %12 : vector<1x70xf32> to vector<70xf32>
    %14 = vector.shape_cast %13 : vector<70xf32> to vector<1x70xf32>
    %15 = vector.broadcast %14 : vector<1x70xf32> to vector<16x70xf32>
    %16 = arith.mulf %1, %15 : vector<16x70xf32>
    %c27 = arith.constant 27 : index
    %c0_6 = arith.constant 0 : index
    %17 = vector.load %arg2[%c27, %c0_6] : memref<36x70xf32, #tpu.memory_space<vmem>>, vector<1x70xf32>
    %18 = vector.shape_cast %17 : vector<1x70xf32> to vector<70xf32>
    %19 = vector.shape_cast %18 : vector<70xf32> to vector<1x70xf32>
    %20 = vector.broadcast %19 : vector<1x70xf32> to vector<16x70xf32>
    %21 = arith.mulf %1, %20 : vector<16x70xf32>
    %c0_7 = arith.constant 0 : index
    %c0_8 = arith.constant 0 : index
    %c1 = arith.constant 1 : index
    %22 = vector.load %arg1[%c0_7, %c0_8, %c1] : memref<1x18x72xf32, #tpu.memory_space<vmem>>, vector<1x16x70xf32>
    %23 = vector.shape_cast %22 : vector<1x16x70xf32> to vector<16x70xf32>
    %c1_9 = arith.constant 1 : index
    %c0_10 = arith.constant 0 : index
    %24 = vector.load %arg2[%c1_9, %c0_10] : memref<36x70xf32, #tpu.memory_space<vmem>>, vector<1x70xf32>
    %25 = vector.shape_cast %24 : vector<1x70xf32> to vector<70xf32>
    %26 = vector.shape_cast %25 : vector<70xf32> to vector<1x70xf32>
    %27 = vector.broadcast %26 : vector<1x70xf32> to vector<16x70xf32>
    %28 = arith.mulf %23, %27 : vector<16x70xf32>
    %c10 = arith.constant 10 : index
    %c0_11 = arith.constant 0 : index
    %29 = vector.load %arg2[%c10, %c0_11] : memref<36x70xf32, #tpu.memory_space<vmem>>, vector<1x70xf32>
    %30 = vector.shape_cast %29 : vector<1x70xf32> to vector<70xf32>
    %31 = vector.shape_cast %30 : vector<70xf32> to vector<1x70xf32>
    %32 = vector.broadcast %31 : vector<1x70xf32> to vector<16x70xf32>
    %33 = arith.mulf %23, %32 : vector<16x70xf32>
    %c19 = arith.constant 19 : index
    %c0_12 = arith.constant 0 : index
    %34 = vector.load %arg2[%c19, %c0_12] : memref<36x70xf32, #tpu.memory_space<vmem>>, vector<1x70xf32>
    %35 = vector.shape_cast %34 : vector<1x70xf32> to vector<70xf32>
    %36 = vector.shape_cast %35 : vector<70xf32> to vector<1x70xf32>
    %37 = vector.broadcast %36 : vector<1x70xf32> to vector<16x70xf32>
    %38 = arith.mulf %23, %37 : vector<16x70xf32>
    %c28 = arith.constant 28 : index
    %c0_13 = arith.constant 0 : index
    %39 = vector.load %arg2[%c28, %c0_13] : memref<36x70xf32, #tpu.memory_space<vmem>>, vector<1x70xf32>
    %40 = vector.shape_cast %39 : vector<1x70xf32> to vector<70xf32>
    %41 = vector.shape_cast %40 : vector<70xf32> to vector<1x70xf32>
    %42 = vector.broadcast %41 : vector<1x70xf32> to vector<16x70xf32>
    %43 = arith.mulf %23, %42 : vector<16x70xf32>
    %c0_14 = arith.constant 0 : index
    %c0_15 = arith.constant 0 : index
    %c2 = arith.constant 2 : index
    %44 = vector.load %arg1[%c0_14, %c0_15, %c2] : memref<1x18x72xf32, #tpu.memory_space<vmem>>, vector<1x16x70xf32>
    %45 = vector.shape_cast %44 : vector<1x16x70xf32> to vector<16x70xf32>
    %c2_16 = arith.constant 2 : index
    %c0_17 = arith.constant 0 : index
    %46 = vector.load %arg2[%c2_16, %c0_17] : memref<36x70xf32, #tpu.memory_space<vmem>>, vector<1x70xf32>
    %47 = vector.shape_cast %46 : vector<1x70xf32> to vector<70xf32>
    %48 = vector.shape_cast %47 : vector<70xf32> to vector<1x70xf32>
    %49 = vector.broadcast %48 : vector<1x70xf32> to vector<16x70xf32>
    %50 = arith.mulf %45, %49 : vector<16x70xf32>
    %51 = arith.addf %6, %50 : vector<16x70xf32>
    %c11 = arith.constant 11 : index
    %c0_18 = arith.constant 0 : index
    %52 = vector.load %arg2[%c11, %c0_18] : memref<36x70xf32, #tpu.memory_space<vmem>>, vector<1x70xf32>
    %53 = vector.shape_cast %52 : vector<1x70xf32> to vector<70xf32>
    %54 = vector.shape_cast %53 : vector<70xf32> to vector<1x70xf32>
    %55 = vector.broadcast %54 : vector<1x70xf32> to vector<16x70xf32>
    %56 = arith.mulf %45, %55 : vector<16x70xf32>
    %57 = arith.addf %11, %56 : vector<16x70xf32>
    %c20 = arith.constant 20 : index
    %c0_19 = arith.constant 0 : index
    %58 = vector.load %arg2[%c20, %c0_19] : memref<36x70xf32, #tpu.memory_space<vmem>>, vector<1x70xf32>
    %59 = vector.shape_cast %58 : vector<1x70xf32> to vector<70xf32>
    %60 = vector.shape_cast %59 : vector<70xf32> to vector<1x70xf32>
    %61 = vector.broadcast %60 : vector<1x70xf32> to vector<16x70xf32>
    %62 = arith.mulf %45, %61 : vector<16x70xf32>
    %63 = arith.addf %16, %62 : vector<16x70xf32>
    %c29 = arith.constant 29 : index
    %c0_20 = arith.constant 0 : index
    %64 = vector.load %arg2[%c29, %c0_20] : memref<36x70xf32, #tpu.memory_space<vmem>>, vector<1x70xf32>
    %65 = vector.shape_cast %64 : vector<1x70xf32> to vector<70xf32>
    %66 = vector.shape_cast %65 : vector<70xf32> to vector<1x70xf32>
    %67 = vector.broadcast %66 : vector<1x70xf32> to vector<16x70xf32>
    %68 = arith.mulf %45, %67 : vector<16x70xf32>
    %69 = arith.addf %21, %68 : vector<16x70xf32>
    %c0_21 = arith.constant 0 : index
    %c1_22 = arith.constant 1 : index
    %c0_23 = arith.constant 0 : index
    %70 = vector.load %arg1[%c0_21, %c1_22, %c0_23] : memref<1x18x72xf32, #tpu.memory_space<vmem>>, vector<1x16x70xf32>
    %71 = vector.shape_cast %70 : vector<1x16x70xf32> to vector<16x70xf32>
    %c3 = arith.constant 3 : index
    %c0_24 = arith.constant 0 : index
    %72 = vector.load %arg2[%c3, %c0_24] : memref<36x70xf32, #tpu.memory_space<vmem>>, vector<1x70xf32>
    %73 = vector.shape_cast %72 : vector<1x70xf32> to vector<70xf32>
    %74 = vector.shape_cast %73 : vector<70xf32> to vector<1x70xf32>
    %75 = vector.broadcast %74 : vector<1x70xf32> to vector<16x70xf32>
    %76 = arith.mulf %71, %75 : vector<16x70xf32>
    %77 = arith.addf %28, %76 : vector<16x70xf32>
    %c12 = arith.constant 12 : index
    %c0_25 = arith.constant 0 : index
    %78 = vector.load %arg2[%c12, %c0_25] : memref<36x70xf32, #tpu.memory_space<vmem>>, vector<1x70xf32>
    %79 = vector.shape_cast %78 : vector<1x70xf32> to vector<70xf32>
    %80 = vector.shape_cast %79 : vector<70xf32> to vector<1x70xf32>
    %81 = vector.broadcast %80 : vector<1x70xf32> to vector<16x70xf32>
    %82 = arith.mulf %71, %81 : vector<16x70xf32>
    %83 = arith.addf %33, %82 : vector<16x70xf32>
    %c21 = arith.constant 21 : index
    %c0_26 = arith.constant 0 : index
    %84 = vector.load %arg2[%c21, %c0_26] : memref<36x70xf32, #tpu.memory_space<vmem>>, vector<1x70xf32>
    %85 = vector.shape_cast %84 : vector<1x70xf32> to vector<70xf32>
    %86 = vector.shape_cast %85 : vector<70xf32> to vector<1x70xf32>
    %87 = vector.broadcast %86 : vector<1x70xf32> to vector<16x70xf32>
    %88 = arith.mulf %71, %87 : vector<16x70xf32>
    %89 = arith.addf %38, %88 : vector<16x70xf32>
    %c30 = arith.constant 30 : index
    %c0_27 = arith.constant 0 : index
    %90 = vector.load %arg2[%c30, %c0_27] : memref<36x70xf32, #tpu.memory_space<vmem>>, vector<1x70xf32>
    %91 = vector.shape_cast %90 : vector<1x70xf32> to vector<70xf32>
    %92 = vector.shape_cast %91 : vector<70xf32> to vector<1x70xf32>
    %93 = vector.broadcast %92 : vector<1x70xf32> to vector<16x70xf32>
    %94 = arith.mulf %71, %93 : vector<16x70xf32>
    %95 = arith.addf %43, %94 : vector<16x70xf32>
    %c0_28 = arith.constant 0 : index
    %c1_29 = arith.constant 1 : index
    %c1_30 = arith.constant 1 : index
    %96 = vector.load %arg1[%c0_28, %c1_29, %c1_30] : memref<1x18x72xf32, #tpu.memory_space<vmem>>, vector<1x16x70xf32>
    %97 = vector.shape_cast %96 : vector<1x16x70xf32> to vector<16x70xf32>
    %c4 = arith.constant 4 : index
    %c0_31 = arith.constant 0 : index
    %98 = vector.load %arg2[%c4, %c0_31] : memref<36x70xf32, #tpu.memory_space<vmem>>, vector<1x70xf32>
    %99 = vector.shape_cast %98 : vector<1x70xf32> to vector<70xf32>
    %100 = vector.shape_cast %99 : vector<70xf32> to vector<1x70xf32>
    %101 = vector.broadcast %100 : vector<1x70xf32> to vector<16x70xf32>
    %102 = arith.mulf %97, %101 : vector<16x70xf32>
    %103 = arith.addf %51, %102 : vector<16x70xf32>
    %c13 = arith.constant 13 : index
    %c0_32 = arith.constant 0 : index
    %104 = vector.load %arg2[%c13, %c0_32] : memref<36x70xf32, #tpu.memory_space<vmem>>, vector<1x70xf32>
    %105 = vector.shape_cast %104 : vector<1x70xf32> to vector<70xf32>
    %106 = vector.shape_cast %105 : vector<70xf32> to vector<1x70xf32>
    %107 = vector.broadcast %106 : vector<1x70xf32> to vector<16x70xf32>
    %108 = arith.mulf %97, %107 : vector<16x70xf32>
    %109 = arith.addf %57, %108 : vector<16x70xf32>
    %c22 = arith.constant 22 : index
    %c0_33 = arith.constant 0 : index
    %110 = vector.load %arg2[%c22, %c0_33] : memref<36x70xf32, #tpu.memory_space<vmem>>, vector<1x70xf32>
    %111 = vector.shape_cast %110 : vector<1x70xf32> to vector<70xf32>
    %112 = vector.shape_cast %111 : vector<70xf32> to vector<1x70xf32>
    %113 = vector.broadcast %112 : vector<1x70xf32> to vector<16x70xf32>
    %114 = arith.mulf %97, %113 : vector<16x70xf32>
    %115 = arith.addf %63, %114 : vector<16x70xf32>
    %c31 = arith.constant 31 : index
    %c0_34 = arith.constant 0 : index
    %116 = vector.load %arg2[%c31, %c0_34] : memref<36x70xf32, #tpu.memory_space<vmem>>, vector<1x70xf32>
    %117 = vector.shape_cast %116 : vector<1x70xf32> to vector<70xf32>
    %118 = vector.shape_cast %117 : vector<70xf32> to vector<1x70xf32>
    %119 = vector.broadcast %118 : vector<1x70xf32> to vector<16x70xf32>
    %120 = arith.mulf %97, %119 : vector<16x70xf32>
    %121 = arith.addf %69, %120 : vector<16x70xf32>
    %c0_35 = arith.constant 0 : index
    %c1_36 = arith.constant 1 : index
    %c2_37 = arith.constant 2 : index
    %122 = vector.load %arg1[%c0_35, %c1_36, %c2_37] : memref<1x18x72xf32, #tpu.memory_space<vmem>>, vector<1x16x70xf32>
    %123 = vector.shape_cast %122 : vector<1x16x70xf32> to vector<16x70xf32>
    %c5 = arith.constant 5 : index
    %c0_38 = arith.constant 0 : index
    %124 = vector.load %arg2[%c5, %c0_38] : memref<36x70xf32, #tpu.memory_space<vmem>>, vector<1x70xf32>
    %125 = vector.shape_cast %124 : vector<1x70xf32> to vector<70xf32>
    %126 = vector.shape_cast %125 : vector<70xf32> to vector<1x70xf32>
    %127 = vector.broadcast %126 : vector<1x70xf32> to vector<16x70xf32>
    %128 = arith.mulf %123, %127 : vector<16x70xf32>
    %129 = arith.addf %77, %128 : vector<16x70xf32>
    %c14 = arith.constant 14 : index
    %c0_39 = arith.constant 0 : index
    %130 = vector.load %arg2[%c14, %c0_39] : memref<36x70xf32, #tpu.memory_space<vmem>>, vector<1x70xf32>
    %131 = vector.shape_cast %130 : vector<1x70xf32> to vector<70xf32>
    %132 = vector.shape_cast %131 : vector<70xf32> to vector<1x70xf32>
    %133 = vector.broadcast %132 : vector<1x70xf32> to vector<16x70xf32>
    %134 = arith.mulf %123, %133 : vector<16x70xf32>
    %135 = arith.addf %83, %134 : vector<16x70xf32>
    %c23 = arith.constant 23 : index
    %c0_40 = arith.constant 0 : index
    %136 = vector.load %arg2[%c23, %c0_40] : memref<36x70xf32, #tpu.memory_space<vmem>>, vector<1x70xf32>
    %137 = vector.shape_cast %136 : vector<1x70xf32> to vector<70xf32>
    %138 = vector.shape_cast %137 : vector<70xf32> to vector<1x70xf32>
    %139 = vector.broadcast %138 : vector<1x70xf32> to vector<16x70xf32>
    %140 = arith.mulf %123, %139 : vector<16x70xf32>
    %141 = arith.addf %89, %140 : vector<16x70xf32>
    %c32 = arith.constant 32 : index
    %c0_41 = arith.constant 0 : index
    %142 = vector.load %arg2[%c32, %c0_41] : memref<36x70xf32, #tpu.memory_space<vmem>>, vector<1x70xf32>
    %143 = vector.shape_cast %142 : vector<1x70xf32> to vector<70xf32>
    %144 = vector.shape_cast %143 : vector<70xf32> to vector<1x70xf32>
    %145 = vector.broadcast %144 : vector<1x70xf32> to vector<16x70xf32>
    %146 = arith.mulf %123, %145 : vector<16x70xf32>
    %147 = arith.addf %95, %146 : vector<16x70xf32>
    %c0_42 = arith.constant 0 : index
    %c2_43 = arith.constant 2 : index
    %c0_44 = arith.constant 0 : index
    %148 = vector.load %arg1[%c0_42, %c2_43, %c0_44] : memref<1x18x72xf32, #tpu.memory_space<vmem>>, vector<1x16x70xf32>
    %149 = vector.shape_cast %148 : vector<1x16x70xf32> to vector<16x70xf32>
    %c6 = arith.constant 6 : index
    %c0_45 = arith.constant 0 : index
    %150 = vector.load %arg2[%c6, %c0_45] : memref<36x70xf32, #tpu.memory_space<vmem>>, vector<1x70xf32>
    %151 = vector.shape_cast %150 : vector<1x70xf32> to vector<70xf32>
    %152 = vector.shape_cast %151 : vector<70xf32> to vector<1x70xf32>
    %153 = vector.broadcast %152 : vector<1x70xf32> to vector<16x70xf32>
    %154 = arith.mulf %149, %153 : vector<16x70xf32>
    %155 = arith.addf %103, %154 : vector<16x70xf32>
    %c15 = arith.constant 15 : index
    %c0_46 = arith.constant 0 : index
    %156 = vector.load %arg2[%c15, %c0_46] : memref<36x70xf32, #tpu.memory_space<vmem>>, vector<1x70xf32>
    %157 = vector.shape_cast %156 : vector<1x70xf32> to vector<70xf32>
    %158 = vector.shape_cast %157 : vector<70xf32> to vector<1x70xf32>
    %159 = vector.broadcast %158 : vector<1x70xf32> to vector<16x70xf32>
    %160 = arith.mulf %149, %159 : vector<16x70xf32>
    %161 = arith.addf %109, %160 : vector<16x70xf32>
    %c24 = arith.constant 24 : index
    %c0_47 = arith.constant 0 : index
    %162 = vector.load %arg2[%c24, %c0_47] : memref<36x70xf32, #tpu.memory_space<vmem>>, vector<1x70xf32>
    %163 = vector.shape_cast %162 : vector<1x70xf32> to vector<70xf32>
    %164 = vector.shape_cast %163 : vector<70xf32> to vector<1x70xf32>
    %165 = vector.broadcast %164 : vector<1x70xf32> to vector<16x70xf32>
    %166 = arith.mulf %149, %165 : vector<16x70xf32>
    %167 = arith.addf %115, %166 : vector<16x70xf32>
    %c33 = arith.constant 33 : index
    %c0_48 = arith.constant 0 : index
    %168 = vector.load %arg2[%c33, %c0_48] : memref<36x70xf32, #tpu.memory_space<vmem>>, vector<1x70xf32>
    %169 = vector.shape_cast %168 : vector<1x70xf32> to vector<70xf32>
    %170 = vector.shape_cast %169 : vector<70xf32> to vector<1x70xf32>
    %171 = vector.broadcast %170 : vector<1x70xf32> to vector<16x70xf32>
    %172 = arith.mulf %149, %171 : vector<16x70xf32>
    %173 = arith.addf %121, %172 : vector<16x70xf32>
    %c0_49 = arith.constant 0 : index
    %c2_50 = arith.constant 2 : index
    %c1_51 = arith.constant 1 : index
    %174 = vector.load %arg1[%c0_49, %c2_50, %c1_51] : memref<1x18x72xf32, #tpu.memory_space<vmem>>, vector<1x16x70xf32>
    %175 = vector.shape_cast %174 : vector<1x16x70xf32> to vector<16x70xf32>
    %c7 = arith.constant 7 : index
    %c0_52 = arith.constant 0 : index
    %176 = vector.load %arg2[%c7, %c0_52] : memref<36x70xf32, #tpu.memory_space<vmem>>, vector<1x70xf32>
    %177 = vector.shape_cast %176 : vector<1x70xf32> to vector<70xf32>
    %178 = vector.shape_cast %177 : vector<70xf32> to vector<1x70xf32>
    %179 = vector.broadcast %178 : vector<1x70xf32> to vector<16x70xf32>
    %180 = arith.mulf %175, %179 : vector<16x70xf32>
    %181 = arith.addf %129, %180 : vector<16x70xf32>
    %c16 = arith.constant 16 : index
    %c0_53 = arith.constant 0 : index
    %182 = vector.load %arg2[%c16, %c0_53] : memref<36x70xf32, #tpu.memory_space<vmem>>, vector<1x70xf32>
    %183 = vector.shape_cast %182 : vector<1x70xf32> to vector<70xf32>
    %184 = vector.shape_cast %183 : vector<70xf32> to vector<1x70xf32>
    %185 = vector.broadcast %184 : vector<1x70xf32> to vector<16x70xf32>
    %186 = arith.mulf %175, %185 : vector<16x70xf32>
    %187 = arith.addf %135, %186 : vector<16x70xf32>
    %c25 = arith.constant 25 : index
    %c0_54 = arith.constant 0 : index
    %188 = vector.load %arg2[%c25, %c0_54] : memref<36x70xf32, #tpu.memory_space<vmem>>, vector<1x70xf32>
    %189 = vector.shape_cast %188 : vector<1x70xf32> to vector<70xf32>
    %190 = vector.shape_cast %189 : vector<70xf32> to vector<1x70xf32>
    %191 = vector.broadcast %190 : vector<1x70xf32> to vector<16x70xf32>
    %192 = arith.mulf %175, %191 : vector<16x70xf32>
    %193 = arith.addf %141, %192 : vector<16x70xf32>
    %c34 = arith.constant 34 : index
    %c0_55 = arith.constant 0 : index
    %194 = vector.load %arg2[%c34, %c0_55] : memref<36x70xf32, #tpu.memory_space<vmem>>, vector<1x70xf32>
    %195 = vector.shape_cast %194 : vector<1x70xf32> to vector<70xf32>
    %196 = vector.shape_cast %195 : vector<70xf32> to vector<1x70xf32>
    %197 = vector.broadcast %196 : vector<1x70xf32> to vector<16x70xf32>
    %198 = arith.mulf %175, %197 : vector<16x70xf32>
    %199 = arith.addf %147, %198 : vector<16x70xf32>
    %c0_56 = arith.constant 0 : index
    %c2_57 = arith.constant 2 : index
    %c2_58 = arith.constant 2 : index
    %200 = vector.load %arg1[%c0_56, %c2_57, %c2_58] : memref<1x18x72xf32, #tpu.memory_space<vmem>>, vector<1x16x70xf32>
    %201 = vector.shape_cast %200 : vector<1x16x70xf32> to vector<16x70xf32>
    %c8 = arith.constant 8 : index
    %c0_59 = arith.constant 0 : index
    %202 = vector.load %arg2[%c8, %c0_59] : memref<36x70xf32, #tpu.memory_space<vmem>>, vector<1x70xf32>
    %203 = vector.shape_cast %202 : vector<1x70xf32> to vector<70xf32>
    %204 = vector.shape_cast %203 : vector<70xf32> to vector<1x70xf32>
    %205 = vector.broadcast %204 : vector<1x70xf32> to vector<16x70xf32>
    %206 = arith.mulf %201, %205 : vector<16x70xf32>
    %207 = arith.addf %155, %206 : vector<16x70xf32>
    %c17 = arith.constant 17 : index
    %c0_60 = arith.constant 0 : index
    %208 = vector.load %arg2[%c17, %c0_60] : memref<36x70xf32, #tpu.memory_space<vmem>>, vector<1x70xf32>
    %209 = vector.shape_cast %208 : vector<1x70xf32> to vector<70xf32>
    %210 = vector.shape_cast %209 : vector<70xf32> to vector<1x70xf32>
    %211 = vector.broadcast %210 : vector<1x70xf32> to vector<16x70xf32>
    %212 = arith.mulf %201, %211 : vector<16x70xf32>
    %213 = arith.addf %161, %212 : vector<16x70xf32>
    %c26 = arith.constant 26 : index
    %c0_61 = arith.constant 0 : index
    %214 = vector.load %arg2[%c26, %c0_61] : memref<36x70xf32, #tpu.memory_space<vmem>>, vector<1x70xf32>
    %215 = vector.shape_cast %214 : vector<1x70xf32> to vector<70xf32>
    %216 = vector.shape_cast %215 : vector<70xf32> to vector<1x70xf32>
    %217 = vector.broadcast %216 : vector<1x70xf32> to vector<16x70xf32>
    %218 = arith.mulf %201, %217 : vector<16x70xf32>
    %219 = arith.addf %167, %218 : vector<16x70xf32>
    %c35 = arith.constant 35 : index
    %c0_62 = arith.constant 0 : index
    %220 = vector.load %arg2[%c35, %c0_62] : memref<36x70xf32, #tpu.memory_space<vmem>>, vector<1x70xf32>
    %221 = vector.shape_cast %220 : vector<1x70xf32> to vector<70xf32>
    %222 = vector.shape_cast %221 : vector<70xf32> to vector<1x70xf32>
    %223 = vector.broadcast %222 : vector<1x70xf32> to vector<16x70xf32>
    %224 = arith.mulf %201, %223 : vector<16x70xf32>
    %225 = arith.addf %173, %224 : vector<16x70xf32>
    %226 = arith.addf %207, %181 : vector<16x70xf32>
    %227 = arith.addf %213, %187 : vector<16x70xf32>
    %228 = arith.addf %219, %193 : vector<16x70xf32>
    %229 = arith.addf %225, %199 : vector<16x70xf32>
    %230 = vector.extract_strided_slice %226 {offsets = [0, 0], sizes = [16, 16], strides = [1, 1]} : vector<16x70xf32> to vector<16x16xf32>
    %231 = vector.extract_strided_slice %226 {offsets = [0, 18], sizes = [16, 16], strides = [1, 1]} : vector<16x70xf32> to vector<16x16xf32>
    %232 = arith.addf %230, %231 : vector<16x16xf32>
    %233 = vector.extract_strided_slice %226 {offsets = [0, 36], sizes = [16, 16], strides = [1, 1]} : vector<16x70xf32> to vector<16x16xf32>
    %234 = arith.addf %232, %233 : vector<16x16xf32>
    %235 = vector.extract_strided_slice %226 {offsets = [0, 54], sizes = [16, 16], strides = [1, 1]} : vector<16x70xf32> to vector<16x16xf32>
    %236 = arith.addf %234, %235 : vector<16x16xf32>
    %c0_63 = arith.constant 0 : index
    %237 = memref.load %arg4[%c0_63] : memref<4xf32, #tpu.memory_space<smem>>
    %238 = vector.broadcast %237 : f32 to vector<16x16xf32>
    %239 = arith.addf %236, %238 : vector<16x16xf32>
    %cst = arith.constant 0.000000e+00 : f32
    %240 = vector.broadcast %cst : f32 to vector<16x16xf32>
    %241 = arith.cmpf ogt, %239, %240 : vector<16x16xf32>
    %cst_64 = arith.constant 2.000000e-01 : f32
    %242 = vector.broadcast %cst_64 : f32 to vector<16x16xf32>
    %243 = arith.mulf %242, %239 : vector<16x16xf32>
    %244 = arith.select %241, %239, %243 : vector<16x16xi1>, vector<16x16xf32>
    %245 = vector.extract_strided_slice %244 {offsets = [0, 1], sizes = [16, 1], strides = [1, 1]} : vector<16x16xf32> to vector<16x1xf32>
    %246 = vector.extract_strided_slice %244 {offsets = [0, 14], sizes = [16, 1], strides = [1, 1]} : vector<16x16xf32> to vector<16x1xf32>
    %247 = tpu.concatenate %245, %244, %246 in 1 : vector<16x1xf32>, vector<16x16xf32>, vector<16x1xf32> -> vector<16x18xf32>
    %c1_65 = arith.constant 1 : index
    %c0_66 = arith.constant 0 : index
    %248 = vector.load %arg7[%c1_65, %c0_66] : memref<18x72xf32, #tpu.memory_space<vmem>>, vector<16x18xf32>
    tpu.vector_store %arg7[%c1_65, %c0_66], %247 {strides = array<i32>} : memref<18x72xf32, #tpu.memory_space<vmem>>, vector<16x18xf32>,
    %249 = vector.extract_strided_slice %227 {offsets = [0, 0], sizes = [16, 16], strides = [1, 1]} : vector<16x70xf32> to vector<16x16xf32>
    %250 = vector.extract_strided_slice %227 {offsets = [0, 18], sizes = [16, 16], strides = [1, 1]} : vector<16x70xf32> to vector<16x16xf32>
    %251 = arith.addf %249, %250 : vector<16x16xf32>
    %252 = vector.extract_strided_slice %227 {offsets = [0, 36], sizes = [16, 16], strides = [1, 1]} : vector<16x70xf32> to vector<16x16xf32>
    %253 = arith.addf %251, %252 : vector<16x16xf32>
    %254 = vector.extract_strided_slice %227 {offsets = [0, 54], sizes = [16, 16], strides = [1, 1]} : vector<16x70xf32> to vector<16x16xf32>
    %255 = arith.addf %253, %254 : vector<16x16xf32>
    %c1_67 = arith.constant 1 : index
    %256 = memref.load %arg4[%c1_67] : memref<4xf32, #tpu.memory_space<smem>>
    %257 = vector.broadcast %256 : f32 to vector<16x16xf32>
    %258 = arith.addf %255, %257 : vector<16x16xf32>
    %cst_68 = arith.constant 0.000000e+00 : f32
    %259 = vector.broadcast %cst_68 : f32 to vector<16x16xf32>
    %260 = arith.cmpf ogt, %258, %259 : vector<16x16xf32>
    %cst_69 = arith.constant 2.000000e-01 : f32
    %261 = vector.broadcast %cst_69 : f32 to vector<16x16xf32>
    %262 = arith.mulf %261, %258 : vector<16x16xf32>
    %263 = arith.select %260, %258, %262 : vector<16x16xi1>, vector<16x16xf32>
    %264 = vector.extract_strided_slice %263 {offsets = [0, 1], sizes = [16, 1], strides = [1, 1]} : vector<16x16xf32> to vector<16x1xf32>
    %265 = vector.extract_strided_slice %263 {offsets = [0, 14], sizes = [16, 1], strides = [1, 1]} : vector<16x16xf32> to vector<16x1xf32>
    %266 = tpu.concatenate %264, %263, %265 in 1 : vector<16x1xf32>, vector<16x16xf32>, vector<16x1xf32> -> vector<16x18xf32>
    %c1_70 = arith.constant 1 : index
    %c18_71 = arith.constant 18 : index
    %267 = vector.load %arg7[%c1_70, %c18_71] : memref<18x72xf32, #tpu.memory_space<vmem>>, vector<16x18xf32>
    tpu.vector_store %arg7[%c1_70, %c18_71], %266 {strides = array<i32>} : memref<18x72xf32, #tpu.memory_space<vmem>>, vector<16x18xf32>,
    %268 = vector.extract_strided_slice %228 {offsets = [0, 0], sizes = [16, 16], strides = [1, 1]} : vector<16x70xf32> to vector<16x16xf32>
    %269 = vector.extract_strided_slice %228 {offsets = [0, 18], sizes = [16, 16], strides = [1, 1]} : vector<16x70xf32> to vector<16x16xf32>
    %270 = arith.addf %268, %269 : vector<16x16xf32>
    %271 = vector.extract_strided_slice %228 {offsets = [0, 36], sizes = [16, 16], strides = [1, 1]} : vector<16x70xf32> to vector<16x16xf32>
    %272 = arith.addf %270, %271 : vector<16x16xf32>
    %273 = vector.extract_strided_slice %228 {offsets = [0, 54], sizes = [16, 16], strides = [1, 1]} : vector<16x70xf32> to vector<16x16xf32>
    %274 = arith.addf %272, %273 : vector<16x16xf32>
    %c2_72 = arith.constant 2 : index
    %275 = memref.load %arg4[%c2_72] : memref<4xf32, #tpu.memory_space<smem>>
    %276 = vector.broadcast %275 : f32 to vector<16x16xf32>
    %277 = arith.addf %274, %276 : vector<16x16xf32>
    %cst_73 = arith.constant 0.000000e+00 : f32
    %278 = vector.broadcast %cst_73 : f32 to vector<16x16xf32>
    %279 = arith.cmpf ogt, %277, %278 : vector<16x16xf32>
    %cst_74 = arith.constant 2.000000e-01 : f32
    %280 = vector.broadcast %cst_74 : f32 to vector<16x16xf32>
    %281 = arith.mulf %280, %277 : vector<16x16xf32>
    %282 = arith.select %279, %277, %281 : vector<16x16xi1>, vector<16x16xf32>
    %283 = vector.extract_strided_slice %282 {offsets = [0, 1], sizes = [16, 1], strides = [1, 1]} : vector<16x16xf32> to vector<16x1xf32>
    %284 = vector.extract_strided_slice %282 {offsets = [0, 14], sizes = [16, 1], strides = [1, 1]} : vector<16x16xf32> to vector<16x1xf32>
    %285 = tpu.concatenate %283, %282, %284 in 1 : vector<16x1xf32>, vector<16x16xf32>, vector<16x1xf32> -> vector<16x18xf32>
    %c1_75 = arith.constant 1 : index
    %c36 = arith.constant 36 : index
    %286 = vector.load %arg7[%c1_75, %c36] : memref<18x72xf32, #tpu.memory_space<vmem>>, vector<16x18xf32>
    tpu.vector_store %arg7[%c1_75, %c36], %285 {strides = array<i32>} : memref<18x72xf32, #tpu.memory_space<vmem>>, vector<16x18xf32>,
    %287 = vector.extract_strided_slice %229 {offsets = [0, 0], sizes = [16, 16], strides = [1, 1]} : vector<16x70xf32> to vector<16x16xf32>
    %288 = vector.extract_strided_slice %229 {offsets = [0, 18], sizes = [16, 16], strides = [1, 1]} : vector<16x70xf32> to vector<16x16xf32>
    %289 = arith.addf %287, %288 : vector<16x16xf32>
    %290 = vector.extract_strided_slice %229 {offsets = [0, 36], sizes = [16, 16], strides = [1, 1]} : vector<16x70xf32> to vector<16x16xf32>
    %291 = arith.addf %289, %290 : vector<16x16xf32>
    %292 = vector.extract_strided_slice %229 {offsets = [0, 54], sizes = [16, 16], strides = [1, 1]} : vector<16x70xf32> to vector<16x16xf32>
    %293 = arith.addf %291, %292 : vector<16x16xf32>
    %c3_76 = arith.constant 3 : index
    %294 = memref.load %arg4[%c3_76] : memref<4xf32, #tpu.memory_space<smem>>
    %295 = vector.broadcast %294 : f32 to vector<16x16xf32>
    %296 = arith.addf %293, %295 : vector<16x16xf32>
    %cst_77 = arith.constant 0.000000e+00 : f32
    %297 = vector.broadcast %cst_77 : f32 to vector<16x16xf32>
    %298 = arith.cmpf ogt, %296, %297 : vector<16x16xf32>
    %cst_78 = arith.constant 2.000000e-01 : f32
    %299 = vector.broadcast %cst_78 : f32 to vector<16x16xf32>
    %300 = arith.mulf %299, %296 : vector<16x16xf32>
    %301 = arith.select %298, %296, %300 : vector<16x16xi1>, vector<16x16xf32>
    %302 = vector.extract_strided_slice %301 {offsets = [0, 1], sizes = [16, 1], strides = [1, 1]} : vector<16x16xf32> to vector<16x1xf32>
    %303 = vector.extract_strided_slice %301 {offsets = [0, 14], sizes = [16, 1], strides = [1, 1]} : vector<16x16xf32> to vector<16x1xf32>
    %304 = tpu.concatenate %302, %301, %303 in 1 : vector<16x1xf32>, vector<16x16xf32>, vector<16x1xf32> -> vector<16x18xf32>
    %c1_79 = arith.constant 1 : index
    %c54 = arith.constant 54 : index
    %305 = vector.load %arg7[%c1_79, %c54] : memref<18x72xf32, #tpu.memory_space<vmem>>, vector<16x18xf32>
    tpu.vector_store %arg7[%c1_79, %c54], %304 {strides = array<i32>} : memref<18x72xf32, #tpu.memory_space<vmem>>, vector<16x18xf32>,
    %c2_80 = arith.constant 2 : index
    %c0_81 = arith.constant 0 : index
    %306 = vector.load %arg7[%c2_80, %c0_81] : memref<18x72xf32, #tpu.memory_space<vmem>>, vector<1x72xf32>
    %c0_82 = arith.constant 0 : index
    %c0_83 = arith.constant 0 : index
    %307 = vector.load %arg7[%c0_82, %c0_83] : memref<18x72xf32, #tpu.memory_space<vmem>>, vector<1x72xf32>
    tpu.vector_store %arg7[%c0_82, %c0_83], %306 {strides = array<i32>} : memref<18x72xf32, #tpu.memory_space<vmem>>, vector<1x72xf32>,
    %c15_84 = arith.constant 15 : index
    %c0_85 = arith.constant 0 : index
    %308 = vector.load %arg7[%c15_84, %c0_85] : memref<18x72xf32, #tpu.memory_space<vmem>>, vector<1x72xf32>
    %c17_86 = arith.constant 17 : index
    %c0_87 = arith.constant 0 : index
    %309 = vector.load %arg7[%c17_86, %c0_87] : memref<18x72xf32, #tpu.memory_space<vmem>>, vector<1x72xf32>
    tpu.vector_store %arg7[%c17_86, %c0_87], %308 {strides = array<i32>} : memref<18x72xf32, #tpu.memory_space<vmem>>, vector<1x72xf32>,
    %c0_88 = arith.constant 0 : index
    %c0_89 = arith.constant 0 : index
    %310 = vector.load %arg7[%c0_88, %c0_89] : memref<18x72xf32, #tpu.memory_space<vmem>>, vector<16x70xf32>
    %c0_90 = arith.constant 0 : index
    %c0_91 = arith.constant 0 : index
    %311 = vector.load %arg3[%c0_90, %c0_91] : memref<36x70xf32, #tpu.memory_space<vmem>>, vector<1x70xf32>
    %312 = vector.shape_cast %311 : vector<1x70xf32> to vector<70xf32>
    %313 = vector.shape_cast %312 : vector<70xf32> to vector<1x70xf32>
    %314 = vector.broadcast %313 : vector<1x70xf32> to vector<16x70xf32>
    %315 = arith.mulf %310, %314 : vector<16x70xf32>
    %c9_92 = arith.constant 9 : index
    %c0_93 = arith.constant 0 : index
    %316 = vector.load %arg3[%c9_92, %c0_93] : memref<36x70xf32, #tpu.memory_space<vmem>>, vector<1x70xf32>
    %317 = vector.shape_cast %316 : vector<1x70xf32> to vector<70xf32>
    %318 = vector.shape_cast %317 : vector<70xf32> to vector<1x70xf32>
    %319 = vector.broadcast %318 : vector<1x70xf32> to vector<16x70xf32>
    %320 = arith.mulf %310, %319 : vector<16x70xf32>
    %c18_94 = arith.constant 18 : index
    %c0_95 = arith.constant 0 : index
    %321 = vector.load %arg3[%c18_94, %c0_95] : memref<36x70xf32, #tpu.memory_space<vmem>>, vector<1x70xf32>
    %322 = vector.shape_cast %321 : vector<1x70xf32> to vector<70xf32>
    %323 = vector.shape_cast %322 : vector<70xf32> to vector<1x70xf32>
    %324 = vector.broadcast %323 : vector<1x70xf32> to vector<16x70xf32>
    %325 = arith.mulf %310, %324 : vector<16x70xf32>
    %c27_96 = arith.constant 27 : index
    %c0_97 = arith.constant 0 : index
    %326 = vector.load %arg3[%c27_96, %c0_97] : memref<36x70xf32, #tpu.memory_space<vmem>>, vector<1x70xf32>
    %327 = vector.shape_cast %326 : vector<1x70xf32> to vector<70xf32>
    %328 = vector.shape_cast %327 : vector<70xf32> to vector<1x70xf32>
    %329 = vector.broadcast %328 : vector<1x70xf32> to vector<16x70xf32>
    %330 = arith.mulf %310, %329 : vector<16x70xf32>
    %c0_98 = arith.constant 0 : index
    %c1_99 = arith.constant 1 : index
    %331 = vector.load %arg7[%c0_98, %c1_99] : memref<18x72xf32, #tpu.memory_space<vmem>>, vector<16x70xf32>
    %c1_100 = arith.constant 1 : index
    %c0_101 = arith.constant 0 : index
    %332 = vector.load %arg3[%c1_100, %c0_101] : memref<36x70xf32, #tpu.memory_space<vmem>>, vector<1x70xf32>
    %333 = vector.shape_cast %332 : vector<1x70xf32> to vector<70xf32>
    %334 = vector.shape_cast %333 : vector<70xf32> to vector<1x70xf32>
    %335 = vector.broadcast %334 : vector<1x70xf32> to vector<16x70xf32>
    %336 = arith.mulf %331, %335 : vector<16x70xf32>
    %c10_102 = arith.constant 10 : index
    %c0_103 = arith.constant 0 : index
    %337 = vector.load %arg3[%c10_102, %c0_103] : memref<36x70xf32, #tpu.memory_space<vmem>>, vector<1x70xf32>
    %338 = vector.shape_cast %337 : vector<1x70xf32> to vector<70xf32>
    %339 = vector.shape_cast %338 : vector<70xf32> to vector<1x70xf32>
    %340 = vector.broadcast %339 : vector<1x70xf32> to vector<16x70xf32>
    %341 = arith.mulf %331, %340 : vector<16x70xf32>
    %c19_104 = arith.constant 19 : index
    %c0_105 = arith.constant 0 : index
    %342 = vector.load %arg3[%c19_104, %c0_105] : memref<36x70xf32, #tpu.memory_space<vmem>>, vector<1x70xf32>
    %343 = vector.shape_cast %342 : vector<1x70xf32> to vector<70xf32>
    %344 = vector.shape_cast %343 : vector<70xf32> to vector<1x70xf32>
    %345 = vector.broadcast %344 : vector<1x70xf32> to vector<16x70xf32>
    %346 = arith.mulf %331, %345 : vector<16x70xf32>
    %c28_106 = arith.constant 28 : index
    %c0_107 = arith.constant 0 : index
    %347 = vector.load %arg3[%c28_106, %c0_107] : memref<36x70xf32, #tpu.memory_space<vmem>>, vector<1x70xf32>
    %348 = vector.shape_cast %347 : vector<1x70xf32> to vector<70xf32>
    %349 = vector.shape_cast %348 : vector<70xf32> to vector<1x70xf32>
    %350 = vector.broadcast %349 : vector<1x70xf32> to vector<16x70xf32>
    %351 = arith.mulf %331, %350 : vector<16x70xf32>
    %c0_108 = arith.constant 0 : index
    %c2_109 = arith.constant 2 : index
    %352 = vector.load %arg7[%c0_108, %c2_109] : memref<18x72xf32, #tpu.memory_space<vmem>>, vector<16x70xf32>
    %c2_110 = arith.constant 2 : index
    %c0_111 = arith.constant 0 : index
    %353 = vector.load %arg3[%c2_110, %c0_111] : memref<36x70xf32, #tpu.memory_space<vmem>>, vector<1x70xf32>
    %354 = vector.shape_cast %353 : vector<1x70xf32> to vector<70xf32>
    %355 = vector.shape_cast %354 : vector<70xf32> to vector<1x70xf32>
    %356 = vector.broadcast %355 : vector<1x70xf32> to vector<16x70xf32>
    %357 = arith.mulf %352, %356 : vector<16x70xf32>
    %358 = arith.addf %315, %357 : vector<16x70xf32>
    %c11_112 = arith.constant 11 : index
    %c0_113 = arith.constant 0 : index
    %359 = vector.load %arg3[%c11_112, %c0_113] : memref<36x70xf32, #tpu.memory_space<vmem>>, vector<1x70xf32>
    %360 = vector.shape_cast %359 : vector<1x70xf32> to vector<70xf32>
    %361 = vector.shape_cast %360 : vector<70xf32> to vector<1x70xf32>
    %362 = vector.broadcast %361 : vector<1x70xf32> to vector<16x70xf32>
    %363 = arith.mulf %352, %362 : vector<16x70xf32>
    %364 = arith.addf %320, %363 : vector<16x70xf32>
    %c20_114 = arith.constant 20 : index
    %c0_115 = arith.constant 0 : index
    %365 = vector.load %arg3[%c20_114, %c0_115] : memref<36x70xf32, #tpu.memory_space<vmem>>, vector<1x70xf32>
    %366 = vector.shape_cast %365 : vector<1x70xf32> to vector<70xf32>
    %367 = vector.shape_cast %366 : vector<70xf32> to vector<1x70xf32>
    %368 = vector.broadcast %367 : vector<1x70xf32> to vector<16x70xf32>
    %369 = arith.mulf %352, %368 : vector<16x70xf32>
    %370 = arith.addf %325, %369 : vector<16x70xf32>
    %c29_116 = arith.constant 29 : index
    %c0_117 = arith.constant 0 : index
    %371 = vector.load %arg3[%c29_116, %c0_117] : memref<36x70xf32, #tpu.memory_space<vmem>>, vector<1x70xf32>
    %372 = vector.shape_cast %371 : vector<1x70xf32> to vector<70xf32>
    %373 = vector.shape_cast %372 : vector<70xf32> to vector<1x70xf32>
    %374 = vector.broadcast %373 : vector<1x70xf32> to vector<16x70xf32>
    %375 = arith.mulf %352, %374 : vector<16x70xf32>
    %376 = arith.addf %330, %375 : vector<16x70xf32>
    %c1_118 = arith.constant 1 : index
    %c0_119 = arith.constant 0 : index
    %377 = vector.load %arg7[%c1_118, %c0_119] : memref<18x72xf32, #tpu.memory_space<vmem>>, vector<16x70xf32>
    %c3_120 = arith.constant 3 : index
    %c0_121 = arith.constant 0 : index
    %378 = vector.load %arg3[%c3_120, %c0_121] : memref<36x70xf32, #tpu.memory_space<vmem>>, vector<1x70xf32>
    %379 = vector.shape_cast %378 : vector<1x70xf32> to vector<70xf32>
    %380 = vector.shape_cast %379 : vector<70xf32> to vector<1x70xf32>
    %381 = vector.broadcast %380 : vector<1x70xf32> to vector<16x70xf32>
    %382 = arith.mulf %377, %381 : vector<16x70xf32>
    %383 = arith.addf %336, %382 : vector<16x70xf32>
    %c12_122 = arith.constant 12 : index
    %c0_123 = arith.constant 0 : index
    %384 = vector.load %arg3[%c12_122, %c0_123] : memref<36x70xf32, #tpu.memory_space<vmem>>, vector<1x70xf32>
    %385 = vector.shape_cast %384 : vector<1x70xf32> to vector<70xf32>
    %386 = vector.shape_cast %385 : vector<70xf32> to vector<1x70xf32>
    %387 = vector.broadcast %386 : vector<1x70xf32> to vector<16x70xf32>
    %388 = arith.mulf %377, %387 : vector<16x70xf32>
    %389 = arith.addf %341, %388 : vector<16x70xf32>
    %c21_124 = arith.constant 21 : index
    %c0_125 = arith.constant 0 : index
    %390 = vector.load %arg3[%c21_124, %c0_125] : memref<36x70xf32, #tpu.memory_space<vmem>>, vector<1x70xf32>
    %391 = vector.shape_cast %390 : vector<1x70xf32> to vector<70xf32>
    %392 = vector.shape_cast %391 : vector<70xf32> to vector<1x70xf32>
    %393 = vector.broadcast %392 : vector<1x70xf32> to vector<16x70xf32>
    %394 = arith.mulf %377, %393 : vector<16x70xf32>
    %395 = arith.addf %346, %394 : vector<16x70xf32>
    %c30_126 = arith.constant 30 : index
    %c0_127 = arith.constant 0 : index
    %396 = vector.load %arg3[%c30_126, %c0_127] : memref<36x70xf32, #tpu.memory_space<vmem>>, vector<1x70xf32>
    %397 = vector.shape_cast %396 : vector<1x70xf32> to vector<70xf32>
    %398 = vector.shape_cast %397 : vector<70xf32> to vector<1x70xf32>
    %399 = vector.broadcast %398 : vector<1x70xf32> to vector<16x70xf32>
    %400 = arith.mulf %377, %399 : vector<16x70xf32>
    %401 = arith.addf %351, %400 : vector<16x70xf32>
    %c1_128 = arith.constant 1 : index
    %c1_129 = arith.constant 1 : index
    %402 = vector.load %arg7[%c1_128, %c1_129] : memref<18x72xf32, #tpu.memory_space<vmem>>, vector<16x70xf32>
    %c4_130 = arith.constant 4 : index
    %c0_131 = arith.constant 0 : index
    %403 = vector.load %arg3[%c4_130, %c0_131] : memref<36x70xf32, #tpu.memory_space<vmem>>, vector<1x70xf32>
    %404 = vector.shape_cast %403 : vector<1x70xf32> to vector<70xf32>
    %405 = vector.shape_cast %404 : vector<70xf32> to vector<1x70xf32>
    %406 = vector.broadcast %405 : vector<1x70xf32> to vector<16x70xf32>
    %407 = arith.mulf %402, %406 : vector<16x70xf32>
    %408 = arith.addf %358, %407 : vector<16x70xf32>
    %c13_132 = arith.constant 13 : index
    %c0_133 = arith.constant 0 : index
    %409 = vector.load %arg3[%c13_132, %c0_133] : memref<36x70xf32, #tpu.memory_space<vmem>>, vector<1x70xf32>
    %410 = vector.shape_cast %409 : vector<1x70xf32> to vector<70xf32>
    %411 = vector.shape_cast %410 : vector<70xf32> to vector<1x70xf32>
    %412 = vector.broadcast %411 : vector<1x70xf32> to vector<16x70xf32>
    %413 = arith.mulf %402, %412 : vector<16x70xf32>
    %414 = arith.addf %364, %413 : vector<16x70xf32>
    %c22_134 = arith.constant 22 : index
    %c0_135 = arith.constant 0 : index
    %415 = vector.load %arg3[%c22_134, %c0_135] : memref<36x70xf32, #tpu.memory_space<vmem>>, vector<1x70xf32>
    %416 = vector.shape_cast %415 : vector<1x70xf32> to vector<70xf32>
    %417 = vector.shape_cast %416 : vector<70xf32> to vector<1x70xf32>
    %418 = vector.broadcast %417 : vector<1x70xf32> to vector<16x70xf32>
    %419 = arith.mulf %402, %418 : vector<16x70xf32>
    %420 = arith.addf %370, %419 : vector<16x70xf32>
    %c31_136 = arith.constant 31 : index
    %c0_137 = arith.constant 0 : index
    %421 = vector.load %arg3[%c31_136, %c0_137] : memref<36x70xf32, #tpu.memory_space<vmem>>, vector<1x70xf32>
    %422 = vector.shape_cast %421 : vector<1x70xf32> to vector<70xf32>
    %423 = vector.shape_cast %422 : vector<70xf32> to vector<1x70xf32>
    %424 = vector.broadcast %423 : vector<1x70xf32> to vector<16x70xf32>
    %425 = arith.mulf %402, %424 : vector<16x70xf32>
    %426 = arith.addf %376, %425 : vector<16x70xf32>
    %c1_138 = arith.constant 1 : index
    %c2_139 = arith.constant 2 : index
    %427 = vector.load %arg7[%c1_138, %c2_139] : memref<18x72xf32, #tpu.memory_space<vmem>>, vector<16x70xf32>
    %c5_140 = arith.constant 5 : index
    %c0_141 = arith.constant 0 : index
    %428 = vector.load %arg3[%c5_140, %c0_141] : memref<36x70xf32, #tpu.memory_space<vmem>>, vector<1x70xf32>
    %429 = vector.shape_cast %428 : vector<1x70xf32> to vector<70xf32>
    %430 = vector.shape_cast %429 : vector<70xf32> to vector<1x70xf32>
    %431 = vector.broadcast %430 : vector<1x70xf32> to vector<16x70xf32>
    %432 = arith.mulf %427, %431 : vector<16x70xf32>
    %433 = arith.addf %383, %432 : vector<16x70xf32>
    %c14_142 = arith.constant 14 : index
    %c0_143 = arith.constant 0 : index
    %434 = vector.load %arg3[%c14_142, %c0_143] : memref<36x70xf32, #tpu.memory_space<vmem>>, vector<1x70xf32>
    %435 = vector.shape_cast %434 : vector<1x70xf32> to vector<70xf32>
    %436 = vector.shape_cast %435 : vector<70xf32> to vector<1x70xf32>
    %437 = vector.broadcast %436 : vector<1x70xf32> to vector<16x70xf32>
    %438 = arith.mulf %427, %437 : vector<16x70xf32>
    %439 = arith.addf %389, %438 : vector<16x70xf32>
    %c23_144 = arith.constant 23 : index
    %c0_145 = arith.constant 0 : index
    %440 = vector.load %arg3[%c23_144, %c0_145] : memref<36x70xf32, #tpu.memory_space<vmem>>, vector<1x70xf32>
    %441 = vector.shape_cast %440 : vector<1x70xf32> to vector<70xf32>
    %442 = vector.shape_cast %441 : vector<70xf32> to vector<1x70xf32>
    %443 = vector.broadcast %442 : vector<1x70xf32> to vector<16x70xf32>
    %444 = arith.mulf %427, %443 : vector<16x70xf32>
    %445 = arith.addf %395, %444 : vector<16x70xf32>
    %c32_146 = arith.constant 32 : index
    %c0_147 = arith.constant 0 : index
    %446 = vector.load %arg3[%c32_146, %c0_147] : memref<36x70xf32, #tpu.memory_space<vmem>>, vector<1x70xf32>
    %447 = vector.shape_cast %446 : vector<1x70xf32> to vector<70xf32>
    %448 = vector.shape_cast %447 : vector<70xf32> to vector<1x70xf32>
    %449 = vector.broadcast %448 : vector<1x70xf32> to vector<16x70xf32>
    %450 = arith.mulf %427, %449 : vector<16x70xf32>
    %451 = arith.addf %401, %450 : vector<16x70xf32>
    %c2_148 = arith.constant 2 : index
    %c0_149 = arith.constant 0 : index
    %452 = vector.load %arg7[%c2_148, %c0_149] : memref<18x72xf32, #tpu.memory_space<vmem>>, vector<16x70xf32>
    %c6_150 = arith.constant 6 : index
    %c0_151 = arith.constant 0 : index
    %453 = vector.load %arg3[%c6_150, %c0_151] : memref<36x70xf32, #tpu.memory_space<vmem>>, vector<1x70xf32>
    %454 = vector.shape_cast %453 : vector<1x70xf32> to vector<70xf32>
    %455 = vector.shape_cast %454 : vector<70xf32> to vector<1x70xf32>
    %456 = vector.broadcast %455 : vector<1x70xf32> to vector<16x70xf32>
    %457 = arith.mulf %452, %456 : vector<16x70xf32>
    %458 = arith.addf %408, %457 : vector<16x70xf32>
    %c15_152 = arith.constant 15 : index
    %c0_153 = arith.constant 0 : index
    %459 = vector.load %arg3[%c15_152, %c0_153] : memref<36x70xf32, #tpu.memory_space<vmem>>, vector<1x70xf32>
    %460 = vector.shape_cast %459 : vector<1x70xf32> to vector<70xf32>
    %461 = vector.shape_cast %460 : vector<70xf32> to vector<1x70xf32>
    %462 = vector.broadcast %461 : vector<1x70xf32> to vector<16x70xf32>
    %463 = arith.mulf %452, %462 : vector<16x70xf32>
    %464 = arith.addf %414, %463 : vector<16x70xf32>
    %c24_154 = arith.constant 24 : index
    %c0_155 = arith.constant 0 : index
    %465 = vector.load %arg3[%c24_154, %c0_155] : memref<36x70xf32, #tpu.memory_space<vmem>>, vector<1x70xf32>
    %466 = vector.shape_cast %465 : vector<1x70xf32> to vector<70xf32>
    %467 = vector.shape_cast %466 : vector<70xf32> to vector<1x70xf32>
    %468 = vector.broadcast %467 : vector<1x70xf32> to vector<16x70xf32>
    %469 = arith.mulf %452, %468 : vector<16x70xf32>
    %470 = arith.addf %420, %469 : vector<16x70xf32>
    %c33_156 = arith.constant 33 : index
    %c0_157 = arith.constant 0 : index
    %471 = vector.load %arg3[%c33_156, %c0_157] : memref<36x70xf32, #tpu.memory_space<vmem>>, vector<1x70xf32>
    %472 = vector.shape_cast %471 : vector<1x70xf32> to vector<70xf32>
    %473 = vector.shape_cast %472 : vector<70xf32> to vector<1x70xf32>
    %474 = vector.broadcast %473 : vector<1x70xf32> to vector<16x70xf32>
    %475 = arith.mulf %452, %474 : vector<16x70xf32>
    %476 = arith.addf %426, %475 : vector<16x70xf32>
    %c2_158 = arith.constant 2 : index
    %c1_159 = arith.constant 1 : index
    %477 = vector.load %arg7[%c2_158, %c1_159] : memref<18x72xf32, #tpu.memory_space<vmem>>, vector<16x70xf32>
    %c7_160 = arith.constant 7 : index
    %c0_161 = arith.constant 0 : index
    %478 = vector.load %arg3[%c7_160, %c0_161] : memref<36x70xf32, #tpu.memory_space<vmem>>, vector<1x70xf32>
    %479 = vector.shape_cast %478 : vector<1x70xf32> to vector<70xf32>
    %480 = vector.shape_cast %479 : vector<70xf32> to vector<1x70xf32>
    %481 = vector.broadcast %480 : vector<1x70xf32> to vector<16x70xf32>
    %482 = arith.mulf %477, %481 : vector<16x70xf32>
    %483 = arith.addf %433, %482 : vector<16x70xf32>
    %c16_162 = arith.constant 16 : index
    %c0_163 = arith.constant 0 : index
    %484 = vector.load %arg3[%c16_162, %c0_163] : memref<36x70xf32, #tpu.memory_space<vmem>>, vector<1x70xf32>
    %485 = vector.shape_cast %484 : vector<1x70xf32> to vector<70xf32>
    %486 = vector.shape_cast %485 : vector<70xf32> to vector<1x70xf32>
    %487 = vector.broadcast %486 : vector<1x70xf32> to vector<16x70xf32>
    %488 = arith.mulf %477, %487 : vector<16x70xf32>
    %489 = arith.addf %439, %488 : vector<16x70xf32>
    %c25_164 = arith.constant 25 : index
    %c0_165 = arith.constant 0 : index
    %490 = vector.load %arg3[%c25_164, %c0_165] : memref<36x70xf32, #tpu.memory_space<vmem>>, vector<1x70xf32>
    %491 = vector.shape_cast %490 : vector<1x70xf32> to vector<70xf32>
    %492 = vector.shape_cast %491 : vector<70xf32> to vector<1x70xf32>
    %493 = vector.broadcast %492 : vector<1x70xf32> to vector<16x70xf32>
    %494 = arith.mulf %477, %493 : vector<16x70xf32>
    %495 = arith.addf %445, %494 : vector<16x70xf32>
    %c34_166 = arith.constant 34 : index
    %c0_167 = arith.constant 0 : index
    %496 = vector.load %arg3[%c34_166, %c0_167] : memref<36x70xf32, #tpu.memory_space<vmem>>, vector<1x70xf32>
    %497 = vector.shape_cast %496 : vector<1x70xf32> to vector<70xf32>
    %498 = vector.shape_cast %497 : vector<70xf32> to vector<1x70xf32>
    %499 = vector.broadcast %498 : vector<1x70xf32> to vector<16x70xf32>
    %500 = arith.mulf %477, %499 : vector<16x70xf32>
    %501 = arith.addf %451, %500 : vector<16x70xf32>
    %c2_168 = arith.constant 2 : index
    %c2_169 = arith.constant 2 : index
    %502 = vector.load %arg7[%c2_168, %c2_169] : memref<18x72xf32, #tpu.memory_space<vmem>>, vector<16x70xf32>
    %c8_170 = arith.constant 8 : index
    %c0_171 = arith.constant 0 : index
    %503 = vector.load %arg3[%c8_170, %c0_171] : memref<36x70xf32, #tpu.memory_space<vmem>>, vector<1x70xf32>
    %504 = vector.shape_cast %503 : vector<1x70xf32> to vector<70xf32>
    %505 = vector.shape_cast %504 : vector<70xf32> to vector<1x70xf32>
    %506 = vector.broadcast %505 : vector<1x70xf32> to vector<16x70xf32>
    %507 = arith.mulf %502, %506 : vector<16x70xf32>
    %508 = arith.addf %458, %507 : vector<16x70xf32>
    %c17_172 = arith.constant 17 : index
    %c0_173 = arith.constant 0 : index
    %509 = vector.load %arg3[%c17_172, %c0_173] : memref<36x70xf32, #tpu.memory_space<vmem>>, vector<1x70xf32>
    %510 = vector.shape_cast %509 : vector<1x70xf32> to vector<70xf32>
    %511 = vector.shape_cast %510 : vector<70xf32> to vector<1x70xf32>
    %512 = vector.broadcast %511 : vector<1x70xf32> to vector<16x70xf32>
    %513 = arith.mulf %502, %512 : vector<16x70xf32>
    %514 = arith.addf %464, %513 : vector<16x70xf32>
    %c26_174 = arith.constant 26 : index
    %c0_175 = arith.constant 0 : index
    %515 = vector.load %arg3[%c26_174, %c0_175] : memref<36x70xf32, #tpu.memory_space<vmem>>, vector<1x70xf32>
    %516 = vector.shape_cast %515 : vector<1x70xf32> to vector<70xf32>
    %517 = vector.shape_cast %516 : vector<70xf32> to vector<1x70xf32>
    %518 = vector.broadcast %517 : vector<1x70xf32> to vector<16x70xf32>
    %519 = arith.mulf %502, %518 : vector<16x70xf32>
    %520 = arith.addf %470, %519 : vector<16x70xf32>
    %c35_176 = arith.constant 35 : index
    %c0_177 = arith.constant 0 : index
    %521 = vector.load %arg3[%c35_176, %c0_177] : memref<36x70xf32, #tpu.memory_space<vmem>>, vector<1x70xf32>
    %522 = vector.shape_cast %521 : vector<1x70xf32> to vector<70xf32>
    %523 = vector.shape_cast %522 : vector<70xf32> to vector<1x70xf32>
    %524 = vector.broadcast %523 : vector<1x70xf32> to vector<16x70xf32>
    %525 = arith.mulf %502, %524 : vector<16x70xf32>
    %526 = arith.addf %476, %525 : vector<16x70xf32>
    %527 = arith.addf %508, %483 : vector<16x70xf32>
    %528 = arith.addf %514, %489 : vector<16x70xf32>
    %529 = arith.addf %520, %495 : vector<16x70xf32>
    %530 = arith.addf %526, %501 : vector<16x70xf32>
    %531 = vector.extract_strided_slice %527 {offsets = [0, 0], sizes = [16, 16], strides = [1, 1]} : vector<16x70xf32> to vector<16x16xf32>
    %532 = vector.extract_strided_slice %527 {offsets = [0, 18], sizes = [16, 16], strides = [1, 1]} : vector<16x70xf32> to vector<16x16xf32>
    %533 = arith.addf %531, %532 : vector<16x16xf32>
    %534 = vector.extract_strided_slice %527 {offsets = [0, 36], sizes = [16, 16], strides = [1, 1]} : vector<16x70xf32> to vector<16x16xf32>
    %535 = arith.addf %533, %534 : vector<16x16xf32>
    %536 = vector.extract_strided_slice %527 {offsets = [0, 54], sizes = [16, 16], strides = [1, 1]} : vector<16x70xf32> to vector<16x16xf32>
    %537 = arith.addf %535, %536 : vector<16x16xf32>
    %c0_178 = arith.constant 0 : index
    %538 = memref.load %arg5[%c0_178] : memref<4xf32, #tpu.memory_space<smem>>
    %539 = vector.broadcast %538 : f32 to vector<16x16xf32>
    %540 = arith.addf %537, %539 : vector<16x16xf32>
    %541 = vector.shape_cast %540 : vector<16x16xf32> to vector<1x16x16xf32>
    %cst_179 = arith.constant dense<0.000000e+00> : vector<1xf32>
    %542 = vector.multi_reduction <add>, %541, %cst_179 [1, 2] : vector<1x16x16xf32> to vector<1xf32>
    %543 = vector.shape_cast %542 : vector<1xf32> to vector<1x1x1xf32>
    %544 = vector.extract %543[0, 0, 0] : f32 from vector<1x1x1xf32>
    %545 = arith.mulf %540, %540 : vector<16x16xf32>
    %546 = vector.shape_cast %545 : vector<16x16xf32> to vector<1x16x16xf32>
    %cst_180 = arith.constant dense<0.000000e+00> : vector<1xf32>
    %547 = vector.multi_reduction <add>, %546, %cst_180 [1, 2] : vector<1x16x16xf32> to vector<1xf32>
    %548 = vector.shape_cast %547 : vector<1xf32> to vector<1x1x1xf32>
    %549 = vector.extract %548[0, 0, 0] : f32 from vector<1x1x1xf32>
    %cst_181 = arith.constant 3.906250e-03 : f32
    %550 = arith.mulf %544, %cst_181 : f32
    %cst_182 = arith.constant 3.906250e-03 : f32
    %551 = arith.mulf %549, %cst_182 : f32
    %552 = arith.mulf %550, %550 : f32
    %553 = arith.subf %551, %552 : f32
    %cst_183 = arith.constant 0.000000e+00 : f32
    %554 = arith.maximumf %553, %cst_183 : f32
    %555 = vector.broadcast %550 : f32 to vector<16x16xf32>
    %556 = arith.subf %540, %555 : vector<16x16xf32>
    %cst_184 = arith.constant 9.99999974E-6 : f32
    %557 = arith.addf %554, %cst_184 : f32
    %558 = math.rsqrt %557 : f32
    %559 = vector.broadcast %558 : f32 to vector<16x16xf32>
    %560 = arith.mulf %556, %559 : vector<16x16xf32>
    %c0_185 = arith.constant 0 : index
    %c1_186 = arith.constant 1 : index
    %c1_187 = arith.constant 1 : index
    %561 = vector.load %arg1[%c0_185, %c1_186, %c1_187] : memref<1x18x72xf32, #tpu.memory_space<vmem>>, vector<1x16x16xf32>
    %562 = vector.shape_cast %561 : vector<1x16x16xf32> to vector<16x16xf32>
    %563 = arith.addf %560, %562 : vector<16x16xf32>
    %564 = vector.extract_strided_slice %528 {offsets = [0, 0], sizes = [16, 16], strides = [1, 1]} : vector<16x70xf32> to vector<16x16xf32>
    %565 = vector.extract_strided_slice %528 {offsets = [0, 18], sizes = [16, 16], strides = [1, 1]} : vector<16x70xf32> to vector<16x16xf32>
    %566 = arith.addf %564, %565 : vector<16x16xf32>
    %567 = vector.extract_strided_slice %528 {offsets = [0, 36], sizes = [16, 16], strides = [1, 1]} : vector<16x70xf32> to vector<16x16xf32>
    %568 = arith.addf %566, %567 : vector<16x16xf32>
    %569 = vector.extract_strided_slice %528 {offsets = [0, 54], sizes = [16, 16], strides = [1, 1]} : vector<16x70xf32> to vector<16x16xf32>
    %570 = arith.addf %568, %569 : vector<16x16xf32>
    %c1_188 = arith.constant 1 : index
    %571 = memref.load %arg5[%c1_188] : memref<4xf32, #tpu.memory_space<smem>>
    %572 = vector.broadcast %571 : f32 to vector<16x16xf32>
    %573 = arith.addf %570, %572 : vector<16x16xf32>
    %574 = vector.shape_cast %573 : vector<16x16xf32> to vector<1x16x16xf32>
    %cst_189 = arith.constant dense<0.000000e+00> : vector<1xf32>
    %575 = vector.multi_reduction <add>, %574, %cst_189 [1, 2] : vector<1x16x16xf32> to vector<1xf32>
    %576 = vector.shape_cast %575 : vector<1xf32> to vector<1x1x1xf32>
    %577 = vector.extract %576[0, 0, 0] : f32 from vector<1x1x1xf32>
    %578 = arith.mulf %573, %573 : vector<16x16xf32>
    %579 = vector.shape_cast %578 : vector<16x16xf32> to vector<1x16x16xf32>
    %cst_190 = arith.constant dense<0.000000e+00> : vector<1xf32>
    %580 = vector.multi_reduction <add>, %579, %cst_190 [1, 2] : vector<1x16x16xf32> to vector<1xf32>
    %581 = vector.shape_cast %580 : vector<1xf32> to vector<1x1x1xf32>
    %582 = vector.extract %581[0, 0, 0] : f32 from vector<1x1x1xf32>
    %cst_191 = arith.constant 3.906250e-03 : f32
    %583 = arith.mulf %577, %cst_191 : f32
    %cst_192 = arith.constant 3.906250e-03 : f32
    %584 = arith.mulf %582, %cst_192 : f32
    %585 = arith.mulf %583, %583 : f32
    %586 = arith.subf %584, %585 : f32
    %cst_193 = arith.constant 0.000000e+00 : f32
    %587 = arith.maximumf %586, %cst_193 : f32
    %588 = vector.broadcast %583 : f32 to vector<16x16xf32>
    %589 = arith.subf %573, %588 : vector<16x16xf32>
    %cst_194 = arith.constant 9.99999974E-6 : f32
    %590 = arith.addf %587, %cst_194 : f32
    %591 = math.rsqrt %590 : f32
    %592 = vector.broadcast %591 : f32 to vector<16x16xf32>
    %593 = arith.mulf %589, %592 : vector<16x16xf32>
    %c0_195 = arith.constant 0 : index
    %c1_196 = arith.constant 1 : index
    %c19_197 = arith.constant 19 : index
    %594 = vector.load %arg1[%c0_195, %c1_196, %c19_197] : memref<1x18x72xf32, #tpu.memory_space<vmem>>, vector<1x16x16xf32>
    %595 = vector.shape_cast %594 : vector<1x16x16xf32> to vector<16x16xf32>
    %596 = arith.addf %593, %595 : vector<16x16xf32>
    %597 = vector.extract_strided_slice %529 {offsets = [0, 0], sizes = [16, 16], strides = [1, 1]} : vector<16x70xf32> to vector<16x16xf32>
    %598 = vector.extract_strided_slice %529 {offsets = [0, 18], sizes = [16, 16], strides = [1, 1]} : vector<16x70xf32> to vector<16x16xf32>
    %599 = arith.addf %597, %598 : vector<16x16xf32>
    %600 = vector.extract_strided_slice %529 {offsets = [0, 36], sizes = [16, 16], strides = [1, 1]} : vector<16x70xf32> to vector<16x16xf32>
    %601 = arith.addf %599, %600 : vector<16x16xf32>
    %602 = vector.extract_strided_slice %529 {offsets = [0, 54], sizes = [16, 16], strides = [1, 1]} : vector<16x70xf32> to vector<16x16xf32>
    %603 = arith.addf %601, %602 : vector<16x16xf32>
    %c2_198 = arith.constant 2 : index
    %604 = memref.load %arg5[%c2_198] : memref<4xf32, #tpu.memory_space<smem>>
    %605 = vector.broadcast %604 : f32 to vector<16x16xf32>
    %606 = arith.addf %603, %605 : vector<16x16xf32>
    %607 = vector.shape_cast %606 : vector<16x16xf32> to vector<1x16x16xf32>
    %cst_199 = arith.constant dense<0.000000e+00> : vector<1xf32>
    %608 = vector.multi_reduction <add>, %607, %cst_199 [1, 2] : vector<1x16x16xf32> to vector<1xf32>
    %609 = vector.shape_cast %608 : vector<1xf32> to vector<1x1x1xf32>
    %610 = vector.extract %609[0, 0, 0] : f32 from vector<1x1x1xf32>
    %611 = arith.mulf %606, %606 : vector<16x16xf32>
    %612 = vector.shape_cast %611 : vector<16x16xf32> to vector<1x16x16xf32>
    %cst_200 = arith.constant dense<0.000000e+00> : vector<1xf32>
    %613 = vector.multi_reduction <add>, %612, %cst_200 [1, 2] : vector<1x16x16xf32> to vector<1xf32>
    %614 = vector.shape_cast %613 : vector<1xf32> to vector<1x1x1xf32>
    %615 = vector.extract %614[0, 0, 0] : f32 from vector<1x1x1xf32>
    %cst_201 = arith.constant 3.906250e-03 : f32
    %616 = arith.mulf %610, %cst_201 : f32
    %cst_202 = arith.constant 3.906250e-03 : f32
    %617 = arith.mulf %615, %cst_202 : f32
    %618 = arith.mulf %616, %616 : f32
    %619 = arith.subf %617, %618 : f32
    %cst_203 = arith.constant 0.000000e+00 : f32
    %620 = arith.maximumf %619, %cst_203 : f32
    %621 = vector.broadcast %616 : f32 to vector<16x16xf32>
    %622 = arith.subf %606, %621 : vector<16x16xf32>
    %cst_204 = arith.constant 9.99999974E-6 : f32
    %623 = arith.addf %620, %cst_204 : f32
    %624 = math.rsqrt %623 : f32
    %625 = vector.broadcast %624 : f32 to vector<16x16xf32>
    %626 = arith.mulf %622, %625 : vector<16x16xf32>
    %c0_205 = arith.constant 0 : index
    %c1_206 = arith.constant 1 : index
    %c37 = arith.constant 37 : index
    %627 = vector.load %arg1[%c0_205, %c1_206, %c37] : memref<1x18x72xf32, #tpu.memory_space<vmem>>, vector<1x16x16xf32>
    %628 = vector.shape_cast %627 : vector<1x16x16xf32> to vector<16x16xf32>
    %629 = arith.addf %626, %628 : vector<16x16xf32>
    %630 = vector.extract_strided_slice %530 {offsets = [0, 0], sizes = [16, 16], strides = [1, 1]} : vector<16x70xf32> to vector<16x16xf32>
    %631 = vector.extract_strided_slice %530 {offsets = [0, 18], sizes = [16, 16], strides = [1, 1]} : vector<16x70xf32> to vector<16x16xf32>
    %632 = arith.addf %630, %631 : vector<16x16xf32>
    %633 = vector.extract_strided_slice %530 {offsets = [0, 36], sizes = [16, 16], strides = [1, 1]} : vector<16x70xf32> to vector<16x16xf32>
    %634 = arith.addf %632, %633 : vector<16x16xf32>
    %635 = vector.extract_strided_slice %530 {offsets = [0, 54], sizes = [16, 16], strides = [1, 1]} : vector<16x70xf32> to vector<16x16xf32>
    %636 = arith.addf %634, %635 : vector<16x16xf32>
    %c3_207 = arith.constant 3 : index
    %637 = memref.load %arg5[%c3_207] : memref<4xf32, #tpu.memory_space<smem>>
    %638 = vector.broadcast %637 : f32 to vector<16x16xf32>
    %639 = arith.addf %636, %638 : vector<16x16xf32>
    %640 = vector.shape_cast %639 : vector<16x16xf32> to vector<1x16x16xf32>
    %cst_208 = arith.constant dense<0.000000e+00> : vector<1xf32>
    %641 = vector.multi_reduction <add>, %640, %cst_208 [1, 2] : vector<1x16x16xf32> to vector<1xf32>
    %642 = vector.shape_cast %641 : vector<1xf32> to vector<1x1x1xf32>
    %643 = vector.extract %642[0, 0, 0] : f32 from vector<1x1x1xf32>
    %644 = arith.mulf %639, %639 : vector<16x16xf32>
    %645 = vector.shape_cast %644 : vector<16x16xf32> to vector<1x16x16xf32>
    %cst_209 = arith.constant dense<0.000000e+00> : vector<1xf32>
    %646 = vector.multi_reduction <add>, %645, %cst_209 [1, 2] : vector<1x16x16xf32> to vector<1xf32>
    %647 = vector.shape_cast %646 : vector<1xf32> to vector<1x1x1xf32>
    %648 = vector.extract %647[0, 0, 0] : f32 from vector<1x1x1xf32>
    %cst_210 = arith.constant 3.906250e-03 : f32
    %649 = arith.mulf %643, %cst_210 : f32
    %cst_211 = arith.constant 3.906250e-03 : f32
    %650 = arith.mulf %648, %cst_211 : f32
    %651 = arith.mulf %649, %649 : f32
    %652 = arith.subf %650, %651 : f32
    %cst_212 = arith.constant 0.000000e+00 : f32
    %653 = arith.maximumf %652, %cst_212 : f32
    %654 = vector.broadcast %649 : f32 to vector<16x16xf32>
    %655 = arith.subf %639, %654 : vector<16x16xf32>
    %cst_213 = arith.constant 9.99999974E-6 : f32
    %656 = arith.addf %653, %cst_213 : f32
    %657 = math.rsqrt %656 : f32
    %658 = vector.broadcast %657 : f32 to vector<16x16xf32>
    %659 = arith.mulf %655, %658 : vector<16x16xf32>
    %c0_214 = arith.constant 0 : index
    %c1_215 = arith.constant 1 : index
    %c55 = arith.constant 55 : index
    %660 = vector.load %arg1[%c0_214, %c1_215, %c55] : memref<1x18x72xf32, #tpu.memory_space<vmem>>, vector<1x16x16xf32>
    %661 = vector.shape_cast %660 : vector<1x16x16xf32> to vector<16x16xf32>
    %662 = arith.addf %659, %661 : vector<16x16xf32>
    %663 = tpu.concatenate %563, %596, %629, %662 in 1 : vector<16x16xf32>, vector<16x16xf32>, vector<16x16xf32>, vector<16x16xf32> -> vector<16x64xf32>
    %c0_216 = arith.constant 0 : index
    %c0_217 = arith.constant 0 : index
    %c0_218 = arith.constant 0 : index
    %664 = vector.load %arg6[%c0_216, %c0_217, %c0_218] : memref<1x16x64xf32, #tpu.memory_space<vmem>>, vector<1x16x64xf32>
    %665 = vector.shape_cast %664 : vector<1x16x64xf32> to vector<16x64xf32>
    %666 = vector.shape_cast %663 : vector<16x64xf32> to vector<1x16x64xf32>
    tpu.vector_store %arg6[%c0_216, %c0_217, %c0_218], %666 {strides = array<i32>} : memref<1x16x64xf32, #tpu.memory_space<vmem>>, vector<1x16x64xf32>,
    return
  }
  func.func @transform_0(%arg0: i32) -> (i32, i32, i32) {
    %c0_i32 = arith.constant 0 : i32
    %c0_i32_0 = arith.constant 0 : i32
    %c0_i32_1 = arith.constant 0 : i32
    return %arg0, %c0_i32, %c0_i32_0 : i32, i32, i32
  }
  func.func @transform_1(%arg0: i32) -> (i32, i32) {
    %c0_i32 = arith.constant 0 : i32
    %c0_i32_0 = arith.constant 0 : i32
    %c0_i32_1 = arith.constant 0 : i32
    return %c0_i32, %c0_i32_0 : i32, i32
  }
  func.func @transform_2(%arg0: i32) -> (i32, i32) {
    %c0_i32 = arith.constant 0 : i32
    %c0_i32_0 = arith.constant 0 : i32
    %c0_i32_1 = arith.constant 0 : i32
    return %c0_i32, %c0_i32_0 : i32, i32
  }
  func.func @transform_3(%arg0: i32) -> i32 {
    %c0_i32 = arith.constant 0 : i32
    %c0_i32_0 = arith.constant 0 : i32
    return %c0_i32 : i32
  }
  func.func @transform_4(%arg0: i32) -> i32 {
    %c0_i32 = arith.constant 0 : i32
    %c0_i32_0 = arith.constant 0 : i32
    return %c0_i32 : i32
  }
  func.func @transform_5(%arg0: i32) -> (i32, i32, i32) {
    %c0_i32 = arith.constant 0 : i32
    %c0_i32_0 = arith.constant 0 : i32
    %c0_i32_1 = arith.constant 0 : i32
    return %arg0, %c0_i32, %c0_i32_0 : i32, i32, i32
  }
}

</mosaic_0001>

<bundles_post_ra>
// kernel: residual_block.1
= control target key start
LH: loop header
LB: loop body
LE: loop exit
PB: predicated region body
PF: predicated region fallthrough
CT: control target
= control target key end

     0   :  { %10 = vsyncpa [#allocation4], 0  ;;  %s3371_s0 = inlined_call_operand.vmem [shape: f32[2,18,72], index: 0, kind: input, shape index: {}]   ;;  %s3372_s1 = inlined_call_operand.vmem [shape: f32[36,70], index: 1, kind: input, shape index: {}]   ;;  %s3373_s2 = inlined_call_operand.vmem [shape: f32[36,70], index: 2, kind: input, shape index: {}]   ;;  %s3374_s3 = inlined_call_operand.vmem [shape: f32[4], index: 3, kind: input, shape index: {}]   ;;  %s3375_s4 = inlined_call_operand.vmem [shape: f32[4], index: 4, kind: input, shape index: {}]   ;;  %s3376_s5 = inlined_call_operand.vmem [shape: f32[2,16,64], index: 5, kind: output, shape index: {}]  }
   0x1   :  { %11 = vsyncpa [#allocation6], 0  ;;  %s2457_s18 = smov 0  }
   0x2 LB: > { %s2463_s19 = sadd.s32 4294967295, %s2405_s18   ;;  %p2190_p0 = scmp.ge.s32.totalorder %s2405_s18, 1  ;;  %s2405_s18 = sphi %s2457_s18, %s17_s18  }
   0x3   : > { %p158_p1 = scmp.lt.s32.totalorder %s2405_s18, 3  ;;  %s177_s22 = sshll.u32 %s3374_s3, 4  ;;  %s178_s22 = int_to_ptr.vmem [resolvable:$true] %s177_s22 }
   0x4   : > { %p3377_p3 = scmp.eq.s32.totalorder %s2463_s19, 0  ;;  %s188_s26 = sshll.u32 %s3375_s4, 4  ;;  %s189_s26 = int_to_ptr.vmem [resolvable:$true] %s188_s26 }
   0x5   : > { %p2470_p2 = pnand %p2190_p0, %p158_p1  ;;  %s2361_s28 = scalar_lea.vmem %s178_s22, 16 }
   0x6   : > { %p2362_p6 = scmp.ne.s32.totalorder %s178_s22, %s2361_s28  ;;  %p2369_p10 = scmp.lt.s32.totalorder %s178_s22, %s178_s22 }
   0x7   : > { %s3379_s23 = scalar_select %p2470_p2, 1, 0 }
   0x8   : > { %p2314_p4 = pneg %p2470_p2  ;;  %p2370_p11 = scmp.lt.s32.totalorder %s2361_s28, %s2361_s28 }
   0xa   : > { %p2482_p5 = pnand %p3377_p3, %p2314_p4  ;;  %p2371_p12 = por %p2370_p11, %p2369_p10 }
   0xc   : > { %p2363_p7 = pneg %p2482_p5 }
   0xe   : > { %p2364_p8 = pnand %p2363_p7, %p2362_p6 }
  0x10   : > { %p2365_p9 = pneg %p2364_p8 }
  0x12   : > { %p2372_p13 = pnand %p2371_p12, %p2365_p9 }
  0x14   : > { %2375 = shalt.err (!%p2372_p13)
}
  0x15   : > { %s2407_s29 = smov [#allocation3]   ;;  %s2376_s30 = scalar_lea.vmem %s189_s26, 16 }
  0x16   : > { %2317 = dma.vmem_to_smem (!%p2482_p5), %s178_s22, 16, %s2407_s29, [#allocation4]  }
  0x17   : > { %p2377_p0 = scmp.ne.s32.totalorder %s189_s26, %s2376_s30  ;;  %p2384_p3 = scmp.lt.s32.totalorder %s189_s26, %s189_s26 }
  0x18   : > { %p2385_p2 = scmp.lt.s32.totalorder %s2376_s30, %s2376_s30 }
  0x19   : > { %p2379_p1 = pnand %p2377_p0, %p2363_p7 }
  0x1a   : > { %p2386_p6 = por %p2385_p2, %p2384_p3 }
  0x1b   : > { %p2380_p4 = pneg %p2379_p1 }
  0x1d   : > { %p2387_p8 = pnand %p2386_p6, %p2380_p4 }
  0x1f   : > { %2390 = shalt.err (!%p2387_p8)
}
  0x20   : > { %s2408_s6 = smov [#allocation5]   ;;  %p3381_p9 = scmp.ne.s32.totalorder %s3379_s23, 0 }
  0x21   : > { %2320 = dma.vmem_to_smem (!%p2482_p5), %s189_s26, 16, %s2408_s6, [#allocation6]  }
  0x22   : > { %209 = sbr.rel (%p3381_p9) target bundleno = 2186 (0x88a), region = 40  ;;  %p3382_p10 = scmp.eq.s32.totalorder (!%p3381_p9), %s2463_s19, 0 }
  0x29   : > { %2396 = dma.done.wait (%p3382_p10), [#allocation4], 16   ;;  %p3383_p11 = pmov %p3382_p10 }
  0x2a   : > { %p3384_p7 = pmov %p3382_p10 }
  0x2b   : > { %2398 = vsyncadd (%p3383_p11), [#allocation4], 4294967280 }
  0x2c   : > { %2400 = dma.done.wait (%p3384_p7), [#allocation6], 16   ;;  %p3385_p2 = pmov %p3384_p7 }
  0x2e   : > { %2402 = vsyncadd (%p3385_p2), [#allocation6], 4294967280 }
  0x2f   : > { %219 = sfence }
  0x30   : > { %v2221_v0 = vld [vmem:[%s3372_s1 + $0xe] ss:$0 sm:$0xff]  ;;  %s2409_s9 = smov 2   ;;  %v2223_v1 = vld [vmem:[%s3372_s1 + $0x20] ss:$0 sm:$0xff]  ;;  %p242_p3 = scmp.lt.s32.totalorder %s2463_s19, 1 }
  0x31   : > { %591 = vrot.lane.b32.xlu0 %v2221_v0, %s2409_s9  ;;  %v2222_v2 = vld [vmem:[%s3372_s1 + $0x17] ss:$0 sm:$0xff]  ;;  %633 = vrot.lane.b32.xlu1 %v2223_v1, %s2409_s9  ;;  %v2209_v3 = vld [vmem:[%s3372_s1 + $0xb] ss:$0 sm:$0xff]  ;;  %s2410_s24 = smov 1   ;;  %s2411_s17 = smov 127  }
  0x32   : > { %v2210_v4 = vld [vmem:[%s3372_s1 + $0x14] ss:$0 sm:$0xff]  ;;  %v2205_v5 = vld [vmem:[%s3372_s1 + $0xa] ss:$0 sm:$0xff]  ;;  %s3387_s19 = smov (!%p242_p3, %s2463_s19), 1  ;;  %s2412_s6 = smov 126  }
  0x33   : > { %v2211_v6 = vld [vmem:[%s3372_s1 + $0x1d] ss:$0 sm:$0xff]  ;;  %v2217_v7 = vld [vmem:[%s3372_s1 + $0xd] ss:$0 sm:$0xff]  ;;  %s2281_s27 = smul.u32 24, %s3387_s19  ;;  %s2413_s25 = smov 110  }
  0x34   : > { %v2206_v8 = vld [vmem:[%s3372_s1 + $0x13] ss:$0 sm:$0xff]  ;;  %v2218_v9 = vld [vmem:[%s3372_s1 + $0x16] ss:$0 sm:$0xff]  ;;  %v2220_v10 = vld [vmem:[%s3372_s1 + $0x5] ss:$0 sm:$0xff] }
  0x35   : > { %612 = vrot.lane.b32.xlu0 %v2222_v2, %s2409_s9  ;;  %353 = vrot.lane.b32.xlu1 %v2209_v3, %s2409_s9  ;;  %s2548_s10 = scalar_lea.vmem %s3371_s0, %s2281_s27  ;;  %v2213_v12 = vld [vmem:[%s3372_s1 + $0xc] ss:$0 sm:$0xff]  ;;  %v2207_v13 = vld [vmem:[%s3372_s1 + $0x1c] ss:$0 sm:$0xff]  ;;  %s2414_s26 = smov 92   ;;  %vm918_vm8 = vcmask 7168  }
  0x36   : > { %v2556_v11 = vld [vmem:[%s2548_s10 + $0x1] sm:$0xff]  ;;  %v2567_v15 = vld [vmem:[%s2548_s10 + $0x9] sm:$0xff]  ;;  %v2214_v17 = vld [vmem:[%s3372_s1 + $0x15] ss:$0 sm:$0xff]  ;;  %s2415_s27 = smov 74   ;;  %s2236_s8 = sld [smem:[#allocation3 + $0x1]] }
  0x37   : > { %v434_v14 = vmul.f32 %v2213_v12, %v2556_v11  ;;  %v435_v16 = vmul.f32 %v2213_v12, %v2567_v15  ;;  %v2219_v18 = vld [vmem:[%s3372_s1 + $0x1f] ss:$0 sm:$0xff]  ;;  %v451_v19 = vmul.f32 %v2214_v17, %v2556_v11  ;;  %v452_v20 = vmul.f32 %v2214_v17, %v2567_v15  ;;  %v2215_v21 = vld [vmem:[%s3372_s1 + $0x1e] ss:$0 sm:$0xff]  ;;  %v2229_v24 = vld [vmem:[%s3372_s1 + $0x10] ss:$0 sm:$0xff] }
  0x38   : > { %v468_v22 = vmul.f32 %v2215_v21, %v2556_v11  ;;  %v469_v23 = vmul.f32 %v2215_v21, %v2567_v15  ;;  %v2233_v25 = vld [vmem:[%s3372_s1 + $0x11] ss:$0 sm:$0xff]  ;;  %v2230_v26 = vld [vmem:[%s3372_s1 + $0x19] ss:$0 sm:$0xff]  ;;  %v2234_v27 = vld [vmem:[%s3372_s1 + $0x1a] ss:$0 sm:$0xff] }
  0x39   : > { %374 = vrot.lane.b32.xlu0 %v2210_v4, %s2409_s9  ;;  %299 = vrot.lane.b32.xlu1 %v2205_v5, %s2410_s24  ;;  %v2231_v28 = vld [vmem:[%s3372_s1 + $0x22] ss:$0 sm:$0xff]  ;;  %v2235_v29 = vld [vmem:[%s3372_s1 + $0x23] ss:$0 sm:$0xff]  ;;  %s2237_s11 = sld [smem:[#allocation3 + $0x2]]  ;;  %s2238_s12 = sld [smem:[#allocation3 + $0x3]] }
  0x3a   : > { %v2208_v30 = vld [vmem:[%s3372_s1 + $0x2] ss:$0 sm:$0xff]  ;;  %v2216_v41 = vld [vmem:[%s3372_s1 + $0x4] ss:$0 sm:$0xff]  ;;  %v2204_v42 = vld [vmem:[%s3372_s1 + $0x1] ss:$0 sm:$0xff] }
  0x3b   : > { %v2212_v43 = vld [vmem:[%s3372_s1 + $0x3] ss:$0 sm:$0xff]  ;;  %v2232_v48 = vld [vmem:[%s3372_s1 + $0x8] ss:$0 sm:$0xff]  ;;  %v2228_v49 = vld [vmem:[%s3372_s1 + $0x7] ss:$0 sm:$0xff] }
  0x3c   : > { %v418_v45 = vmul.f32 %v2212_v43, %v2567_v15  ;;  %v417_v46 = vmul.f32 %v2212_v43, %v2556_v11  ;;  %v2655_v51 = vld [vmem:[%s2548_s10] sm:$0xff]  ;;  %v2658_v52 = vld [vmem:[%s2548_s10 + $0x8] sm:$0xff]  ;;  %s2416_s13 = smov 3   ;;  %s888_s14 = sld [smem:[#allocation3]]  ;;  %vm921_vm9 = vcmask 138240   ;;  %vm924_vm10 = vcmask 146432  }
  0x3d   : > { %395 = vrot.lane.b32.xlu0 %v2211_v6, %s2409_s9  ;;  %507 = vrot.lane.b32.xlu1 %v2217_v7, %s2410_s24  ;;  %s2417_s15 = smov 18   ;;  %s2418_s16 = smov 36   ;;  %vm995_vm11 = vcmask 294032   ;;  %vm1066_vm12 = vcmask 441632   ;;  %vm1137_vm13 = vcmask 589232   ;;  %vm1141_vm14 = vcmask 581632  }
  0x3e   : > { %s2419_s20 = smov 54   ;;  %s1781_s29 = sld [smem:[#allocation5]]  ;;  %vm1785_vm15 = vcmask 130048  }
  0x3f   : > { %s2276_s22 = sld [smem:[#allocation5 + $0x2]] }
  0x41   : > { %310 = vrot.lane.b32.xlu0 %v2206_v8, %s2410_s24  ;;  %528 = vrot.lane.b32.xlu1 %v2218_v9, %s2410_s24 }
  0x45   : > { %570 = vrot.lane.b32.xlu0 %v2220_v10, %s2409_s9  ;;  %321 = vrot.lane.b32.xlu1 %v2207_v13, %s2410_s24  ;;  %v2691_v13 = vld [vmem:[%s2548_s10 + $0x2] sm:$0xff] }
  0x49   : > { %438 = vrot.lane.b32.xlu0 %v434_v14, %s2410_s24  ;;  %440 = vrot.lane.b32.xlu1 %v435_v16, %s2410_s24  ;;  %v2694_v14 = vld [vmem:[%s2548_s10 + $0xa] sm:$0xff] }
  0x4d   : > { %549 = vrot.lane.b32.xlu0 %v2219_v18, %s2410_s24  ;;  %455 = vrot.lane.b32.xlu1 %v451_v19, %s2410_s24 }
  0x51   : > { %457 = vrot.lane.b32.xlu0 %v452_v20, %s2410_s24  ;;  %472 = vrot.lane.b32.xlu1 %v468_v22, %s2410_s24 }
  0x55   : > { %474 = vrot.lane.b32.xlu0 %v469_v23, %s2410_s24  ;;  %705 = vrot.lane.b32.xlu1 %v2229_v24, %s2410_s24 }
  0x59   : > { %765 = vrot.lane.b32.xlu0 %v2233_v25, %s2409_s9  ;;  %718 = vrot.lane.b32.xlu1 %v2230_v26, %s2410_s24 }
  0x5d   : > { %786 = vrot.lane.b32.xlu0 %v2234_v27, %s2409_s9  ;;  %731 = vrot.lane.b32.xlu1 %v2231_v28, %s2410_s24 }
  0x61   : > { %807 = vrot.lane.b32.xlu0 %v2235_v29, %s2409_s9  ;;  %332 = vrot.lane.b32.xlu1 %v2208_v30, %s2409_s9 }
  0xa3   : > { %v592_v31 = vpop.permute.xlu0 %591  ;;  %v634_v35 = vpop.permute.xlu1 %633 }
  0xa4   : > { %v594_v32 = vmul.f32 %v592_v31, %v2556_v11  ;;  %v595_v33 = vmul.f32 %v592_v31, %v2567_v15  ;;  %v636_v38 = vmul.f32 %v634_v35, %v2556_v11  ;;  %v637_v39 = vmul.f32 %v634_v35, %v2567_v15 }
  0xa6   : > { %598 = vrot.lane.b32.xlu1 %v594_v32, %s2411_s17  ;;  %600 = vrot.lane.b32.xlu0 %v595_v33, %s2411_s17 }
  0xa7   : > { %v613_v34 = vpop.permute.xlu0 %612  ;;  %v354_v50 = vpop.permute.xlu1 %353 }
  0xa8   : > { %v615_v36 = vmul.f32 %v613_v34, %v2556_v11  ;;  %v616_v37 = vmul.f32 %v613_v34, %v2567_v15  ;;  %v356_v54 = vmul.f32 %v354_v50, %v2655_v51  ;;  %v357_v55 = vmul.f32 %v354_v50, %v2658_v52 }
  0xaa   : > { %619 = vrot.lane.b32.xlu1 %v615_v36, %s2411_s17  ;;  %621 = vrot.lane.b32.xlu0 %v616_v37, %s2411_s17 }
  0xab   : > { %v375_v40 = vpop.permute.xlu0 %374  ;;  %v300_v56 = vpop.permute.xlu1 %299 }
  0xac   : > { %v377_v58 = vmul.f32 %v375_v40, %v2655_v51  ;;  %v378_v59 = vmul.f32 %v375_v40, %v2658_v52  ;;  %v302_v32 = vmul.f32 %v300_v56, %v2655_v51  ;;  %v303_v33 = vmul.f32 %v300_v56, %v2658_v52 }
  0xae   : > { %640 = vrot.lane.b32.xlu1 %v636_v38, %s2411_s17  ;;  %642 = vrot.lane.b32.xlu0 %v637_v39, %s2411_s17 }
  0xaf   : > { %v396_v44 = vpop.permute.xlu0 %395  ;;  %v508_v61 = vpop.permute.xlu1 %507 }
  0xb0   : > { %v398_v62 = vmul.f32 %v396_v44, %v2655_v51  ;;  %v399_v63 = vmul.f32 %v396_v44, %v2658_v52  ;;  %v510_v1 = vmul.f32 %v508_v61, %v2556_v11  ;;  %v511_v2 = vmul.f32 %v508_v61, %v2567_v15 }
  0xb2   : > { %486 = vrot.lane.b32.xlu1 %v2216_v41, %s2410_s24  ;;  %288 = vrot.lane.b32.xlu0 %v2204_v42, %s2410_s24 }
  0xb3   : > { %v2644_v47 = vpop.permute.xlu0 %310  ;;  %v529_v3 = vpop.permute.xlu1 %528 }
  0xb4   : > { %v531_v5 = vmul.f32 %v529_v3, %v2556_v11  ;;  %v532_v6 = vmul.f32 %v529_v3, %v2567_v15  ;;  %v313_v34 = vmul.f32 %v2644_v47, %v2655_v51  ;;  %v314_v35 = vmul.f32 %v2644_v47, %v2658_v52 }
  0xb6   : > { %423 = vrot.lane.b32.xlu1 %v418_v45, %s2410_s24  ;;  %421 = vrot.lane.b32.xlu0 %v417_v46, %s2410_s24 }
  0xb7   : > { %v571_v53 = vpop.permute.xlu0 %570  ;;  %v322_v24 = vpop.permute.xlu1 %321 }
  0xb8   : > { %v573_v7 = vmul.f32 %v571_v53, %v2556_v11  ;;  %v574_v8 = vmul.f32 %v571_v53, %v2567_v15  ;;  %v324_v44 = vmul.f32 %v322_v24, %v2655_v51  ;;  %v325_v45 = vmul.f32 %v322_v24, %v2658_v52 }
  0xba   : > { %744 = vrot.lane.b32.xlu1 %v2232_v48, %s2409_s9  ;;  %692 = vrot.lane.b32.xlu0 %v2228_v49, %s2410_s24 }
  0xbb   : > { %v439_v57 = vpop.permute.xlu0 %438  ;;  %v441_v25 = vpop.permute.xlu1 %440 }
  0xbc   : > { %v444_v36 = vadd.f32 %v439_v57, %v302_v32  ;;  %v445_v37 = vadd.f32 %v441_v25, %v303_v33 }
  0xbe   : > { %362 = vrot.lane.b32.xlu1 %v357_v55, %s2412_s6  ;;  %360 = vrot.lane.b32.xlu0 %v356_v54, %s2412_s6 }
  0xbf   : > { %v550_v60 = vpop.permute.xlu0 %549  ;;  %v456_v26 = vpop.permute.xlu1 %455 }
  0xc0   : > { %v552_v10 = vmul.f32 %v550_v60, %v2556_v11  ;;  %v553_v12 = vmul.f32 %v550_v60, %v2567_v15  ;;  %v461_v48 = vadd.f32 %v456_v26, %v313_v34 }
  0xc2   : > { %383 = vrot.lane.b32.xlu1 %v378_v59, %s2412_s6  ;;  %381 = vrot.lane.b32.xlu0 %v377_v58, %s2412_s6 }
  0xc3   : > { %v458_v0 = vpop.permute.xlu0 %457  ;;  %v473_v27 = vpop.permute.xlu1 %472 }
  0xc4   : > { %v462_v46 = vadd.f32 %v458_v0, %v314_v35  ;;  %v478_v58 = vadd.f32 %v473_v27, %v324_v44  ;;  %v2201_v44 = vld [vmem:[%s3372_s1 + $0x9] ss:$0 sm:$0xff] }
  0xc6   : > { %404 = vrot.lane.b32.xlu1 %v399_v63, %s2412_s6  ;;  %402 = vrot.lane.b32.xlu0 %v398_v62, %s2412_s6 }
  0xc7   : > { %v2676_v4 = vpop.permute.xlu0 %474  ;;  %v706_v28 = vpop.permute.xlu1 %705 }
  0xc8   : > { %v708_v40 = vmul.f32 %v706_v28, %v2691_v13  ;;  %v709_v41 = vmul.f32 %v706_v28, %v2694_v14  ;;  %v479_v61 = vadd.f32 %v2676_v4, %v325_v45  ;;  %v267_v45 = vmul.f32 %v2201_v44, %v2658_v52 }
  0xca   : > { %516 = vrot.lane.b32.xlu1 %v511_v2, %s2411_s17  ;;  %514 = vrot.lane.b32.xlu0 %v510_v1, %s2411_s17 }
  0xcb   : > { %v766_v9 = vpop.permute.xlu0 %765  ;;  %v719_v29 = vpop.permute.xlu1 %718 }
  0xcc   : > { %v768_v17 = vmul.f32 %v766_v9, %v2691_v13  ;;  %v769_v18 = vmul.f32 %v766_v9, %v2694_v14  ;;  %v721_v47 = vmul.f32 %v719_v29, %v2691_v13  ;;  %v722_v55 = vmul.f32 %v719_v29, %v2694_v14 }
  0xce   : > { %537 = vrot.lane.b32.xlu1 %v532_v6, %s2411_s17  ;;  %535 = vrot.lane.b32.xlu0 %v531_v5, %s2411_s17 }
  0xcf   : > { %v787_v16 = vpop.permute.xlu0 %786  ;;  %v732_v30 = vpop.permute.xlu1 %731 }
  0xd0   : > { %v789_v19 = vmul.f32 %v787_v16, %v2691_v13  ;;  %v790_v20 = vmul.f32 %v787_v16, %v2694_v14  ;;  %v734_v62 = vmul.f32 %v732_v30, %v2691_v13  ;;  %v735_v1 = vmul.f32 %v732_v30, %v2694_v14 }
  0xd2   : > { %579 = vrot.lane.b32.xlu1 %v574_v8, %s2411_s17  ;;  %577 = vrot.lane.b32.xlu0 %v573_v7, %s2411_s17 }
  0xd3   : > { %v808_v21 = vpop.permute.xlu0 %807  ;;  %v333_v31 = vpop.permute.xlu1 %332 }
  0xd4   : > { %v810_v22 = vmul.f32 %v808_v21, %v2691_v13  ;;  %v811_v23 = vmul.f32 %v808_v21, %v2694_v14  ;;  %v336_v4 = vmul.f32 %v333_v31, %v2658_v52  ;;  %v335_v9 = vmul.f32 %v333_v31, %v2655_v51 }
  0xd6   : > { %558 = vrot.lane.b32.xlu1 %v553_v12, %s2411_s17  ;;  %556 = vrot.lane.b32.xlu0 %v552_v10, %s2411_s17 }
  0xda   : > { %774 = vrot.lane.b32.xlu1 %v769_v18, %s2412_s6  ;;  %772 = vrot.lane.b32.xlu0 %v768_v17, %s2412_s6 }
  0xde   : > { %795 = vrot.lane.b32.xlu1 %v790_v20, %s2412_s6  ;;  %793 = vrot.lane.b32.xlu0 %v789_v19, %s2412_s6 }
  0xe2   : > { %816 = vrot.lane.b32.xlu1 %v811_v23, %s2412_s6  ;;  %814 = vrot.lane.b32.xlu0 %v810_v22, %s2412_s6 }
 0x118   : > { %v599_v38 = vpop.permute.xlu1 %598  ;;  %v601_v39 = vpop.permute.xlu0 %600 }
 0x119   : > { %v604_v42 = vadd.f32 %v599_v38, %v444_v36  ;;  %v605_v43 = vadd.f32 %v601_v39, %v445_v37 }
 0x11b   : > { %v710_v49 = vadd.f32 %v708_v40, %v604_v42  ;;  %v711_v50 = vadd.f32 %v709_v41, %v605_v43 }
 0x11c   : > { %v620_v53 = vpop.permute.xlu1 %619  ;;  %v622_v54 = vpop.permute.xlu0 %621 }
 0x11d   : > { %v625_v56 = vadd.f32 %v620_v53, %v461_v48  ;;  %v626_v57 = vadd.f32 %v622_v54, %v462_v46  ;;  %836 = vrot.lane.b32.xlu1 %v711_v50, %s2411_s17  ;;  %834 = vrot.lane.b32.xlu0 %v710_v49, %s2411_s17  ;;  %v266_v46 = vmul.f32 %v2201_v44, %v2655_v51  ;;  %v2202_v48 = vld [vmem:[%s3372_s1 + $0x12] ss:$0 sm:$0xff]  ;;  %v2200_v44 = vld [vmem:[%s3372_s1] ss:$0 sm:$0xff] }
 0x11e   : > { %v274_v54 = vmul.f32 %v2202_v48, %v2658_v52 }
 0x11f   : > { %v723_v59 = vadd.f32 %v721_v47, %v625_v56  ;;  %v724_v60 = vadd.f32 %v722_v55, %v626_v57  ;;  %v273_v55 = vmul.f32 %v2202_v48, %v2655_v51  ;;  %v2225_v56 = vld [vmem:[%s3372_s1 + $0xf] ss:$0 sm:$0xff]  ;;  %v260_v48 = vmul.f32 %v2200_v44, %v2658_v52 }
 0x120   : > { %v641_v63 = vpop.permute.xlu1 %640  ;;  %v643_v0 = vpop.permute.xlu0 %642  ;;  %v665_v57 = vmul.f32 %v2225_v56, %v2694_v14 }
 0x121   : > { %v646_v2 = vadd.f32 %v641_v63, %v478_v58  ;;  %v647_v3 = vadd.f32 %v643_v0, %v479_v61  ;;  %846 = vrot.lane.b32.xlu1 %v724_v60, %s2411_s17  ;;  %844 = vrot.lane.b32.xlu0 %v723_v59, %s2411_s17  ;;  %v664_v58 = vmul.f32 %v2225_v56, %v2691_v13  ;;  %v2203_v63 = vld [vmem:[%s3372_s1 + $0x1b] ss:$0 sm:$0xff] }
 0x123   : > { %v736_v5 = vadd.f32 %v734_v62, %v646_v2  ;;  %v737_v6 = vadd.f32 %v735_v1, %v647_v3  ;;  %v2226_v2 = vld [vmem:[%s3372_s1 + $0x18] ss:$0 sm:$0xff]  ;;  %v281_v3 = vmul.f32 %v2203_v63, %v2658_v52 }
 0x124   : > { %v487_v7 = vpop.permute.xlu1 %486  ;;  %v289_v8 = vpop.permute.xlu0 %288 }
 0x125   : > { %856 = vrot.lane.b32.xlu1 %v737_v6, %s2411_s17  ;;  %854 = vrot.lane.b32.xlu0 %v736_v5, %s2411_s17  ;;  %v490_v16 = vmul.f32 %v487_v7, %v2567_v15  ;;  %v489_v17 = vmul.f32 %v487_v7, %v2556_v11  ;;  %v291_v28 = vmul.f32 %v289_v8, %v2655_v51 }
 0x126   : > { %v292_v29 = vmul.f32 %v289_v8, %v2658_v52  ;;  %v280_v5 = vmul.f32 %v2203_v63, %v2655_v51  ;;  %v674_v6 = vmul.f32 %v2226_v2, %v2694_v14  ;;  %v673_v7 = vmul.f32 %v2226_v2, %v2691_v13 }
 0x128   : > { %v424_v10 = vpop.permute.xlu1 %423  ;;  %v422_v12 = vpop.permute.xlu0 %421 }
 0x129   : > { %341 = vrot.lane.b32.xlu1 %v336_v4, %s2412_s6  ;;  %339 = vrot.lane.b32.xlu0 %v335_v9, %s2412_s6  ;;  %v428_v32 = vadd.f32 %v424_v10, %v292_v29  ;;  %v427_v33 = vadd.f32 %v422_v12, %v291_v28 }
 0x12c   : > { %v745_v18 = vpop.permute.xlu1 %744  ;;  %v693_v19 = vpop.permute.xlu0 %692 }
 0x12d   : > { %v748_v20 = vmul.f32 %v745_v18, %v2694_v14  ;;  %495 = vrot.lane.b32.xlu1 %v490_v16, %s2411_s17  ;;  %v747_v21 = vmul.f32 %v745_v18, %v2691_v13  ;;  %493 = vrot.lane.b32.xlu0 %v489_v17, %s2411_s17  ;;  %v695_v34 = vmul.f32 %v693_v19, %v2691_v13 }
 0x12e   : > { %v696_v35 = vmul.f32 %v693_v19, %v2694_v14 }
 0x130   : > { %v363_v22 = vpop.permute.xlu1 %362  ;;  %v361_v23 = vpop.permute.xlu0 %360 }
 0x131   : > { %753 = vrot.lane.b32.xlu1 %v748_v20, %s2412_s6  ;;  %751 = vrot.lane.b32.xlu0 %v747_v21, %s2412_s6  ;;  %v367_v47 = vadd.f32 %v363_v22, %v267_v45  ;;  %v366_v53 = vadd.f32 %v361_v23, %v266_v46  ;;  %v2227_v23 = vld [vmem:[%s3372_s1 + $0x21] ss:$0 sm:$0xff] }
 0x132   : > { %v683_v29 = vmul.f32 %v2227_v23, %v2694_v14 }
 0x134   : > { %v384_v15 = vpop.permute.xlu1 %383  ;;  %v382_v11 = vpop.permute.xlu0 %381 }
 0x135   : > { %v388_v61 = vadd.f32 %v384_v15, %v274_v54  ;;  %v387_v62 = vadd.f32 %v382_v11, %v273_v55 }
 0x138   : > { %v405_v24 = vpop.permute.xlu1 %404  ;;  %v403_v25 = vpop.permute.xlu0 %402 }
 0x139   : > { %v409_v17 = vadd.f32 %v405_v24, %v281_v3  ;;  %v408_v18 = vadd.f32 %v403_v25, %v280_v5  ;;  %v682_v24 = vmul.f32 %v2227_v23, %v2691_v13 }
 0x13c   : > { %v517_v26 = vpop.permute.xlu1 %516  ;;  %v515_v27 = vpop.permute.xlu0 %514 }
 0x13d   : > { %v521_v0 = vadd.f32 %v517_v26, %v367_v47  ;;  %v520_v1 = vadd.f32 %v515_v27, %v366_v53 }
 0x13f   : > { %v667_v9 = vadd.f32 %v665_v57, %v521_v0  ;;  %v666_v10 = vadd.f32 %v664_v58, %v520_v1 }
 0x140   : > { %v538_v30 = vpop.permute.xlu1 %537  ;;  %v536_v31 = vpop.permute.xlu0 %535 }
 0x141   : > { %v542_v8 = vadd.f32 %v538_v30, %v388_v61  ;;  %v541_v4 = vadd.f32 %v536_v31, %v387_v62 }
 0x143   : > { %v676_v21 = vadd.f32 %v674_v6, %v542_v8  ;;  %v675_v22 = vadd.f32 %v673_v7, %v541_v4 }
 0x144   : > { %v580_v36 = vpop.permute.xlu1 %579  ;;  %v578_v37 = vpop.permute.xlu0 %577 }
 0x145   : > { %v584_v38 = vadd.f32 %v580_v36, %v428_v32  ;;  %v583_v39 = vadd.f32 %v578_v37, %v427_v33 }
 0x147   : > { %v698_v40 = vadd.f32 %v696_v35, %v584_v38  ;;  %v697_v41 = vadd.f32 %v695_v34, %v583_v39 }
 0x148   : > { %v559_v42 = vpop.permute.xlu1 %558  ;;  %v557_v43 = vpop.permute.xlu0 %556 }
 0x149   : > { %826 = vrot.lane.b32.xlu1 %v698_v40, %s2411_s17  ;;  %824 = vrot.lane.b32.xlu0 %v697_v41, %s2411_s17  ;;  %v563_v28 = vadd.f32 %v559_v42, %v409_v17  ;;  %v562_v25 = vadd.f32 %v557_v43, %v408_v18 }
 0x14b   : > { %v685_v36 = vadd.f32 %v683_v29, %v563_v28  ;;  %v684_v37 = vadd.f32 %v682_v24, %v562_v25 }
 0x14c   : > { %v775_v49 = vpop.permute.xlu1 %774  ;;  %v773_v50 = vpop.permute.xlu0 %772 }
 0x14d   : > { %v779_v19 = vadd.f32 %v775_v49, %v667_v9  ;;  %v778_v20 = vadd.f32 %v773_v50, %v666_v10  ;;  %v259_v49 = vmul.f32 %v2200_v44, %v2655_v51  ;;  %v2224_v50 = vld [vmem:[%s3372_s1 + $0x6] ss:$0 sm:$0xff] }
 0x14e   : > { %v656_v56 = vmul.f32 %v2224_v50, %v2694_v14  ;;  %v655_v51 = vmul.f32 %v2224_v50, %v2691_v13 }
 0x150   : > { %v796_v59 = vpop.permute.xlu1 %795  ;;  %v794_v60 = vpop.permute.xlu0 %793 }
 0x151   : > { %v800_v30 = vadd.f32 %v796_v59, %v676_v21  ;;  %v799_v31 = vadd.f32 %v794_v60, %v675_v22 }
 0x154   : > { %v817_v12 = vpop.permute.xlu1 %816  ;;  %v815_v16 = vpop.permute.xlu0 %814 }
 0x155   : > { %v821_v40 = vadd.f32 %v817_v12, %v685_v36  ;;  %v820_v41 = vadd.f32 %v815_v16, %v684_v37  ;;  %v1025_v36 = vstv %s2237_s11 }
 0x18f   : > { %v837_v15 = vpop.permute.xlu1 %836  ;;  %v835_v11 = vpop.permute.xlu0 %834 }
 0x190   : > { %v2777_v26 = vadd.f32 %v837_v15, %v779_v19  ;;  %v2779_v27 = vadd.f32 %v835_v11, %v778_v20  ;;  %v954_v20 = vstv %s2236_s8 }
 0x192   : > { %931 = vrot.lane.b32.xlu1 %v2777_v26, %s2413_s25  ;;  %929 = vrot.lane.b32.xlu0 %v2779_v27, %s2413_s25 }
 0x193   : > { %v847_v32 = vpop.permute.xlu1 %846  ;;  %v845_v33 = vpop.permute.xlu0 %844 }
 0x194   : > { %v2787_v34 = vadd.f32 %v847_v32, %v800_v30  ;;  %v2789_v35 = vadd.f32 %v845_v33, %v799_v31 }
 0x196   : > { %1002 = vrot.lane.b32.xlu1 %v2787_v34, %s2413_s25  ;;  %1000 = vrot.lane.b32.xlu0 %v2789_v35, %s2413_s25 }
 0x197   : > { %v857_v38 = vpop.permute.xlu1 %856  ;;  %v855_v39 = vpop.permute.xlu0 %854 }
 0x198   : > { %v2799_v42 = vadd.f32 %v857_v38, %v821_v40  ;;  %v2801_v43 = vadd.f32 %v855_v39, %v820_v41 }
 0x19a   : > { %939 = vrot.lane.b32.xlu1 %v2777_v26, %s2414_s26  ;;  %937 = vrot.lane.b32.xlu0 %v2779_v27, %s2414_s26 }
 0x19b   : > { %v342_v45 = vpop.permute.xlu1 %341  ;;  %v340_v46 = vpop.permute.xlu0 %339 }
 0x19c   : > { %v346_v54 = vadd.f32 %v342_v45, %v260_v48  ;;  %v345_v55 = vadd.f32 %v340_v46, %v259_v49 }
 0x19e   : > { %1073 = vrot.lane.b32.xlu1 %v2799_v42, %s2413_s25  ;;  %1071 = vrot.lane.b32.xlu0 %v2801_v43, %s2413_s25 }
 0x19f   : > { %v496_v47 = vpop.permute.xlu1 %495  ;;  %v494_v53 = vpop.permute.xlu0 %493 }
 0x1a0   : > { %v500_v57 = vadd.f32 %v496_v47, %v346_v54  ;;  %v499_v52 = vadd.f32 %v494_v53, %v345_v55 }
 0x1a2   : > { %1010 = vrot.lane.b32.xlu1 %v2787_v34, %s2414_s26  ;;  %1008 = vrot.lane.b32.xlu0 %v2789_v35, %s2414_s26  ;;  %v658_v58 = vadd.f32 %v656_v56, %v500_v57  ;;  %v657_v59 = vadd.f32 %v655_v51, %v499_v52  ;;  %v1096_v56 = vstv %s2238_s12 }
 0x1a3   : > { %v754_v60 = vpop.permute.xlu1 %753  ;;  %v752_v61 = vpop.permute.xlu0 %751 }
 0x1a4   : > { %v758_v62 = vadd.f32 %v754_v60, %v658_v58  ;;  %v757_v63 = vadd.f32 %v752_v61, %v657_v59 }
 0x1a6   : > { %947 = vrot.lane.b32.xlu1 %v2777_v26, %s2415_s27  ;;  %945 = vrot.lane.b32.xlu0 %v2779_v27, %s2415_s27 }
 0x1aa   : > { %1081 = vrot.lane.b32.xlu1 %v2799_v42, %s2414_s26  ;;  %1079 = vrot.lane.b32.xlu0 %v2801_v43, %s2414_s26 }
 0x1ae   : > { %1018 = vrot.lane.b32.xlu1 %v2787_v34, %s2415_s27  ;;  %1016 = vrot.lane.b32.xlu0 %v2789_v35, %s2415_s27 }
 0x1b2   : > { %1089 = vrot.lane.b32.xlu1 %v2799_v42, %s2415_s27  ;;  %1087 = vrot.lane.b32.xlu0 %v2801_v43, %s2415_s27 }
 0x1bb   : > { %v827_v0 = vpop.permute.xlu1 %826  ;;  %v825_v1 = vpop.permute.xlu0 %824 }
 0x1bc   : > { %v2837_v2 = vadd.f32 %v827_v0, %v758_v62  ;;  %v2839_v14 = vadd.f32 %v825_v1, %v757_v63 }
 0x1be   : > { %866 = vrot.lane.b32.xlu1 %v2837_v2, %s2413_s25  ;;  %864 = vrot.lane.b32.xlu0 %v2839_v14, %s2413_s25 }
 0x1c2   : > { %874 = vrot.lane.b32.xlu1 %v2837_v2, %s2414_s26  ;;  %872 = vrot.lane.b32.xlu0 %v2839_v14, %s2414_s26 }
 0x1c6   : > { %882 = vrot.lane.b32.xlu1 %v2837_v2, %s2415_s27  ;;  %880 = vrot.lane.b32.xlu0 %v2839_v14, %s2415_s27 }
 0x204   : > { %v932_v13 = vpop.permute.xlu1 %931  ;;  %v930_v3 = vpop.permute.xlu0 %929 }
 0x205   : > { %v936_v16 = vadd.f32 %v932_v13, %v2777_v26  ;;  %v935_v17 = vadd.f32 %v930_v3, %v2779_v27 }
 0x208   : > { %v1003_v5 = vpop.permute.xlu1 %1002  ;;  %v1001_v6 = vpop.permute.xlu0 %1000 }
 0x209   : > { %v1007_v25 = vadd.f32 %v1003_v5, %v2787_v34  ;;  %v1006_v30 = vadd.f32 %v1001_v6, %v2789_v35  ;;  %v889_v5 = vstv %s888_s14 }
 0x20c   : > { %v940_v7 = vpop.permute.xlu1 %939  ;;  %v938_v8 = vpop.permute.xlu0 %937 }
 0x20d   : > { %v944_v18 = vadd.f32 %v940_v7, %v936_v16  ;;  %v943_v19 = vadd.f32 %v938_v8, %v935_v17 }
 0x210   : > { %v1074_v4 = vpop.permute.xlu1 %1073  ;;  %v1072_v9 = vpop.permute.xlu0 %1071 }
 0x211   : > { %v1078_v35 = vadd.f32 %v1074_v4, %v2799_v42  ;;  %v1077_v46 = vadd.f32 %v1072_v9, %v2801_v43 }
 0x214   : > { %v1011_v10 = vpop.permute.xlu1 %1010  ;;  %v1009_v12 = vpop.permute.xlu0 %1008 }
 0x215   : > { %v1015_v31 = vadd.f32 %v1011_v10, %v1007_v25  ;;  %v1014_v32 = vadd.f32 %v1009_v12, %v1006_v30 }
 0x218   : > { %v948_v21 = vpop.permute.xlu1 %947  ;;  %v946_v22 = vpop.permute.xlu0 %945 }
 0x219   : > { %v952_v23 = vadd.f32 %v948_v21, %v944_v18  ;;  %v951_v15 = vadd.f32 %v946_v22, %v943_v19 }
 0x21b   : > { %v956_v11 = vadd.f32 %v954_v20, %v952_v23  ;;  %v955_v28 = vadd.f32 %v954_v20, %v951_v15 }
 0x21c   : > { %v1082_v29 = vpop.permute.xlu1 %1081  ;;  %v1080_v24 = vpop.permute.xlu0 %1079 }
 0x21d   : > { %vm958_vm0 = vcmp.gt.f32.partialorder %v956_v11, 0.0  ;;  %v960_v26 = vmul.f32 0.2, %v956_v11  ;;  %vm957_vm1 = vcmp.gt.f32.partialorder %v955_v28, 0.0  ;;  %v959_v27 = vmul.f32 0.2, %v955_v28 }
 0x21e   : > { %v1086_v50 = vadd.f32 %v1082_v29, %v1078_v35  ;;  %v1085_v53 = vadd.f32 %v1080_v24, %v1077_v46 }
 0x21f   : > { %v962_v33 = vsel %vm958_vm0, %v956_v11, %v960_v26  ;;  %v961_v39 = vsel %vm957_vm1, %v955_v28, %v959_v27  ;;  %vm2102_vm0 = vcmask 261120   ;;  %vm2105_vm1 = vcmask 392192  }
 0x220   : > { %v1019_v37 = vpop.permute.xlu1 %1018  ;;  %967 = vrot.lane.b32.xlu1 %v962_v33, %s2411_s17  ;;  %v1017_v38 = vpop.permute.xlu0 %1016  ;;  %965 = vrot.lane.b32.xlu0 %v961_v39, %s2411_s17 }
 0x221   : > { %v1023_v40 = vadd.f32 %v1019_v37, %v1015_v31  ;;  %v1022_v41 = vadd.f32 %v1017_v38, %v1014_v32 }
 0x223   : > { %v1027_v34 = vadd.f32 %v1025_v36, %v1023_v40  ;;  %v1026_v44 = vadd.f32 %v1025_v36, %v1022_v41 }
 0x224   : > { %973 = vrot.lane.b32.xlu1 %v962_v33, %s2410_s24  ;;  %971 = vrot.lane.b32.xlu0 %v961_v39, %s2410_s24  ;;  %v1090_v48 = vpop.permute.xlu1 %1089  ;;  %v1088_v47 = vpop.permute.xlu0 %1087 }
 0x225   : > { %v1031_v45 = vmul.f32 0.2, %v1027_v34  ;;  %vm1029_vm2 = vcmp.gt.f32.partialorder %v1027_v34, 0.0  ;;  %v1030_v49 = vmul.f32 0.2, %v1026_v44  ;;  %vm1028_vm3 = vcmp.gt.f32.partialorder %v1026_v44, 0.0 }
 0x226   : > { %v1094_v54 = vadd.f32 %v1090_v48, %v1086_v50  ;;  %v1093_v57 = vadd.f32 %v1088_v47, %v1085_v53  ;;  %v2259_v47 = vld [vmem:[%s3373_s2 + $0x5] ss:$0 sm:$0xff] }
 0x227   : > { %v1033_v55 = vsel %vm1029_vm2, %v1027_v34, %v1031_v45  ;;  %v1032_v42 = vsel %vm1028_vm3, %v1026_v44, %v1030_v49  ;;  %v2247_v49 = vld [vmem:[%s3373_s2 + $0x2] ss:$0 sm:$0xff]  ;;  %vm2108_vm2 = vcmask 523264  }
 0x228   : > { %979 = vrot.lane.b32.xlu1 %v962_v33, %s2416_s13  ;;  %977 = vrot.lane.b32.xlu0 %v961_v39, %s2416_s13  ;;  %v1098_v43 = vadd.f32 %v1096_v56, %v1094_v54  ;;  %v1097_v52 = vadd.f32 %v1096_v56, %v1093_v57  ;;  %v2255_v54 = vld [vmem:[%s3373_s2 + $0x4] ss:$0 sm:$0xff]  ;;  %v2243_v56 = vld [vmem:[%s3373_s2 + $0x1] ss:$0 sm:$0xff] }
 0x22a   : > { %v1102_v59 = vmul.f32 0.2, %v1098_v43  ;;  %vm1100_vm4 = vcmp.gt.f32.partialorder %v1098_v43, 0.0  ;;  %v1101_v62 = vmul.f32 0.2, %v1097_v52  ;;  %vm1099_vm5 = vcmp.gt.f32.partialorder %v1097_v52, 0.0 }
 0x22c   : > { %1038 = vrot.lane.b32.xlu1 %v1033_v55, %s2411_s17  ;;  %1036 = vrot.lane.b32.xlu0 %v1032_v42, %s2411_s17  ;;  %v1104_v3 = vsel %vm1100_vm4, %v1098_v43, %v1102_v59  ;;  %v1103_v7 = vsel %vm1099_vm5, %v1097_v52, %v1101_v62 }
 0x230   : > { %1044 = vrot.lane.b32.xlu1 %v1033_v55, %s2410_s24  ;;  %v867_v51 = vpop.permute.xlu1 %866  ;;  %v865_v58 = vpop.permute.xlu0 %864  ;;  %1042 = vrot.lane.b32.xlu0 %v1032_v42, %s2410_s24 }
 0x231   : > { %v871_v63 = vadd.f32 %v867_v51, %v2837_v2  ;;  %v870_v0 = vadd.f32 %v865_v58, %v2839_v14 }
 0x234   : > { %1050 = vrot.lane.b32.xlu1 %v1033_v55, %s2416_s13  ;;  %v875_v60 = vpop.permute.xlu1 %874  ;;  %v873_v61 = vpop.permute.xlu0 %872  ;;  %1048 = vrot.lane.b32.xlu0 %v1032_v42, %s2416_s13 }
 0x235   : > { %v879_v1 = vadd.f32 %v875_v60, %v871_v63  ;;  %v878_v13 = vadd.f32 %v873_v61, %v870_v0 }
 0x238   : > { %1109 = vrot.lane.b32.xlu1 %v1104_v3, %s2411_s17  ;;  %v883_v6 = vpop.permute.xlu1 %882  ;;  %v881_v8 = vpop.permute.xlu0 %880  ;;  %1107 = vrot.lane.b32.xlu0 %v1103_v7, %s2411_s17 }
 0x239   : > { %v887_v4 = vadd.f32 %v883_v6, %v879_v1  ;;  %v886_v9 = vadd.f32 %v881_v8, %v878_v13  ;;  %v2251_v13 = vld [vmem:[%s3373_s2 + $0x3] ss:$0 sm:$0xff] }
 0x23b   : > { %v891_v10 = vadd.f32 %v889_v5, %v887_v4  ;;  %v890_v2 = vadd.f32 %v889_v5, %v886_v9 }
 0x23c   : > { %1115 = vrot.lane.b32.xlu1 %v1104_v3, %s2410_s24  ;;  %1113 = vrot.lane.b32.xlu0 %v1103_v7, %s2410_s24 }
 0x23d   : > { %v895_v14 = vmul.f32 0.2, %v891_v10  ;;  %vm893_vm6 = vcmp.gt.f32.partialorder %v891_v10, 0.0  ;;  %v894_v12 = vmul.f32 0.2, %v890_v2  ;;  %vm892_vm7 = vcmp.gt.f32.partialorder %v890_v2, 0.0 }
 0x23f   : > { %v897_v16 = vsel %vm893_vm6, %v891_v10, %v895_v14  ;;  %v896_v17 = vsel %vm892_vm7, %v890_v2, %v894_v12  ;;  %v2271_v14 = vld [vmem:[%s3373_s2 + $0x8] ss:$0 sm:$0xff]  ;;  %v2267_v12 = vld [vmem:[%s3373_s2 + $0x7] ss:$0 sm:$0xff] }
 0x240   : > { %1121 = vrot.lane.b32.xlu1 %v1104_v3, %s2416_s13  ;;  %1119 = vrot.lane.b32.xlu0 %v1103_v7, %s2416_s13 }
 0x244   : > { %902 = vrot.lane.b32.xlu1 %v897_v16, %s2411_s17  ;;  %900 = vrot.lane.b32.xlu0 %v896_v17, %s2411_s17 }
 0x248   : > { %908 = vrot.lane.b32.xlu1 %v897_v16, %s2410_s24  ;;  %906 = vrot.lane.b32.xlu0 %v896_v17, %s2410_s24 }
 0x24c   : > { %914 = vrot.lane.b32.xlu1 %v897_v16, %s2416_s13  ;;  %912 = vrot.lane.b32.xlu0 %v896_v17, %s2416_s13  ;;  %v2248_v16 = vld [vmem:[%s3373_s2 + $0xb] ss:$0 sm:$0xff]  ;;  %v2260_v17 = vld [vmem:[%s3373_s2 + $0xe] ss:$0 sm:$0xff] }
 0x292   : > { %v968_v18 = vpop.permute.xlu1 %967  ;;  %v966_v19 = vpop.permute.xlu0 %965 }
 0x296   : > { %v974_v20 = vpop.permute.xlu1 %973  ;;  %v972_v21 = vpop.permute.xlu0 %971 }
 0x297   : > { %v984_v22 = vsel %vm918_vm8, %v968_v18, %v974_v20  ;;  %v983_v15 = vsel %vm918_vm8, %v966_v19, %v972_v21  ;;  %v2256_v19 = vld [vmem:[%s3373_s2 + $0xd] ss:$0 sm:$0xff]  ;;  %v2244_v20 = vld [vmem:[%s3373_s2 + $0xa] ss:$0 sm:$0xff]  ;;  %v2272_v21 = vld [vmem:[%s3373_s2 + $0x11] ss:$0 sm:$0xff] }
 0x29a   : > { %v980_v23 = vpop.permute.xlu1 %979  ;;  %v978_v28 = vpop.permute.xlu0 %977 }
 0x29b   : > { %v986_v11 = vsel %vm921_vm9, %v984_v22, %v980_v23  ;;  %v985_v29 = vsel %vm921_vm9, %v983_v15, %v978_v28  ;;  %v2268_v23 = vld [vmem:[%s3373_s2 + $0x10] ss:$0 sm:$0xff] }
 0x29c   : > { %991 = vrot.lane.b32.xlu1 %v986_v11, %s2417_s15  ;;  %989 = vrot.lane.b32.xlu0 %v985_v29, %s2417_s15  ;;  %v2261_v11 = vld [vmem:[%s3373_s2 + $0x17] ss:$0 sm:$0xff] }
 0x29e   : > { %v1039_v24 = vpop.permute.xlu1 %1038  ;;  %v1037_v25 = vpop.permute.xlu0 %1036 }
 0x2a2   : > { %v1045_v30 = vpop.permute.xlu1 %1044  ;;  %v1043_v26 = vpop.permute.xlu0 %1042 }
 0x2a3   : > { %v1055_v27 = vsel %vm918_vm8, %v1039_v24, %v1045_v30  ;;  %v1054_v32 = vsel %vm918_vm8, %v1037_v25, %v1043_v26  ;;  %v2252_v25 = vld [vmem:[%s3373_s2 + $0xc] ss:$0 sm:$0xff] }
 0x2a6   : > { %v1051_v31 = vpop.permute.xlu1 %1050  ;;  %v1049_v36 = vpop.permute.xlu0 %1048 }
 0x2a7   : > { %v1057_v33 = vsel %vm921_vm9, %v1055_v27, %v1051_v31  ;;  %v1056_v37 = vsel %vm921_vm9, %v1054_v32, %v1049_v36 }
 0x2a8   : > { %1062 = vrot.lane.b32.xlu1 %v1057_v33, %s2418_s16  ;;  %1060 = vrot.lane.b32.xlu0 %v1056_v37, %s2418_s16  ;;  %s2420_s16 = smov 0.0  }
 0x2aa   : > { %v1110_v38 = vpop.permute.xlu1 %1109  ;;  %v1108_v39 = vpop.permute.xlu0 %1107 }
 0x2ae   : > { %v1116_v40 = vpop.permute.xlu1 %1115  ;;  %v1114_v41 = vpop.permute.xlu0 %1113 }
 0x2af   : > { %v1126_v34 = vsel %vm918_vm8, %v1110_v38, %v1116_v40  ;;  %v1125_v35 = vsel %vm918_vm8, %v1108_v39, %v1114_v41 }
 0x2b2   : > { %v1122_v44 = vpop.permute.xlu1 %1121  ;;  %v1120_v46 = vpop.permute.xlu0 %1119 }
 0x2b3   : > { %v1128_v45 = vsel %vm921_vm9, %v1126_v34, %v1122_v44  ;;  %v1127_v48 = vsel %vm921_vm9, %v1125_v35, %v1120_v46 }
 0x2b4   : > { %1133 = vrot.lane.b32.xlu1 %v1128_v45, %s2419_s20  ;;  %1131 = vrot.lane.b32.xlu0 %v1127_v48, %s2419_s20 }
 0x2b6   : > { %v903_v50 = vpop.permute.xlu1 %902  ;;  %v901_v53 = vpop.permute.xlu0 %900 }
 0x2b8   : > { %1225 = vrot.lane.b32.xlu1 %v2247_v49, %s2409_s9  ;;  %1463 = vrot.lane.b32.xlu0 %v2259_v47, %s2409_s9 }
 0x2ba   : > { %v909_v55 = vpop.permute.xlu1 %908  ;;  %v907_v57 = vpop.permute.xlu0 %906 }
 0x2bb   : > { %v920_v42 = vsel %vm918_vm8, %v903_v50, %v909_v55  ;;  %v919_v52 = vsel %vm918_vm8, %v901_v53, %v907_v57 }
 0x2bc   : > { %1379 = vrot.lane.b32.xlu1 %v2255_v54, %s2410_s24  ;;  %1181 = vrot.lane.b32.xlu0 %v2243_v56, %s2410_s24 }
 0x2be   : > { %v915_v43 = vpop.permute.xlu1 %914  ;;  %v913_v58 = vpop.permute.xlu0 %912 }
 0x2bf   : > { %v923_v51 = vsel %vm921_vm9, %v920_v42, %v915_v43  ;;  %v922_v59 = vsel %vm921_vm9, %v919_v52, %v913_v58 }
 0x2c0   : > { %926 = vst.msk [vmem:[#allocation2 + $0x9] sm:$0xff] %vm924_vm10, %v923_v51  ;;  %925 = vst.msk [vmem:[#allocation2 + $0x1] sm:$0xff] %vm924_vm10, %v922_v59 }
 0x30e   : > { %v992_v60 = vpop.permute.xlu1 %991  ;;  %v990_v61 = vpop.permute.xlu0 %989 }
 0x30f   : > { %997 = vst.msk [vmem:[#allocation2 + $0x9] sm:$0xff] %vm995_vm11, %v992_v60  ;;  %996 = vst.msk [vmem:[#allocation2 + $0x1] sm:$0xff] %vm995_vm11, %v990_v61 }
 0x31a   : > { %v1063_v62 = vpop.permute.xlu1 %1062  ;;  %v1061_v63 = vpop.permute.xlu0 %1060 }
 0x31b   : > { %1068 = vst.msk [vmem:[#allocation2 + $0x9] sm:$0xff] %vm1066_vm12, %v1063_v62  ;;  %1067 = vst.msk [vmem:[#allocation2 + $0x1] sm:$0xff] %vm1066_vm12, %v1061_v63 }
 0x326   : > { %v1134_v0 = vpop.permute.xlu1 %1133  ;;  %v1132_v1 = vpop.permute.xlu0 %1131 }
 0x327   : > { %1139 = vst.msk [vmem:[#allocation2 + $0x9] sm:$0xff] %vm1137_vm13, %v1134_v0  ;;  %1138 = vst.msk [vmem:[#allocation2 + $0x1] sm:$0xff] %vm1137_vm13, %v1132_v1 }
 0x32a   : > { %v1464_v9 = vpop.permute.xlu0 %1463  ;;  %v1226_v18 = vpop.permute.xlu1 %1225 }
 0x32e   : > { %v1143_v3 = vld [vmem:[#allocation2 + $0xf] sm:$0x1]  ;;  %v1140_v6 = vld [vmem:[#allocation2 + $0x2] sm:$0x1]  ;;  %v1380_v22 = vpop.permute.xlu1 %1379  ;;  %v1182_v26 = vpop.permute.xlu0 %1181 }
 0x32f   : > { %v2920_v5 = vld [vmem:[#allocation2 + $0x9] sm:$0xff]  ;;  %1144 = vst.msk [vmem:[#allocation2 + $0x11] sm:$0x1] %vm1141_vm14, %v1143_v3  ;;  %v2922_v7 = vld [vmem:[#allocation2 + $0x1] sm:$0xff]  ;;  %1142 = vst.msk [vmem:[#allocation2] sm:$0x1] %vm1141_vm14, %v1140_v6 }
 0x330   : > { %v1311_v8 = vmul.f32 %v2251_v13, %v2920_v5  ;;  %v1310_v4 = vmul.f32 %v2251_v13, %v2922_v7  ;;  %v1467_v10 = vmul.f32 %v1464_v9, %v2920_v5  ;;  %v1466_v2 = vmul.f32 %v1464_v9, %v2922_v7  ;;  %v2969_v28 = vld [vmem:[#allocation2 + $0x8] sm:$0xff]  ;;  %v2245_v3 = vld [vmem:[%s3373_s2 + $0x13] ss:$0 sm:$0xff]  ;;  %v2249_v6 = vld [vmem:[%s3373_s2 + $0x14] ss:$0 sm:$0xff] }
 0x331   : > { %v1382_v15 = vmul.f32 %v1380_v22, %v2922_v7  ;;  %v1229_v29 = vmul.f32 %v1226_v18, %v2969_v28  ;;  %v1383_v24 = vmul.f32 %v1380_v22, %v2920_v5  ;;  %v1327_v30 = vmul.f32 %v2252_v25, %v2922_v7  ;;  %v2981_v36 = vld [vmem:[#allocation2 + $0x2] sm:$0xff] }
 0x332   : > { %1316 = vrot.lane.b32.xlu1 %v1311_v8, %s2410_s24  ;;  %1314 = vrot.lane.b32.xlu0 %v1310_v4, %s2410_s24  ;;  %v1328_v40 = vmul.f32 %v2252_v25, %v2920_v5  ;;  %v1185_v49 = vmul.f32 %v1182_v26, %v2969_v28  ;;  %v2253_v8 = vld [vmem:[%s3373_s2 + $0x15] ss:$0 sm:$0xff] }
 0x333   : > { %v1344_v4 = vmul.f32 %v2253_v8, %v2922_v7 }
 0x336   : > { %1472 = vrot.lane.b32.xlu1 %v1467_v10, %s2411_s17  ;;  %1470 = vrot.lane.b32.xlu0 %v1466_v2, %s2411_s17  ;;  %v2990_v45 = vld [vmem:[#allocation2] sm:$0xff]  ;;  %v2997_v50 = vld [vmem:[#allocation2 + $0xa] sm:$0xff]  ;;  %v2257_v10 = vld [vmem:[%s3373_s2 + $0x16] ss:$0 sm:$0xff] }
 0x337   : > { %v1228_v48 = vmul.f32 %v1226_v18, %v2990_v45  ;;  %v1184_v47 = vmul.f32 %v1182_v26, %v2990_v45  ;;  %v2273_v18 = vld [vmem:[%s3373_s2 + $0x1a] ss:$0 sm:$0xff]  ;;  %v2240_v26 = vld [vmem:[%s3373_s2 + $0x9] ss:$0 sm:$0xff] }
 0x33a   : > { %1637 = vrot.lane.b32.xlu1 %v2271_v14, %s2409_s9  ;;  %1585 = vrot.lane.b32.xlu0 %v2267_v12, %s2410_s24  ;;  %v1345_v14 = vmul.f32 %v2253_v8, %v2920_v5  ;;  %v2269_v12 = vld [vmem:[%s3373_s2 + $0x19] ss:$0 sm:$0xff] }
 0x33e   : > { %1246 = vrot.lane.b32.xlu1 %v2248_v16, %s2409_s9  ;;  %1484 = vrot.lane.b32.xlu0 %v2260_v17, %s2409_s9  ;;  %v2262_v17 = vld [vmem:[%s3373_s2 + $0x20] ss:$0 sm:$0xff] }
 0x342   : > { %1400 = vrot.lane.b32.xlu1 %v2256_v19, %s2410_s24  ;;  %1192 = vrot.lane.b32.xlu0 %v2244_v20, %s2410_s24 }
 0x346   : > { %1658 = vrot.lane.b32.xlu1 %v2272_v21, %s2409_s9  ;;  %1598 = vrot.lane.b32.xlu0 %v2268_v23, %s2410_s24 }
 0x34a   : > { %1386 = vrot.lane.b32.xlu1 %v1382_v15, %s2411_s17  ;;  %1505 = vrot.lane.b32.xlu0 %v2261_v11, %s2409_s9 }
 0x34e   : > { %1234 = vrot.lane.b32.xlu0 %v1229_v29, %s2412_s6 }
 0x352   : > { %1388 = vrot.lane.b32.xlu0 %v1383_v24, %s2411_s17 }
 0x356   : > { %1331 = vrot.lane.b32.xlu0 %v1327_v30, %s2410_s24 }
 0x3a4   : > { %v1317_v27 = vpop.permute.xlu1 %1316  ;;  %v1315_v31 = vpop.permute.xlu0 %1314 }
 0x3a5   : > { %v1321_v53 = vadd.f32 %v1317_v27, %v1185_v49  ;;  %v1320_v56 = vadd.f32 %v1315_v31, %v1184_v47 }
 0x3a8   : > { %v1473_v32 = vpop.permute.xlu1 %1472  ;;  %v1471_v33 = vpop.permute.xlu0 %1470 }
 0x3a9   : > { %v1477_v57 = vadd.f32 %v1473_v32, %v1321_v53  ;;  %v1476_v51 = vadd.f32 %v1471_v33, %v1320_v56  ;;  %v1160_v32 = vmul.f32 %v2240_v26, %v2969_v28 }
 0x3ac   : > { %v1638_v37 = vpop.permute.xlu1 %1637  ;;  %v1586_v39 = vpop.permute.xlu0 %1585 }
 0x3ad   : > { %v1640_v38 = vmul.f32 %v1638_v37, %v2981_v36  ;;  %v1641_v54 = vmul.f32 %v1638_v37, %v2997_v50  ;;  %v1589_v55 = vmul.f32 %v1586_v39, %v2997_v50  ;;  %v1588_v42 = vmul.f32 %v1586_v39, %v2981_v36 }
 0x3af   : > { %1644 = vrot.lane.b32.xlu1 %v1640_v38, %s2412_s6  ;;  %v1591_v58 = vadd.f32 %v1589_v55, %v1477_v57  ;;  %v1590_v59 = vadd.f32 %v1588_v42, %v1476_v51  ;;  %v1159_v38 = vmul.f32 %v2240_v26, %v2990_v45 }
 0x3b0   : > { %v1485_v41 = vpop.permute.xlu0 %1484  ;;  %v1247_v44 = vpop.permute.xlu1 %1246 }
 0x3b1   : > { %v1487_v34 = vmul.f32 %v1485_v41, %v2922_v7  ;;  %v1488_v35 = vmul.f32 %v1485_v41, %v2920_v5  ;;  %v1250_v46 = vmul.f32 %v1247_v44, %v2969_v28  ;;  %v1249_v43 = vmul.f32 %v1247_v44, %v2990_v45 }
 0x3b3   : > { %1333 = vrot.lane.b32.xlu1 %v1328_v40, %s2410_s24  ;;  %1491 = vrot.lane.b32.xlu0 %v1487_v34, %s2411_s17  ;;  %v2264_v40 = vld [vmem:[%s3373_s2 + $0xf] ss:$0 sm:$0xff] }
 0x3b4   : > { %v1401_v52 = vpop.permute.xlu1 %1400  ;;  %v3010_v61 = vpop.permute.xlu0 %1192  ;;  %v1558_v44 = vmul.f32 %v2264_v40, %v2997_v50  ;;  %v1557_v49 = vmul.f32 %v2264_v40, %v2981_v36 }
 0x3b5   : > { %v1404_v60 = vmul.f32 %v1401_v52, %v2920_v5  ;;  %v1403_v63 = vmul.f32 %v1401_v52, %v2922_v7 }
 0x3b7   : > { %1493 = vrot.lane.b32.xlu1 %v1488_v35, %s2411_s17  ;;  %1255 = vrot.lane.b32.xlu0 %v1250_v46, %s2412_s6 }
 0x3b8   : > { %v1659_v62 = vpop.permute.xlu1 %1658  ;;  %v3018_v13 = vpop.permute.xlu0 %1598 }
 0x3b9   : > { %v1662_v0 = vmul.f32 %v1659_v62, %v2997_v50  ;;  %v1661_v1 = vmul.f32 %v1659_v62, %v2981_v36 }
 0x3bb   : > { %1232 = vrot.lane.b32.xlu1 %v1228_v48, %s2412_s6  ;;  %1646 = vrot.lane.b32.xlu0 %v1641_v54, %s2412_s6 }
 0x3bc   : > { %v1506_v9 = vpop.permute.xlu0 %1505  ;;  %v3058_v20 = vpop.permute.xlu1 %1386 }
 0x3bd   : > { %v1508_v2 = vmul.f32 %v1506_v9, %v2922_v7  ;;  %v1509_v16 = vmul.f32 %v1506_v9, %v2920_v5 }
 0x3bf   : > { %1253 = vrot.lane.b32.xlu1 %v1249_v43, %s2412_s6  ;;  %1719 = vrot.lane.b32.xlu0 %v1591_v58, %s2411_s17 }
 0x3c0   : > { %v3056_v19 = vpop.permute.xlu0 %1234 }
 0x3c3   : > { %1717 = vrot.lane.b32.xlu1 %v1590_v59, %s2411_s17  ;;  %1409 = vrot.lane.b32.xlu0 %v1404_v60, %s2411_s17 }
 0x3c4   : > { %v3060_v21 = vpop.permute.xlu0 %1388 }
 0x3c7   : > { %1407 = vrot.lane.b32.xlu1 %v1403_v63, %s2411_s17  ;;  %1667 = vrot.lane.b32.xlu0 %v1662_v0, %s2412_s6  ;;  %v2239_v0 = vld [vmem:[%s3373_s2] ss:$0 sm:$0xff] }
 0x3c8   : > { %v1332_v23 = vpop.permute.xlu0 %1331 }
 0x3cb   : > { %1665 = vrot.lane.b32.xlu1 %v1661_v1, %s2412_s6  ;;  %1203 = vrot.lane.b32.xlu0 %v2245_v3, %s2410_s24  ;;  %v1152_v1 = vmul.f32 %v2239_v0, %v2990_v45  ;;  %v1195_v3 = vmul.f32 %v3010_v61, %v2990_v45 }
 0x3cf   : > { %1267 = vrot.lane.b32.xlu1 %v2249_v6, %s2409_s9  ;;  %1348 = vrot.lane.b32.xlu0 %v1344_v4, %s2410_s24  ;;  %v1196_v6 = vmul.f32 %v3010_v61, %v2969_v28  ;;  %v2263_v61 = vld [vmem:[%s3373_s2 + $0x6] ss:$0 sm:$0xff] }
 0x3d3   : > { %1421 = vrot.lane.b32.xlu1 %v2257_v10, %s2410_s24  ;;  %1512 = vrot.lane.b32.xlu0 %v1508_v2, %s2411_s17 }
 0x3d7   : > { %1350 = vrot.lane.b32.xlu1 %v1345_v14, %s2410_s24  ;;  %1611 = vrot.lane.b32.xlu0 %v2269_v12, %s2410_s24  ;;  %v1337_v14 = vadd.f32 %v1332_v23, %v1195_v3  ;;  %v2246_v23 = vld [vmem:[%s3373_s2 + $0x1c] ss:$0 sm:$0xff] }
 0x3db   : > { %1514 = vrot.lane.b32.xlu1 %v1509_v16, %s2411_s17  ;;  %1526 = vrot.lane.b32.xlu0 %v2262_v17, %s2409_s9  ;;  %v1153_v16 = vmul.f32 %v2239_v0, %v2969_v28  ;;  %v2265_v0 = vld [vmem:[%s3373_s2 + $0x18] ss:$0 sm:$0xff] }
 0x3dd   : > { %v1239_v26 = vadd.f32 %v3056_v19, %v1153_v16  ;;  %v1549_v19 = vmul.f32 %v2263_v61, %v2997_v50 }
 0x3df   : > { %1679 = vrot.lane.b32.xlu1 %v2273_v18, %s2409_s9 }
 0x421   : > { %v3062_v22 = vpop.permute.xlu1 %1644 }
 0x425   : > { %v1334_v15 = vpop.permute.xlu1 %1333  ;;  %v1492_v11 = vpop.permute.xlu0 %1491 }
 0x426   : > { %v1338_v12 = vadd.f32 %v1334_v15, %v1196_v6  ;;  %v1497_v17 = vadd.f32 %v1492_v11, %v1337_v14  ;;  %v1601_v11 = vmul.f32 %v3018_v13, %v2981_v36 }
 0x429   : > { %v1494_v29 = vpop.permute.xlu1 %1493  ;;  %v1256_v24 = vpop.permute.xlu0 %1255 }
 0x42a   : > { %v1260_v37 = vadd.f32 %v1256_v24, %v1160_v32  ;;  %v1498_v18 = vadd.f32 %v1494_v29, %v1338_v12  ;;  %v2250_v24 = vld [vmem:[%s3373_s2 + $0x1d] ss:$0 sm:$0xff]  ;;  %v1602_v29 = vmul.f32 %v3018_v13, %v2997_v50  ;;  %v1548_v32 = vmul.f32 %v2263_v61, %v2981_v36 }
 0x42c   : > { %v1604_v40 = vadd.f32 %v1602_v29, %v1498_v18 }
 0x42d   : > { %v1233_v25 = vpop.permute.xlu1 %1232  ;;  %v3064_v30 = vpop.permute.xlu0 %1646 }
 0x42e   : > { %v1238_v9 = vadd.f32 %v1233_v25, %v1152_v1 }
 0x430   : > { %v1392_v15 = vadd.f32 %v3058_v20, %v1238_v9  ;;  %v1393_v20 = vadd.f32 %v3060_v21, %v1239_v26  ;;  %v1566_v9 = vmul.f32 %v2265_v0, %v2981_v36 }
 0x431   : > { %v1254_v27 = vpop.permute.xlu1 %1253  ;;  %v3069_v31 = vpop.permute.xlu0 %1719 }
 0x432   : > { %v1259_v41 = vadd.f32 %v1254_v27, %v1159_v38 }
 0x435   : > { %v3072_v33 = vpop.permute.xlu1 %1717  ;;  %v1410_v39 = vpop.permute.xlu0 %1409 }
 0x436   : > { %v1414_v34 = vadd.f32 %v1410_v39, %v1260_v37  ;;  %v1603_v39 = vadd.f32 %v1601_v11, %v1497_v17 }
 0x438   : > { %v1560_v48 = vadd.f32 %v1558_v44, %v1414_v34 }
 0x439   : > { %v1408_v35 = vpop.permute.xlu1 %1407  ;;  %v1668_v47 = vpop.permute.xlu0 %1667 }
 0x43a   : > { %v1413_v46 = vadd.f32 %v1408_v35, %v1259_v41  ;;  %v3080_v53 = vadd.f32 %v1668_v47, %v1560_v48  ;;  %v1550_v41 = vadd.f32 %v1548_v32, %v1392_v15  ;;  %v1551_v48 = vadd.f32 %v1549_v19, %v1393_v20 }
 0x43c   : > { %v1559_v54 = vadd.f32 %v1557_v49, %v1413_v46  ;;  %v1650_v49 = vadd.f32 %v3062_v22, %v1550_v41  ;;  %v2254_v22 = vld [vmem:[%s3373_s2 + $0x1e] ss:$0 sm:$0xff] }
 0x43d   : > { %v1666_v55 = vpop.permute.xlu1 %1665  ;;  %v1204_v52 = vpop.permute.xlu0 %1203 }
 0x43e   : > { %v3082_v56 = vadd.f32 %v1666_v55, %v1559_v54  ;;  %v1207_v25 = vmul.f32 %v1204_v52, %v2969_v28  ;;  %v1206_v37 = vmul.f32 %v1204_v52, %v2990_v45  ;;  %v1651_v54 = vadd.f32 %v3064_v30, %v1551_v48  ;;  %v2258_v30 = vld [vmem:[%s3373_s2 + $0x1f] ss:$0 sm:$0xff] }
 0x440   : > { %v3136_v55 = vadd.f32 %v3069_v31, %v1651_v54  ;;  %v1361_v31 = vmul.f32 %v2254_v22, %v2922_v7  ;;  %v1782_v54 = vstv %s1781_s29 }
 0x441   : > { %v1268_v57 = vpop.permute.xlu1 %1267  ;;  %v1349_v62 = vpop.permute.xlu0 %1348 }
 0x442   : > { %v1270_v42 = vmul.f32 %v1268_v57, %v2990_v45  ;;  %v1271_v43 = vmul.f32 %v1268_v57, %v2969_v28  ;;  %v1354_v34 = vadd.f32 %v1349_v62, %v1206_v37  ;;  %v3139_v57 = vadd.f32 %v3072_v33, %v1650_v49 }
 0x444   : > { %1274 = vrot.lane.b32.xlu1 %v1270_v42, %s2412_s6  ;;  %1276 = vrot.lane.b32.xlu0 %v1271_v43, %s2412_s6  ;;  %v1362_v43 = vmul.f32 %v2254_v22, %v2920_v5 }
 0x445   : > { %v1422_v51 = vpop.permute.xlu1 %1421  ;;  %v1513_v8 = vpop.permute.xlu0 %1512 }
 0x446   : > { %v1424_v58 = vmul.f32 %v1422_v51, %v2922_v7  ;;  %v1425_v59 = vmul.f32 %v1422_v51, %v2920_v5  ;;  %v1518_v35 = vadd.f32 %v1513_v8, %v1354_v34  ;;  %v2241_v51 = vld [vmem:[%s3373_s2 + $0x12] ss:$0 sm:$0xff] }
 0x448   : > { %1428 = vrot.lane.b32.xlu1 %v1424_v58, %s2411_s17  ;;  %1430 = vrot.lane.b32.xlu0 %v1425_v59, %s2411_s17  ;;  %v1166_v58 = vmul.f32 %v2241_v51, %v2990_v45 }
 0x449   : > { %v1351_v60 = vpop.permute.xlu1 %1350  ;;  %v1612_v27 = vpop.permute.xlu0 %1611 }
 0x44a   : > { %v1355_v38 = vadd.f32 %v1351_v60, %v1207_v25  ;;  %v1614_v13 = vmul.f32 %v1612_v27, %v2981_v36  ;;  %v1615_v46 = vmul.f32 %v1612_v27, %v2997_v50 }
 0x44c   : > { %v1616_v21 = vadd.f32 %v1614_v13, %v1518_v35 }
 0x44d   : > { %v1515_v63 = vpop.permute.xlu1 %1514  ;;  %v1527_v33 = vpop.permute.xlu0 %1526 }
 0x44e   : > { %v1519_v44 = vadd.f32 %v1515_v63, %v1355_v38  ;;  %v1529_v42 = vmul.f32 %v1527_v33, %v2922_v7  ;;  %v1530_v52 = vmul.f32 %v1527_v33, %v2920_v5  ;;  %v1167_v63 = vmul.f32 %v2241_v51, %v2969_v28 }
 0x450   : > { %v1617_v47 = vadd.f32 %v1615_v46, %v1519_v44 }
 0x451   : > { %v1680_v4 = vpop.permute.xlu1 %1679 }
 0x452   : > { %v1682_v10 = vmul.f32 %v1680_v4, %v2981_v36  ;;  %v1683_v2 = vmul.f32 %v1680_v4, %v2997_v50 }
 0x454   : > { %1686 = vrot.lane.b32.xlu1 %v1682_v10, %s2412_s6  ;;  %1688 = vrot.lane.b32.xlu0 %v1683_v2, %s2412_s6  ;;  %v1567_v2 = vmul.f32 %v2265_v0, %v2997_v50 }
 0x458   : > { %1288 = vrot.lane.b32.xlu1 %v2250_v24, %s2409_s9  ;;  %1214 = vrot.lane.b32.xlu0 %v2246_v23, %s2410_s24 }
 0x45c   : > { %1729 = vrot.lane.b32.xlu0 %v1604_v40, %s2411_s17  ;;  %1727 = vrot.lane.b32.xlu1 %v1603_v39, %s2411_s17 }
 0x460   : > { %1739 = vrot.lane.b32.xlu0 %v1617_v47, %s2411_s17  ;;  %1737 = vrot.lane.b32.xlu1 %v1616_v21, %s2411_s17 }
 0x464   : > { %1759 = vrot.lane.b32.xlu0 %v3136_v55, %s2413_s25  ;;  %1757 = vrot.lane.b32.xlu1 %v3139_v57, %s2413_s25 }
 0x468   : > { %1767 = vrot.lane.b32.xlu0 %v3136_v55, %s2414_s26  ;;  %1765 = vrot.lane.b32.xlu1 %v3139_v57, %s2414_s26 }
 0x46c   : > { %1775 = vrot.lane.b32.xlu0 %v3136_v55, %s2415_s27  ;;  %1773 = vrot.lane.b32.xlu1 %v3139_v57, %s2415_s27 }
 0x470   : > { %1365 = vrot.lane.b32.xlu0 %v1361_v31, %s2410_s24  ;;  %1442 = vrot.lane.b32.xlu1 %v2258_v30, %s2410_s24 }
 0x474   : > { %1367 = vrot.lane.b32.xlu1 %v1362_v43, %s2410_s24  ;;  %1533 = vrot.lane.b32.xlu0 %v1529_v42, %s2411_s17 }
 0x478   : > { %1535 = vrot.lane.b32.xlu1 %v1530_v52, %s2411_s17 }
 0x4b6   : > { %v1275_v59 = vpop.permute.xlu1 %1274  ;;  %v1277_v60 = vpop.permute.xlu0 %1276 }
 0x4b7   : > { %v1280_v62 = vadd.f32 %v1275_v59, %v1166_v58  ;;  %v1281_v1 = vadd.f32 %v1277_v60, %v1167_v63  ;;  %v2274_v58 = vld [vmem:[%s3373_s2 + $0x23] ss:$0 sm:$0xff]  ;;  %v2270_v59 = vld [vmem:[%s3373_s2 + $0x22] ss:$0 sm:$0xff] }
 0x4ba   : > { %v1429_v3 = vpop.permute.xlu1 %1428  ;;  %v1431_v6 = vpop.permute.xlu0 %1430 }
 0x4bb   : > { %v1434_v8 = vadd.f32 %v1429_v3, %v1280_v62  ;;  %v1435_v4 = vadd.f32 %v1431_v6, %v1281_v1 }
 0x4bd   : > { %v1568_v10 = vadd.f32 %v1566_v9, %v1434_v8  ;;  %v1569_v14 = vadd.f32 %v1567_v2, %v1435_v4 }
 0x4c6   : > { %v1687_v12 = vpop.permute.xlu1 %1686  ;;  %v1689_v16 = vpop.permute.xlu0 %1688 }
 0x4c7   : > { %v1692_v17 = vadd.f32 %v1687_v12, %v1568_v10  ;;  %v1693_v18 = vadd.f32 %v1689_v16, %v1569_v14 }
 0x4ca   : > { %v3178_v61 = vpop.permute.xlu1 %1288  ;;  %v1215_v24 = vpop.permute.xlu0 %1214 }
 0x4cb   : > { %v1217_v39 = vmul.f32 %v1215_v24, %v2990_v45  ;;  %v1218_v19 = vmul.f32 %v1215_v24, %v2969_v28  ;;  %v1292_v62 = vmul.f32 %v3178_v61, %v2969_v28 }
 0x4ce   : > { %v1728_v23 = vpop.permute.xlu1 %1727  ;;  %v1730_v15 = vpop.permute.xlu0 %1729 }
 0x4cf   : > { %v3181_v25 = vadd.f32 %v1728_v23, %v3082_v56  ;;  %v3184_v11 = vadd.f32 %v1730_v15, %v3080_v53 }
 0x4d1   : > { %1841 = vrot.lane.b32.xlu0 %v3181_v25, %s2413_s25  ;;  %1843 = vrot.lane.b32.xlu1 %v3184_v11, %s2413_s25 }
 0x4d2   : > { %v1738_v29 = vpop.permute.xlu1 %1737  ;;  %v1740_v26 = vpop.permute.xlu0 %1739 }
 0x4d3   : > { %v3190_v27 = vadd.f32 %v1738_v29, %v1692_v17  ;;  %v3232_v60 = vadd.f32 %v1740_v26, %v1693_v18 }
 0x4d5   : > { %1851 = vrot.lane.b32.xlu0 %v3184_v11, %s2414_s26  ;;  %1849 = vrot.lane.b32.xlu1 %v3181_v25, %s2414_s26 }
 0x4d6   : > { %v1758_v56 = vpop.permute.xlu1 %1757  ;;  %v1760_v32 = vpop.permute.xlu0 %1759 }
 0x4d7   : > { %v1763_v34 = vadd.f32 %v1758_v56, %v3139_v57  ;;  %v1764_v13 = vadd.f32 %v1760_v32, %v3136_v55 }
 0x4d9   : > { %1859 = vrot.lane.b32.xlu0 %v3184_v11, %s2415_s27  ;;  %1857 = vrot.lane.b32.xlu1 %v3181_v25, %s2415_s27 }
 0x4da   : > { %v1766_v53 = vpop.permute.xlu1 %1765  ;;  %v1768_v37 = vpop.permute.xlu0 %1767 }
 0x4db   : > { %v1771_v35 = vadd.f32 %v1766_v53, %v1763_v34  ;;  %v1772_v46 = vadd.f32 %v1768_v37, %v1764_v13 }
 0x4de   : > { %v1774_v38 = vpop.permute.xlu1 %1773  ;;  %v1776_v20 = vpop.permute.xlu0 %1775 }
 0x4df   : > { %v1779_v49 = vadd.f32 %v1774_v38, %v1771_v35  ;;  %v1780_v21 = vadd.f32 %v1776_v20, %v1772_v46 }
 0x4e1   : > { %v3210_v22 = vadd.f32 %v1782_v54, %v1779_v49  ;;  %v3212_v30 = vadd.f32 %v1782_v54, %v1780_v21 }
 0x4e2   : > { %v3201_v40 = vpop.permute.xlu1 %1442  ;;  %v1366_v41 = vpop.permute.xlu0 %1365 }
 0x4e3   : > { %v3205_v44 = vadd.f32 %v1366_v41, %v1217_v39  ;;  %v1798_v57 = vmul.f32 %v3210_v22, %v3210_v22  ;;  %v1799_v55 = vmul.f32 %v3212_v30, %v3212_v30  ;;  %v1786_v43 = vsel %vm1785_vm15, %v3210_v22, 0.0 }
 0x4e4   : > { %v1787_v52 = vsel %vm1785_vm15, %v3212_v30, 0.0  ;;  %v1446_v63 = vmul.f32 %v3201_v40, %v2920_v5  ;;  %v1445_v26 = vmul.f32 %v3201_v40, %v2922_v7 }
 0x4e5   : > { %v1800_v31 = vsel %vm1785_vm15, %v1798_v57, 0.0  ;;  %v1801_v33 = vsel %vm1785_vm15, %v1799_v55, 0.0  ;;  %v1788_v51 = vadd.f32 %v1787_v52, %v1786_v43 }
 0x4e6   : > { %v1368_v48 = vpop.permute.xlu1 %1367  ;;  %v1802_v42 = vadd.f32 %v1801_v33, %v1800_v31  ;;  %v1534_v0 = vpop.permute.xlu0 %1533 }
 0x4e7   : > { %v3208_v47 = vadd.f32 %v1368_v48, %v1218_v19  ;;  %v1539_v40 = vadd.f32 %v1534_v0, %v3205_v44 }
 0x4ea   : > { %v1536_v1 = vpop.permute.xlu1 %1535 }
 0x4eb   : > { %v1540_v48 = vadd.f32 %v1536_v1, %v3208_v47 }
 0x4f8   : > { %1803 = vadd.xlane.f32.xlu0 %v1802_v42 }
 0x4fd   : > { %1789 = vadd.xlane.f32.xlu1 %v1788_v51 }
 0x50e   : > { %1700 = vrot.lane.b32.xlu1 %v2274_v58, %s2409_s9  ;;  %1624 = vrot.lane.b32.xlu0 %v2270_v59, %s2410_s24  ;;  %s2275_s9 = sld [smem:[#allocation5 + $0x1]] }
 0x512   : > { %1922 = vrot.lane.b32.xlu1 %v3232_v60, %s2413_s25 }
 0x514   : > { %v1866_v12 = vstv %s2275_s9 }
 0x516   : > { %1930 = vrot.lane.b32.xlu1 %v3232_v60, %s2414_s26 }
 0x51a   : > { %1297 = vrot.lane.b32.xlu1 %v1292_v62, %s2412_s6 }
 0x51e   : > { %1938 = vrot.lane.b32.xlu1 %v3232_v60, %s2415_s27 }
 0x522   : > { %1451 = vrot.lane.b32.xlu1 %v1446_v63, %s2411_s17 }
 0x543   : > { %v1844_v3 = vpop.permute.xlu1 %1843  ;;  %v1842_v6 = vpop.permute.xlu0 %1841 }
 0x544   : > { %v1848_v9 = vadd.f32 %v1844_v3, %v3184_v11  ;;  %v1847_v10 = vadd.f32 %v1842_v6, %v3181_v25  ;;  %v1291_v25 = vmul.f32 %v3178_v61, %v2990_v45 }
 0x547   : > { %v1850_v8 = vpop.permute.xlu1 %1849  ;;  %v1852_v4 = vpop.permute.xlu0 %1851 }
 0x548   : > { %v1855_v2 = vadd.f32 %v1850_v8, %v1847_v10  ;;  %v1856_v14 = vadd.f32 %v1852_v4, %v1848_v9 }
 0x54b   : > { %v1858_v16 = vpop.permute.xlu1 %1857  ;;  %v1860_v17 = vpop.permute.xlu0 %1859 }
 0x54c   : > { %v1863_v18 = vadd.f32 %v1858_v16, %v1855_v2  ;;  %v1864_v5 = vadd.f32 %v1860_v17, %v1856_v14 }
 0x54e   : > { %v3248_v24 = vadd.f32 %v1866_v12, %v1863_v18  ;;  %v3250_v23 = vadd.f32 %v1866_v12, %v1864_v5  ;;  %v1945_v12 = vstv %s2276_s22 }
 0x550   : > { %v1869_v15 = vsel %vm1785_vm15, %v3248_v24, 0.0  ;;  %v1870_v29 = vsel %vm1785_vm15, %v3250_v23, 0.0 }
 0x551   : > { %v1871_v11 = vadd.f32 %v1870_v29, %v1869_v15 }
 0x553   : > { %1872 = vadd.xlane.f32.xlu0 %v1871_v11 }
 0x569   : > { %1920 = vrot.lane.b32.xlu0 %v3190_v27, %s2413_s25 }
 0x56d   : > { %1928 = vrot.lane.b32.xlu0 %v3190_v27, %s2414_s26 }
 0x571   : > { %1295 = vrot.lane.b32.xlu0 %v1291_v25, %s2412_s6 }
 0x575   : > { %1936 = vrot.lane.b32.xlu0 %v3190_v27, %s2415_s27 }
 0x579   : > { %1449 = vrot.lane.b32.xlu0 %v1445_v26, %s2411_s17 }
 0x585   : > { %v1804_v56 = vpop.xlane.xlu0 %1803 }
 0x586   : > { %v1805_v32 = vrot.slane %v1804_v56, 4 }
 0x588   : > { %v1806_v53 = vadd.f32 %v1805_v32, %v1804_v56 }
 0x589   : > { %v1625_v20 = vpop.permute.xlu0 %1624 }
 0x58a   : > { %v1807_v37 = vrot.slane %v1806_v53, 2  ;;  %v1790_v38 = vpop.xlane.xlu1 %1789  ;;  %v1627_v61 = vmul.f32 %v1625_v20, %v2981_v36  ;;  %v1628_v19 = vmul.f32 %v1625_v20, %v2997_v50 }
 0x58b   : > { %v1791_v39 = vrot.slane %v1790_v38, 4 }
 0x58c   : > { %v1808_v13 = vadd.f32 %v1807_v37, %v1806_v53  ;;  %v1629_v54 = vadd.f32 %v1627_v61, %v1539_v40  ;;  %v1630_v57 = vadd.f32 %v1628_v19, %v1540_v48 }
 0x58d   : > { %v1792_v41 = vadd.f32 %v1791_v39, %v1790_v38  ;;  %v2266_v38 = vld [vmem:[%s3373_s2 + $0x21] ss:$0 sm:$0xff] }
 0x58e   : > { %v1701_v34 = vpop.permute.xlu1 %1700  ;;  %v1809_v21 = vrot.slane %v1808_v13, 1  ;;  %v1576_v39 = vmul.f32 %v2266_v38, %v2997_v50 }
 0x58f   : > { %v1793_v35 = vrot.slane %v1792_v41, 2  ;;  %v1703_v46 = vmul.f32 %v1701_v34, %v2981_v36  ;;  %v1704_v7 = vmul.f32 %v1701_v34, %v2997_v50 }
 0x590   : > { %v1810_v33 = vadd.f32 %v1809_v21, %v1808_v13 }
 0x591   : > { %1709 = vrot.lane.b32.xlu1 %v1704_v7, %s2412_s6  ;;  %1707 = vrot.lane.b32.xlu0 %v1703_v46, %s2412_s6  ;;  %v1794_v49 = vadd.f32 %v1793_v35, %v1792_v41 }
 0x592   : > { %v1923_v47 = vpop.permute.xlu1 %1922 }
 0x593   : > { %v1795_v55 = vrot.slane %v1794_v49, 1  ;;  %v1927_v3 = vadd.f32 %v1923_v47, %v3232_v60 }
 0x595   : > { %1749 = vrot.lane.b32.xlu1 %v1630_v57, %s2411_s17  ;;  %1747 = vrot.lane.b32.xlu0 %v1629_v54, %s2411_s17  ;;  %v1796_v31 = vadd.f32 %v1795_v55, %v1794_v49  ;;  %v1881_v55 = vmul.f32 %v3248_v24, %v3248_v24 }
 0x596   : > { %v1931_v43 = vpop.permute.xlu1 %1930 }
 0x597   : > { %2282 = vpush %v1796_v31  ;;  %v1935_v4 = vadd.f32 %v1931_v43, %v1927_v3  ;;  %v1882_v31 = vmul.f32 %v3250_v23, %v3250_v23 }
 0x598   : > { %2284 = vpush %v1810_v33 }
 0x59a   : > { %v1298_v59 = vpop.permute.xlu1 %1297 }
 0x59e   : > { %v1939_v8 = vpop.permute.xlu1 %1938 }
 0x59f   : > { %v1943_v2 = vadd.f32 %v1939_v8, %v1935_v4 }
 0x5a1   : > { %v3285_v18 = vadd.f32 %v1945_v12, %v1943_v2 }
 0x5a2   : > { %v1452_v26 = vpop.permute.xlu1 %1451 }
 0x5a3   : > { %v1949_v29 = vsel %vm1785_vm15, %v3285_v18, 0.0  ;;  %v1961_v47 = vmul.f32 %v3285_v18, %v3285_v18 }
 0x5a5   : > { %v1963_v43 = vsel %vm1785_vm15, %v1961_v47, 0.0 }
 0x5c8   : > { %s2283_s24 = spop %2282 }
 0x5c9   : > { %s3278_s12 = smul.f32 0.00390625, %s2283_s24  ;;  %s2285_s13 = spop %2284 }
 0x5ca   : > { %s1813_s14 = smul.f32 0.00390625, %s2285_s13 }
 0x5cb   : > { %s1814_s6 = smul.f32 %s3278_s12, %s3278_s12  ;;  %v1817_v48 = vstv %s3278_s12 }
 0x5cc   : > { %v1818_v50 = vsub.f32 %v3210_v22, %v1817_v48  ;;  %v1819_v21 = vsub.f32 %v3212_v30, %v1817_v48  ;;  %v1883_v22 = vsel %vm1785_vm15, %v1881_v55, 0.0  ;;  %v1884_v30 = vsel %vm1785_vm15, %v1882_v31, 0.0 }
 0x5cd   : > { %s1815_s15 = ssub.f32 %s1813_s14, %s1814_s6  ;;  %v1885_v33 = vadd.f32 %v1884_v30, %v1883_v22  ;;  %s2421_s14 = smov 109  }
 0x5ce   : > { %s2422_s6 = smov 91  }
 0x5cf   : > { %s1816_s20 = smax.f32 %s2420_s16, %s1815_s15  ;;  %s2423_s15 = smov 73  }
 0x5d0   : > { %s1820_s21 = sadd.f32 1e-05, %s1816_s20 }
 0x5d2   : > { %v1821_v44 = vstv %s1820_s21 }
 0x5d3   : > { %2353 = vrsqrt.f32 %v1821_v44 }
 0x5dd   : > { %v2354_v42 = vpop.eup %2353 }
 0x5de   : > { %2286 = vpush %v2354_v42 }
 0x5e0   : > { %v1873_v52 = vpop.xlane.xlu0 %1872 }
 0x5e1   : > { %v1874_v51 = vrot.slane %v1873_v52, 4 }
 0x5e3   : > { %v1875_v58 = vadd.f32 %v1874_v51, %v1873_v52 }
 0x5e4   : > { %v1921_v62 = vpop.permute.xlu0 %1920 }
 0x5e5   : > { %v1876_v63 = vrot.slane %v1875_v58, 2  ;;  %v1926_v14 = vadd.f32 %v1921_v62, %v3190_v27  ;;  %v2242_v27 = vld [vmem:[%s3373_s2 + $0x1b] ss:$0 sm:$0xff] }
 0x5e6   : > { %v1174_v25 = vmul.f32 %v2242_v27, %v2969_v28  ;;  %v1173_v37 = vmul.f32 %v2242_v27, %v2990_v45  ;;  %v1575_v28 = vmul.f32 %v2266_v38, %v2981_v36 }
 0x5e7   : > { %v1877_v0 = vadd.f32 %v1876_v63, %v1875_v58 }
 0x5e8   : > { %v1929_v1 = vpop.permute.xlu0 %1928  ;;  %v1302_v56 = vadd.f32 %v1298_v59, %v1174_v25 }
 0x5e9   : > { %v1878_v6 = vrot.slane %v1877_v0, 1  ;;  %v1934_v16 = vadd.f32 %v1929_v1, %v1926_v14 }
 0x5ea   : > { %v1456_v53 = vadd.f32 %v1452_v26, %v1302_v56 }
 0x5eb   : > { %v1879_v9 = vadd.f32 %v1878_v6, %v1877_v0 }
 0x5ec   : > { %v1296_v10 = vpop.permute.xlu0 %1295  ;;  %v1578_v13 = vadd.f32 %v1576_v39, %v1456_v53 }
 0x5ed   : > { %2288 = vpush %v1879_v9  ;;  %v1301_v20 = vadd.f32 %v1296_v10, %v1173_v37 }
 0x5f0   : > { %v1937_v17 = vpop.permute.xlu0 %1936 }
 0x5f1   : > { %v1942_v5 = vadd.f32 %v1937_v17, %v1934_v16 }
 0x5f3   : > { %v3287_v15 = vadd.f32 %v1945_v12, %v1942_v5 }
 0x5f4   : > { %v1450_v32 = vpop.permute.xlu0 %1449 }
 0x5f5   : > { %v1948_v60 = vsel %vm1785_vm15, %v3287_v15, 0.0  ;;  %v1455_v34 = vadd.f32 %v1450_v32, %v1301_v20  ;;  %v1960_v44 = vmul.f32 %v3287_v15, %v3287_v15 }
 0x5f6   : > { %v1950_v11 = vadd.f32 %v1949_v29, %v1948_v60 }
 0x5f7   : > { %v1577_v46 = vadd.f32 %v1575_v28, %v1455_v34  ;;  %v1962_v42 = vsel %vm1785_vm15, %v1960_v44, 0.0 }
 0x5f8   : > { %1951 = vadd.xlane.f32.xlu0 %v1950_v11  ;;  %v1964_v52 = vadd.f32 %v1963_v43, %v1962_v42 }
 0x603   : > { %v1710_v41 = vpop.permute.xlu1 %1709  ;;  %v1708_v61 = vpop.permute.xlu0 %1707 }
 0x604   : > { %v1714_v19 = vadd.f32 %v1710_v41, %v1578_v13  ;;  %v1713_v45 = vadd.f32 %v1708_v61, %v1577_v46 }
 0x607   : > { %v1750_v35 = vpop.permute.xlu1 %1749  ;;  %v1748_v40 = vpop.permute.xlu0 %1747 }
 0x608   : > { %v1754_v7 = vadd.f32 %v1750_v35, %v1714_v19  ;;  %v1753_v49 = vadd.f32 %v1748_v40, %v1713_v45 }
 0x60a   : > { %2001 = vrot.lane.b32.xlu1 %v1754_v7, %s2413_s25 }
 0x60e   : > { %1999 = vrot.lane.b32.xlu0 %v1753_v49, %s2413_s25  ;;  %s2277_s25 = sld [smem:[#allocation5 + $0x3]] }
 0x60f   : > { %s2287_s7 = spop %2286 }
 0x610   : > { %v1824_v54 = vstv %s2287_s7 }
 0x611   : > { %v3308_v57 = vmul.f32 %v1824_v54, %v1818_v50  ;;  %v3310_v36 = vmul.f32 %v1824_v54, %v1819_v21  ;;  %v1828_v50 = vld [vmem:[%s2548_s10 + $0x9] sm:$0xff]  ;;  %v1827_v54 = vld [vmem:[%s2548_s10 + $0x1] sm:$0xff] }
 0x612   : > { %2007 = vrot.lane.b32.xlu0 %v1753_v49, %s2414_s26 }
 0x614   : > { %v2024_v16 = vstv %s2277_s25  ;;  %s2424_s25 = smov 16  }
 0x616   : > { %2015 = vrot.lane.b32.xlu0 %v1753_v49, %s2415_s27 }
 0x62e   : > { %1886 = vadd.xlane.f32.xlu1 %v1885_v33 }
 0x63f   : > { %2009 = vrot.lane.b32.xlu1 %v1754_v7, %s2414_s26  ;;  %s2289_s26 = spop %2288 }
 0x663   : > { %1965 = vadd.xlane.f32.xlu1 %v1964_v52 }
 0x674   : > { %2017 = vrot.lane.b32.xlu1 %v1754_v7, %s2415_s27  ;;  %s3330_s27 = smul.f32 0.00390625, %s2289_s26  ;;  %s2425_s26 = smov 32  }
 0x676   : > { %s1897_s8 = smul.f32 %s3330_s27, %s3330_s27  ;;  %v1900_v55 = vstv %s3330_s27 }
 0x677   : > { %v1901_v31 = vsub.f32 %v3248_v24, %v1900_v55  ;;  %v1902_v22 = vsub.f32 %v3250_v23, %v1900_v55 }
 0x67c   : > { %v2002_v51 = vpop.permute.xlu1 %2001 }
 0x67d   : > { %v2006_v5 = vadd.f32 %v2002_v51, %v1754_v7 }
 0x685   : > { %v1952_v6 = vpop.xlane.xlu0 %1951 }
 0x686   : > { %v1953_v56 = vrot.slane %v1952_v6, 4 }
 0x688   : > { %v1954_v61 = vadd.f32 %v1953_v56, %v1952_v6 }
 0x689   : > { %v2000_v8 = vpop.permute.xlu0 %1999 }
 0x68a   : > { %v2005_v9 = vadd.f32 %v2000_v8, %v1753_v49  ;;  %v1955_v19 = vrot.slane %v1954_v61, 2 }
 0x68c   : > { %v1956_v46 = vadd.f32 %v1955_v19, %v1954_v61 }
 0x68d   : > { %v2008_v4 = vpop.permute.xlu0 %2007 }
 0x68e   : > { %v2013_v14 = vadd.f32 %v2008_v4, %v2005_v9  ;;  %v1957_v40 = vrot.slane %v1956_v46, 1 }
 0x690   : > { %v1958_v49 = vadd.f32 %v1957_v40, %v1956_v46 }
 0x691   : > { %v2016_v10 = vpop.permute.xlu0 %2015 }
 0x692   : > { %v2021_v12 = vadd.f32 %v2016_v10, %v2013_v14 }
 0x694   : > { %v3328_v60 = vadd.f32 %v2024_v16, %v2021_v12 }
 0x696   : > { %v2039_v26 = vmul.f32 %v3328_v60, %v3328_v60  ;;  %v2027_v53 = vsel %vm1785_vm15, %v3328_v60, 0.0 }
 0x698   : > { %v2041_v39 = vsel %vm1785_vm15, %v2039_v26, 0.0 }
 0x6bb   : > { %v1887_v58 = vpop.xlane.xlu1 %1886 }
 0x6bc   : > { %v1888_v59 = vrot.slane %v1887_v58, 4 }
 0x6be   : > { %v1889_v62 = vadd.f32 %v1888_v59, %v1887_v58 }
 0x6bf   : > { %v2010_v2 = vpop.permute.xlu1 %2009 }
 0x6c0   : > { %v1890_v63 = vrot.slane %v1889_v62, 2  ;;  %v2014_v29 = vadd.f32 %v2010_v2, %v2006_v5 }
 0x6c2   : > { %v1891_v0 = vadd.f32 %v1890_v63, %v1889_v62 }
 0x6c4   : > { %v1892_v1 = vrot.slane %v1891_v0, 1 }
 0x6c6   : > { %v1893_v3 = vadd.f32 %v1892_v1, %v1891_v0 }
 0x6c8   : > { %2290 = vpush %v1893_v3 }
 0x6f0   : > { %v1966_v17 = vpop.xlane.xlu1 %1965 }
 0x6f1   : > { %v1967_v32 = vrot.slane %v1966_v17, 4 }
 0x6f3   : > { %v1968_v13 = vadd.f32 %v1967_v32, %v1966_v17 }
 0x6f4   : > { %v2018_v11 = vpop.permute.xlu1 %2017 }
 0x6f5   : > { %v2022_v27 = vadd.f32 %v2018_v11, %v2014_v29  ;;  %v1969_v28 = vrot.slane %v1968_v13, 2 }
 0x6f7   : > { %v3332_v25 = vadd.f32 %v2024_v16, %v2022_v27  ;;  %v1970_v7 = vadd.f32 %v1969_v28, %v1968_v13 }
 0x6f9   : > { %s2291_s11 = spop %2290  ;;  %v2028_v37 = vsel %vm1785_vm15, %v3332_v25, 0.0  ;;  %v2040_v38 = vmul.f32 %v3332_v25, %v3332_v25  ;;  %v1971_v45 = vrot.slane %v1970_v7, 1 }
 0x6fa   : > { %s1896_s9 = smul.f32 0.00390625, %s2291_s11  ;;  %v2029_v20 = vadd.f32 %v2028_v37, %v2027_v53 }
 0x6fb   : > { %v2042_v41 = vsel %vm1785_vm15, %v2040_v38, 0.0  ;;  %v1972_v21 = vadd.f32 %v1971_v45, %v1970_v7 }
 0x6fc   : > { %s1898_s24 = ssub.f32 %s1896_s9, %s1897_s8  ;;  %2030 = vadd.xlane.f32.xlu0 %v2029_v20  ;;  %v2043_v34 = vadd.f32 %v2042_v41, %v2041_v39 }
 0x6fe   : > { %s1899_s12 = smax.f32 %s2420_s16, %s1898_s24  ;;  %2044 = vadd.xlane.f32.xlu1 %v2043_v34 }
 0x6ff   : > { %s1903_s13 = sadd.f32 1e-05, %s1899_s12 }
 0x701   : > { %v1904_v35 = vstv %s1903_s13 }
 0x702   : > { %2355 = vrsqrt.f32 %v1904_v35 }
 0x70c   : > { %v2356_v48 = vpop.eup %2355 }
 0x70d   : > { %2292 = vpush %v2356_v48 }
 0x70e   : > { %2294 = vpush %v1958_v49 }
 0x70f   : > { %2296 = vpush %v1972_v21  ;;  %1912 = vrot.lane.b32.xlu1 %v1828_v50, %s2421_s14 }
 0x712   : > { %1910 = vrot.lane.b32.xlu0 %v1827_v54, %s2421_s14 }
 0x713   : > { %1991 = vrot.lane.b32.xlu1 %v1828_v50, %s2422_s6 }
 0x716   : > { %1989 = vrot.lane.b32.xlu0 %v1827_v54, %s2422_s6 }
 0x717   : > { %2070 = vrot.lane.b32.xlu1 %v1828_v50, %s2423_s15 }
 0x71a   : > { %2068 = vrot.lane.b32.xlu0 %v1827_v54, %s2423_s15  ;;  %s2280_s15 = sshll.u32 %s3387_s19, 4 }
 0x71b   : > { %1833 = vrot.lane.b32.xlu1 %v1828_v50, %s2411_s17 }
 0x71e   : > { %1831 = vrot.lane.b32.xlu0 %v1827_v54, %s2411_s17 }
 0x73e   : > { %s2293_s20 = spop %2292 }
 0x73f   : > { %v1907_v30 = vstv %s2293_s20  ;;  %s2295_s10 = spop %2294 }
 0x740   : > { %v1908_v33 = vmul.f32 %v1907_v30, %v1901_v31  ;;  %v1909_v44 = vmul.f32 %v1907_v30, %v1902_v22  ;;  %s1974_s21 = smul.f32 0.00390625, %s2295_s10  ;;  %s2297_s22 = spop %2296 }
 0x741   : > { %s1975_s23 = smul.f32 0.00390625, %s2297_s22 }
 0x742   : > { %s1976_s28 = smul.f32 %s1974_s21, %s1974_s21  ;;  %v1979_v43 = vstv %s1974_s21  ;;  %s251_s21 = scalar_lea.vmem %s3376_s5, %s2280_s15 }
 0x743   : > { %v1980_v63 = vsub.f32 %v3287_v15, %v1979_v43  ;;  %v1981_v6 = vsub.f32 %v3285_v18, %v1979_v43 }
 0x744   : > { %s1977_s29 = ssub.f32 %s1975_s23, %s1976_s28 }
 0x746   : > { %s1978_s30 = smax.f32 %s2420_s16, %s1977_s29 }
 0x747   : > { %s1982_s7 = sadd.f32 1e-05, %s1978_s30 }
 0x749   : > { %v1983_v47 = vstv %s1982_s7 }
 0x74a   : > { %2357 = vrsqrt.f32 %v1983_v47 }
 0x754   : > { %v2358_v42 = vpop.eup %2357 }
 0x755   : > { %2298 = vpush %v2358_v42 }
 0x786   : > { %s2299_s17 = spop %2298 }
 0x787   : > { %v1986_v59 = vstv %s2299_s17 }
 0x788   : > { %v1987_v4 = vmul.f32 %v1986_v59, %v1980_v63  ;;  %v1988_v12 = vmul.f32 %v1986_v59, %v1981_v6 }
 0x789   : > { %v2031_v24 = vpop.xlane.xlu0 %2030 }
 0x78a   : > { %v2032_v23 = vrot.slane %v2031_v24, 4 }
 0x78b   : > { %v2045_v52 = vpop.xlane.xlu1 %2044 }
 0x78c   : > { %v2033_v51 = vadd.f32 %v2032_v23, %v2031_v24  ;;  %v2046_v58 = vrot.slane %v2045_v52, 4 }
 0x78d   : > { %v1911_v62 = vpop.permute.xlu0 %1910 }
 0x78e   : > { %v2034_v0 = vrot.slane %v2033_v51, 2  ;;  %v2047_v1 = vadd.f32 %v2046_v58, %v2045_v52  ;;  %v1916_v3 = vadd.f32 %v1911_v62, %v1908_v33 }
 0x78f   : > { %v1913_v8 = vpop.permute.xlu1 %1912 }
 0x790   : > { %v2048_v9 = vrot.slane %v2047_v1, 2  ;;  %v1917_v10 = vadd.f32 %v1913_v8, %v1909_v44  ;;  %2078 = vrot.lane.b32.xlu0 %v1916_v3, %s2424_s25  ;;  %v2035_v2 = vadd.f32 %v2034_v0, %v2033_v51 }
 0x791   : > { %v1990_v14 = vpop.permute.xlu0 %1989 }
 0x792   : > { %v1995_v16 = vadd.f32 %v1990_v14, %v1987_v4  ;;  %2080 = vrot.lane.b32.xlu1 %v1917_v10, %s2424_s25  ;;  %v2036_v17 = vrot.slane %v2035_v2, 1  ;;  %v2049_v5 = vadd.f32 %v2048_v9, %v2047_v1 }
 0x793   : > { %v1992_v29 = vpop.permute.xlu1 %1991 }
 0x794   : > { %v1996_v15 = vadd.f32 %v1992_v29, %v1988_v12  ;;  %2086 = vrot.lane.b32.xlu0 %v1995_v16, %s2425_s26  ;;  %v2037_v11 = vadd.f32 %v2036_v17, %v2035_v2  ;;  %v2050_v27 = vrot.slane %v2049_v5, 1 }
 0x795   : > { %v2069_v41 = vpop.permute.xlu0 %2068 }
 0x796   : > { %2088 = vrot.lane.b32.xlu1 %v1996_v15, %s2425_s26  ;;  %2300 = vpush %v2037_v11  ;;  %v2051_v18 = vadd.f32 %v2050_v27, %v2049_v5 }
 0x797   : > { %v2071_v61 = vpop.permute.xlu1 %2070 }
 0x798   : > { %2302 = vpush %v2051_v18 }
 0x799   : > { %v1832_v19 = vpop.permute.xlu0 %1831 }
 0x79b   : > { %v1834_v28 = vpop.permute.xlu1 %1833 }
 0x79c   : > { %v1838_v40 = vadd.f32 %v1834_v28, %v3310_v36 }
 0x7c7   : > { %s2301_s27 = spop %2300 }
 0x7c8   : > { %s2053_s8 = smul.f32 0.00390625, %s2301_s27 }
 0x7c9   : > { %s2303_s11 = spop %2302 }
 0x7ca   : > { %s2055_s9 = smul.f32 %s2053_s8, %s2053_s8  ;;  %v2058_v32 = vstv %s2053_s8 }
 0x7cb   : > { %s2054_s24 = smul.f32 0.00390625, %s2303_s11  ;;  %v2059_v53 = vsub.f32 %v3328_v60, %v2058_v32  ;;  %v2060_v37 = vsub.f32 %v3332_v25, %v2058_v32  ;;  %v1837_v25 = vadd.f32 %v1832_v19, %v3308_v57 }
 0x7cd   : > { %s2056_s12 = ssub.f32 %s2054_s24, %s2055_s9 }
 0x7cf   : > { %s2057_s13 = smax.f32 %s2420_s16, %s2056_s12  ;;  %s2426_s16 = smov 48  }
 0x7d0   : > { %s2061_s14 = sadd.f32 1e-05, %s2057_s13 }
 0x7d2   : > { %v2062_v26 = vstv %s2061_s14 }
 0x7d3   : > { %2359 = vrsqrt.f32 %v2062_v26 }
 0x7dd   : > { %v2360_v56 = vpop.eup %2359 }
 0x7de   : > { %2304 = vpush %v2360_v56 }
 0x802   : > { %v2079_v35 = vpop.permute.xlu0 %2078 }
 0x803   : > { %v2100_v45 = vsel %vm1785_vm15, %v1837_v25, %v2079_v35 }
 0x804   : > { %v2081_v46 = vpop.permute.xlu1 %2080 }
 0x805   : > { %v2101_v48 = vsel %vm1785_vm15, %v1838_v40, %v2081_v46 }
 0x806   : > { %v2087_v7 = vpop.permute.xlu0 %2086 }
 0x807   : > { %v2103_v49 = vsel %vm2102_vm0, %v2100_v45, %v2087_v7 }
 0x808   : > { %v2089_v60 = vpop.permute.xlu1 %2088 }
 0x809   : > { %v2104_v50 = vsel %vm2102_vm0, %v2101_v48, %v2089_v60 }
 0x80f   : > { %s2305_s6 = spop %2304 }
 0x810   : > { %v2065_v38 = vstv %s2305_s6 }
 0x811   : > { %v2066_v20 = vmul.f32 %v2065_v38, %v2059_v53  ;;  %v2067_v39 = vmul.f32 %v2065_v38, %v2060_v37 }
 0x813   : > { %v2074_v34 = vadd.f32 %v2069_v41, %v2066_v20  ;;  %v2075_v13 = vadd.f32 %v2071_v61, %v2067_v39 }
 0x815   : > { %2096 = vrot.lane.b32.xlu1 %v2075_v13, %s2426_s16  ;;  %2094 = vrot.lane.b32.xlu0 %v2074_v34, %s2426_s16 }
 0x887   : > { %v2097_v21 = vpop.permute.xlu1 %2096  ;;  %v2095_v54 = vpop.permute.xlu0 %2094 }
 0x888   : > { %v2107_v55 = vsel %vm2105_vm1, %v2104_v50, %v2097_v21  ;;  %v2106_v31 = vsel %vm2105_vm1, %v2103_v49, %v2095_v54 }
 0x889   : > { %2110 = vst.msk [vmem:[%s251_s21 + $0x8] sm:$0xff] %vm2108_vm2, %v2107_v55  ;;  %2109 = vst.msk [vmem:[%s251_s21] sm:$0xff] %vm2108_vm2, %v2106_v31 }
 0x88a PF: > { %s17_s18 = sadd.s32 1, %s2405_s18  }
 0x88b   : > { %p14_p5 = scmp.ge.s32.totalorder %s17_s18, 4  }
 0x88d   :  { %16 = sbr.rel (!%p14_p5) target bundleno = 2 (0x2), region = 79 }
 0x894   :  { %2132 = vsyncpa [#allocation4], 1 }
 0x895   :  { %2134 = vsyncpa [#allocation4 + $0x1], 1 }
 0x896   :  { %2135 = vsyncpa [#allocation6], 1 }

</bundles_post_ra>
